<compile_context>
chip_gen: v7x
topology: tpu7x:2x2x1
jax: 0.10.0
libtpu: 0.0.40
codegen_flags: <defaults>
</compile_context>

<pallas_src>
import jax
import jax.numpy as jnp
from jax.experimental import pallas as pl
from jax.experimental.pallas import tpu as pltpu


# ------------------- wrapper-side (trace-time) weight prep -------------------

def _fold_bn(w_hwio, bias, gamma, beta, mean, var, eps=1e-5):
    """Fold eval-mode BatchNorm into conv weights/bias (exact in eval mode)."""
    scale = gamma * jax.lax.rsqrt(var + eps)                  # [Cout]
    return w_hwio * scale, (bias - mean) * scale + beta


def _conv_band_matrices(w_hwio, w_in, n_ow):
    """M[di, wp] : [w_in*Cin, n_ow*Cout] band matrices.

    M[di, wp][(2*ow + wp + dj)*Cin + ci, ow*Cout + co] = w_hwio[di, dj, ci, co]

    For an image laid out as X[h, w*Cin + ci],
        sum_di  X[2*oh + hp + di, :] @ M[di, wp]
    is the conv output at spatial position (2*oh + hp, 2*ow + wp), i.e. the
    (hp, wp) phase of the 2x2 max-pool window.
    """
    kh, kw, cin, cout = w_hwio.shape
    di, wp, dj, ci, ow, co = jnp.meshgrid(
        jnp.arange(kh), jnp.arange(2), jnp.arange(kw), jnp.arange(cin),
        jnp.arange(n_ow), jnp.arange(cout), indexing="ij")
    rows = (2 * ow + wp + dj) * cin + ci
    cols = ow * cout + co
    vals = w_hwio[di, dj, ci, co]
    m = jnp.zeros((kh, 2, w_in * cin, n_ow * cout), w_hwio.dtype)
    return m.at[di.ravel(), wp.ravel(), rows.ravel(), cols.ravel()].set(
        vals.ravel())


def _pool_row_select(n_oh, h_in, kh):
    """S[di, hp] : [n_oh, h_in] one-hot row selectors,
    S[di, hp][oh, 2*oh + hp + di] = 1 (input row feeding output row 2*oh+hp
    at vertical tap di)."""
    di = jnp.arange(kh)[:, None, None, None]
    hp = jnp.arange(2)[None, :, None, None]
    oh = jnp.arange(n_oh)[None, None, :, None]
    col = jnp.arange(h_in)[None, None, None, :]
    return (col == 2 * oh + hp + di).astype(jnp.float32)


# --------------------------- the fused Pallas kernel --------------------------

def _net_kernel(x_ref, s1_ref, m1_ref, b1_ref, s2_ref, m2_ref, b2_ref,
                fc1w_ref, fc1b_ref, fc2w_ref, fc2b_ref, fc3w_ref, fc3b_ref,
                o_ref, p2_scr):
    f32 = jnp.float32
    x = x_ref[0]                                   # [32, 96] = [h, w*3 + c]

    def conv_pool_stage(inp, s_ref, m_ref, b_ref, n_oh, n_cols):
        # Four accumulators = the (h-parity, w-parity) phases of the 2x2 pool.
        acc = [[jnp.zeros((n_oh, n_cols), f32) for _ in range(2)]
               for _ in range(2)]
        for di in range(5):
            rows = [jnp.dot(s_ref[di, hp], inp, preferred_element_type=f32)
                    for hp in range(2)]            # row-selected input slabs
            for wpar in range(2):
                m = m_ref[di, wpar]                # [w_in*Cin, n_ow*Cout]
                for hp in range(2):
                    acc[hp][wpar] = acc[hp][wpar] + jnp.dot(
                        rows[hp], m, preferred_element_type=f32)
        # maxpool(relu(conv + b)) == relu(max(conv phases) + b) (monotone).
        pooled = jnp.maximum(jnp.maximum(acc[0][0], acc[0][1]),
                             jnp.maximum(acc[1][0], acc[1][1]))
        return jnp.maximum(pooled + b_ref[...], 0.0)

    # conv1(3->6,5x5)+BN(folded)+ReLU+pool -> [14, 14*6]
    p1 = conv_pool_stage(x, s1_ref, m1_ref, b1_ref, n_oh=14, n_cols=84)
    # conv2(6->16,5x5)+BN(folded)+ReLU+pool -> [5, 5*16]
    p2 = conv_pool_stage(p1, s2_ref, m2_ref, b2_ref, n_oh=5, n_cols=80)

    # FC stack (dropout = identity in eval mode).
    p2_scr[...] = p2
    z1 = jnp.zeros((1, 120), f32)
    for h in range(5):                             # contract over (h, w*c)
        z1 = z1 + jnp.dot(p2_scr[pl.ds(h, 1), :], fc1w_ref[h],
                          preferred_element_type=f32)
    z1 = jnp.maximum(z1 + fc1b_ref[...], 0.0)
    z2 = jnp.maximum(jnp.dot(z1, fc2w_ref[...],
                             preferred_element_type=f32) + fc2b_ref[...], 0.0)
    z3 = jnp.dot(z2, fc3w_ref[...],
                 preferred_element_type=f32) + fc3b_ref[...]
    o_ref[0] = z3


# ------------------------------- the network ---------------------------------

def net_forward(params, x_nchw):
    B = x_nchw.shape[0]
    n_class = params["fc3_w"].shape[1]

    # NCHW -> NHWC -> per-image 2-D layout [H, W*C] (one small input transpose).
    x2d = jnp.transpose(x_nchw, (0, 2, 3, 1)).astype(jnp.float32)
    x2d = x2d.reshape(B, 32, 32 * 3)

    # Fold eval-mode BN into the conv weights & biases.
    w1f, b1f = _fold_bn(params["w1"], params["b1"], params["g1"],
                        params["bt1"], params["m1"], params["v1"])
    w2f, b2f = _fold_bn(params["w2"], params["b2"], params["g2"],
                        params["bt2"], params["m2"], params["v2"])

    m1 = _conv_band_matrices(w1f, w_in=32, n_ow=14)      # [5, 2, 96, 84]
    m2 = _conv_band_matrices(w2f, w_in=14, n_ow=5)       # [5, 2, 84, 80]
    s1 = _pool_row_select(n_oh=14, h_in=32, kh=5)        # [5, 2, 14, 32]
    s2 = _pool_row_select(n_oh=5, h_in=14, kh=5)         # [5, 2,  5, 14]
    b1row = jnp.tile(b1f, 14).reshape(1, 84)
    b2row = jnp.tile(b2f, 5).reshape(1, 80)

    # fc1 rows are stored in PyTorch (c, h, w) flatten order; permute once to
    # the kernel's (h, w, c) layout so no runtime activation transpose is needed.
    fc1w = params["fc1_w"].reshape(16, 5, 5, 120)
    fc1w = jnp.transpose(fc1w, (1, 2, 0, 3)).reshape(5, 80, 120)
    fc1b = params["fc1_b"].reshape(1, 120)
    fc2w = params["fc2_w"]
    fc2b = params["fc2_b"].reshape(1, 84)
    fc3w = params["fc3_w"]
    fc3b = params["fc3_b"].reshape(1, n_class)

    out = pl.pallas_call(
        _net_kernel,
        out_shape=jax.ShapeDtypeStruct((B, 1, n_class), jnp.float32),
        grid_spec=pltpu.PrefetchScalarGridSpec(
            num_scalar_prefetch=0,
            grid=(B,),
            in_specs=[
                pl.BlockSpec((1, 32, 96), lambda b: (b, 0, 0)),        # x
                pl.BlockSpec((5, 2, 14, 32), lambda b: (0, 0, 0, 0)),  # s1
                pl.BlockSpec((5, 2, 96, 84), lambda b: (0, 0, 0, 0)),  # m1
                pl.BlockSpec((1, 84), lambda b: (0, 0)),               # b1row
                pl.BlockSpec((5, 2, 5, 14), lambda b: (0, 0, 0, 0)),   # s2
                pl.BlockSpec((5, 2, 84, 80), lambda b: (0, 0, 0, 0)),  # m2
                pl.BlockSpec((1, 80), lambda b: (0, 0)),               # b2row
                pl.BlockSpec((5, 80, 120), lambda b: (0, 0, 0)),       # fc1w
                pl.BlockSpec((1, 120), lambda b: (0, 0)),              # fc1b
                pl.BlockSpec((120, 84), lambda b: (0, 0)),             # fc2w
                pl.BlockSpec((1, 84), lambda b: (0, 0)),               # fc2b
                pl.BlockSpec((84, n_class), lambda b: (0, 0)),         # fc3w
                pl.BlockSpec((1, n_class), lambda b: (0, 0)),          # fc3b
            ],
            out_specs=pl.BlockSpec((1, 1, n_class), lambda b: (b, 0, 0)),
            scratch_shapes=[pltpu.VMEM((5, 80), jnp.float32)],
        ),
        compiler_params=pltpu.CompilerParams(
            dimension_semantics=("parallel",)),
    )(x2d, s1, m1, b1row, s2, m2, b2row,
      fc1w, fc1b, fc2w, fc2b, fc3w, fc3b)
    return out.reshape(B, n_class)


def init_params(key, n_class):
    ks = jax.random.split(key, 12)

    def w(k, shape, fan_in):
        return jax.random.normal(k, shape, jnp.float32) / jnp.sqrt(fan_in)

    p = {}
    # conv1: 3 -> 6, k=5 (HWIO)
    p["w1"] = w(ks[0], (5, 5, 3, 6), 5 * 5 * 3)
    p["b1"] = jnp.zeros((6,), jnp.float32)
    p["g1"] = 1.0 + 0.1 * jax.random.normal(ks[1], (6,), jnp.float32)
    p["bt1"] = 0.1 * jax.random.normal(ks[2], (6,), jnp.float32)
    p["m1"] = 0.1 * jax.random.normal(ks[3], (6,), jnp.float32)
    p["v1"] = jax.random.uniform(ks[4], (6,), jnp.float32, 0.5, 1.5)
    # conv2: 6 -> 16, k=5
    p["w2"] = w(ks[5], (5, 5, 6, 16), 5 * 5 * 6)
    p["b2"] = jnp.zeros((16,), jnp.float32)
    p["g2"] = 1.0 + 0.1 * jax.random.normal(ks[6], (16,), jnp.float32)
    p["bt2"] = 0.1 * jax.random.normal(ks[7], (16,), jnp.float32)
    p["m2"] = 0.1 * jax.random.normal(ks[8], (16,), jnp.float32)
    p["v2"] = jax.random.uniform(ks[9], (16,), jnp.float32, 0.5, 1.5)
    # fc layers (stored [in, out]; fc1 rows in PyTorch (c, h, w) flatten order)
    kf = jax.random.split(ks[10], 3)
    p["fc1_w"] = w(kf[0], (16 * 5 * 5, 120), 16 * 5 * 5)
    p["fc1_b"] = jnp.zeros((120,), jnp.float32)
    p["fc2_w"] = w(kf[1], (120, 84), 120)
    p["fc2_b"] = jnp.zeros((84,), jnp.float32)
    p["fc3_w"] = w(kf[2], (84, n_class), 84)
    p["fc3_b"] = jnp.zeros((n_class,), jnp.float32)
    return p


if __name__ == "__main__":
    n_class = 10
    key = jax.random.PRNGKey(0)
    k_x, k_p = jax.random.split(key)

    # Input shape implied by fc1 = 16*5*5: 32x32 RGB images, NCHW.
    x = jax.random.normal(k_x, (2, 3, 32, 32), jnp.float32)
    params = init_params(k_p, n_class)

    fwd = jax.jit(net_forward)
    out = jax.block_until_ready(fwd(params, x))
    assert out.shape == (2, n_class), out.shape
    print("KERNEL_OK")
</pallas_src>

<mosaic_0001>
module attributes {stable_mosaic.version = 11 : i64} {
  func.func @_net_kernel(%arg0: i32, %arg1: memref<1x32x96xf32, #tpu.memory_space<vmem>>, %arg2: memref<5x2x14x32xf32, #tpu.memory_space<vmem>>, %arg3: memref<5x2x96x84xf32, #tpu.memory_space<vmem>>, %arg4: memref<1x84xf32, #tpu.memory_space<vmem>>, %arg5: memref<5x2x5x14xf32, #tpu.memory_space<vmem>>, %arg6: memref<5x2x84x80xf32, #tpu.memory_space<vmem>>, %arg7: memref<1x80xf32, #tpu.memory_space<vmem>>, %arg8: memref<5x80x120xf32, #tpu.memory_space<vmem>>, %arg9: memref<1x120xf32, #tpu.memory_space<vmem>>, %arg10: memref<120x84xf32, #tpu.memory_space<vmem>>, %arg11: memref<1x84xf32, #tpu.memory_space<vmem>>, %arg12: memref<84x10xf32, #tpu.memory_space<vmem>>, %arg13: memref<1x10xf32, #tpu.memory_space<vmem>>, %arg14: memref<1x1x10xf32, #tpu.memory_space<vmem>>, %arg15: memref<5x80xf32, #tpu.memory_space<vmem>>) attributes {dimension_semantics = [#tpu.dimension_semantics<parallel>], iteration_bounds = array<i64: 2>, scalar_prefetch = 0 : i64, scratch_operands = 1 : i64, tpu.core_type = #tpu.core_type<tc>, window_params = [{transform_indices = @transform_0, window_bounds = array<i64: 1, 32, 96>}, {pipeline_mode = #tpu.pipeline_mode<synchronous>, transform_indices = @transform_1, window_bounds = array<i64: 5, 2, 14, 32>}, {pipeline_mode = #tpu.pipeline_mode<synchronous>, transform_indices = @transform_2, window_bounds = array<i64: 5, 2, 96, 84>}, {pipeline_mode = #tpu.pipeline_mode<synchronous>, transform_indices = @transform_3, window_bounds = array<i64: 1, 84>}, {pipeline_mode = #tpu.pipeline_mode<synchronous>, transform_indices = @transform_4, window_bounds = array<i64: 5, 2, 5, 14>}, {pipeline_mode = #tpu.pipeline_mode<synchronous>, transform_indices = @transform_5, window_bounds = array<i64: 5, 2, 84, 80>}, {pipeline_mode = #tpu.pipeline_mode<synchronous>, transform_indices = @transform_6, window_bounds = array<i64: 1, 80>}, {pipeline_mode = #tpu.pipeline_mode<synchronous>, transform_indices = @transform_7, window_bounds = array<i64: 5, 80, 120>}, {pipeline_mode = #tpu.pipeline_mode<synchronous>, transform_indices = @transform_8, window_bounds = array<i64: 1, 120>}, {pipeline_mode = #tpu.pipeline_mode<synchronous>, transform_indices = @transform_9, window_bounds = array<i64: 120, 84>}, {pipeline_mode = #tpu.pipeline_mode<synchronous>, transform_indices = @transform_10, window_bounds = array<i64: 1, 84>}, {pipeline_mode = #tpu.pipeline_mode<synchronous>, transform_indices = @transform_11, window_bounds = array<i64: 84, 10>}, {pipeline_mode = #tpu.pipeline_mode<synchronous>, transform_indices = @transform_12, window_bounds = array<i64: 1, 10>}, {transform_indices = @transform_13, window_bounds = array<i64: 1, 1, 10>}]} {
    %c0 = arith.constant 0 : index
    %c0_0 = arith.constant 0 : index
    %c0_1 = arith.constant 0 : index
    %0 = vector.load %arg1[%c0, %c0_0, %c0_1] : memref<1x32x96xf32, #tpu.memory_space<vmem>>, vector<1x32x96xf32>
    %1 = vector.shape_cast %0 : vector<1x32x96xf32> to vector<32x96xf32>
    %cst = arith.constant 0.000000e+00 : f32
    %2 = vector.broadcast %cst : f32 to vector<14x84xf32>
    %cst_2 = arith.constant 0.000000e+00 : f32
    %3 = vector.broadcast %cst_2 : f32 to vector<14x84xf32>
    %cst_3 = arith.constant 0.000000e+00 : f32
    %4 = vector.broadcast %cst_3 : f32 to vector<14x84xf32>
    %cst_4 = arith.constant 0.000000e+00 : f32
    %5 = vector.broadcast %cst_4 : f32 to vector<14x84xf32>
    %c0_5 = arith.constant 0 : index
    %c0_6 = arith.constant 0 : index
    %c0_7 = arith.constant 0 : index
    %c0_8 = arith.constant 0 : index
    %6 = vector.load %arg2[%c0_5, %c0_6, %c0_7, %c0_8] : memref<5x2x14x32xf32, #tpu.memory_space<vmem>>, vector<1x1x14x32xf32>
    %7 = vector.shape_cast %6 : vector<1x1x14x32xf32> to vector<14x32xf32>
    %cst_9 = arith.constant dense<0.000000e+00> : vector<14x96xf32>
    %8 = tpu.matmul %7, %1, %cst_9 {dimension_numbers = #tpu.dot_dimension_numbers<[1], [0], [0], [1], [0, 0, 1, 1], [], []>} : vector<14x32xf32>, vector<32x96xf32>, vector<14x96xf32> -> vector<14x96xf32>
    %c0_10 = arith.constant 0 : index
    %c1 = arith.constant 1 : index
    %c0_11 = arith.constant 0 : index
    %c0_12 = arith.constant 0 : index
    %9 = vector.load %arg2[%c0_10, %c1, %c0_11, %c0_12] : memref<5x2x14x32xf32, #tpu.memory_space<vmem>>, vector<1x1x14x32xf32>
    %10 = vector.shape_cast %9 : vector<1x1x14x32xf32> to vector<14x32xf32>
    %cst_13 = arith.constant dense<0.000000e+00> : vector<14x96xf32>
    %11 = tpu.matmul %10, %1, %cst_13 {dimension_numbers = #tpu.dot_dimension_numbers<[1], [0], [0], [1], [0, 0, 1, 1], [], []>} : vector<14x32xf32>, vector<32x96xf32>, vector<14x96xf32> -> vector<14x96xf32>
    %c0_14 = arith.constant 0 : index
    %c0_15 = arith.constant 0 : index
    %c0_16 = arith.constant 0 : index
    %c0_17 = arith.constant 0 : index
    %12 = vector.load %arg3[%c0_14, %c0_15, %c0_16, %c0_17] : memref<5x2x96x84xf32, #tpu.memory_space<vmem>>, vector<1x1x96x84xf32>
    %13 = vector.shape_cast %12 : vector<1x1x96x84xf32> to vector<96x84xf32>
    %cst_18 = arith.constant dense<0.000000e+00> : vector<14x84xf32>
    %14 = tpu.matmul %8, %13, %cst_18 {dimension_numbers = #tpu.dot_dimension_numbers<[1], [0], [0], [1], [0, 0, 1, 1], [], []>} : vector<14x96xf32>, vector<96x84xf32>, vector<14x84xf32> -> vector<14x84xf32>
    %15 = arith.addf %2, %14 : vector<14x84xf32>
    %cst_19 = arith.constant dense<0.000000e+00> : vector<14x84xf32>
    %16 = tpu.matmul %11, %13, %cst_19 {dimension_numbers = #tpu.dot_dimension_numbers<[1], [0], [0], [1], [0, 0, 1, 1], [], []>} : vector<14x96xf32>, vector<96x84xf32>, vector<14x84xf32> -> vector<14x84xf32>
    %17 = arith.addf %4, %16 : vector<14x84xf32>
    %c0_20 = arith.constant 0 : index
    %c1_21 = arith.constant 1 : index
    %c0_22 = arith.constant 0 : index
    %c0_23 = arith.constant 0 : index
    %18 = vector.load %arg3[%c0_20, %c1_21, %c0_22, %c0_23] : memref<5x2x96x84xf32, #tpu.memory_space<vmem>>, vector<1x1x96x84xf32>
    %19 = vector.shape_cast %18 : vector<1x1x96x84xf32> to vector<96x84xf32>
    %cst_24 = arith.constant dense<0.000000e+00> : vector<14x84xf32>
    %20 = tpu.matmul %8, %19, %cst_24 {dimension_numbers = #tpu.dot_dimension_numbers<[1], [0], [0], [1], [0, 0, 1, 1], [], []>} : vector<14x96xf32>, vector<96x84xf32>, vector<14x84xf32> -> vector<14x84xf32>
    %21 = arith.addf %3, %20 : vector<14x84xf32>
    %cst_25 = arith.constant dense<0.000000e+00> : vector<14x84xf32>
    %22 = tpu.matmul %11, %19, %cst_25 {dimension_numbers = #tpu.dot_dimension_numbers<[1], [0], [0], [1], [0, 0, 1, 1], [], []>} : vector<14x96xf32>, vector<96x84xf32>, vector<14x84xf32> -> vector<14x84xf32>
    %23 = arith.addf %5, %22 : vector<14x84xf32>
    %c1_26 = arith.constant 1 : index
    %c0_27 = arith.constant 0 : index
    %c0_28 = arith.constant 0 : index
    %c0_29 = arith.constant 0 : index
    %24 = vector.load %arg2[%c1_26, %c0_27, %c0_28, %c0_29] : memref<5x2x14x32xf32, #tpu.memory_space<vmem>>, vector<1x1x14x32xf32>
    %25 = vector.shape_cast %24 : vector<1x1x14x32xf32> to vector<14x32xf32>
    %cst_30 = arith.constant dense<0.000000e+00> : vector<14x96xf32>
    %26 = tpu.matmul %25, %1, %cst_30 {dimension_numbers = #tpu.dot_dimension_numbers<[1], [0], [0], [1], [0, 0, 1, 1], [], []>} : vector<14x32xf32>, vector<32x96xf32>, vector<14x96xf32> -> vector<14x96xf32>
    %c1_31 = arith.constant 1 : index
    %c1_32 = arith.constant 1 : index
    %c0_33 = arith.constant 0 : index
    %c0_34 = arith.constant 0 : index
    %27 = vector.load %arg2[%c1_31, %c1_32, %c0_33, %c0_34] : memref<5x2x14x32xf32, #tpu.memory_space<vmem>>, vector<1x1x14x32xf32>
    %28 = vector.shape_cast %27 : vector<1x1x14x32xf32> to vector<14x32xf32>
    %cst_35 = arith.constant dense<0.000000e+00> : vector<14x96xf32>
    %29 = tpu.matmul %28, %1, %cst_35 {dimension_numbers = #tpu.dot_dimension_numbers<[1], [0], [0], [1], [0, 0, 1, 1], [], []>} : vector<14x32xf32>, vector<32x96xf32>, vector<14x96xf32> -> vector<14x96xf32>
    %c1_36 = arith.constant 1 : index
    %c0_37 = arith.constant 0 : index
    %c0_38 = arith.constant 0 : index
    %c0_39 = arith.constant 0 : index
    %30 = vector.load %arg3[%c1_36, %c0_37, %c0_38, %c0_39] : memref<5x2x96x84xf32, #tpu.memory_space<vmem>>, vector<1x1x96x84xf32>
    %31 = vector.shape_cast %30 : vector<1x1x96x84xf32> to vector<96x84xf32>
    %cst_40 = arith.constant dense<0.000000e+00> : vector<14x84xf32>
    %32 = tpu.matmul %26, %31, %cst_40 {dimension_numbers = #tpu.dot_dimension_numbers<[1], [0], [0], [1], [0, 0, 1, 1], [], []>} : vector<14x96xf32>, vector<96x84xf32>, vector<14x84xf32> -> vector<14x84xf32>
    %33 = arith.addf %15, %32 : vector<14x84xf32>
    %cst_41 = arith.constant dense<0.000000e+00> : vector<14x84xf32>
    %34 = tpu.matmul %29, %31, %cst_41 {dimension_numbers = #tpu.dot_dimension_numbers<[1], [0], [0], [1], [0, 0, 1, 1], [], []>} : vector<14x96xf32>, vector<96x84xf32>, vector<14x84xf32> -> vector<14x84xf32>
    %35 = arith.addf %17, %34 : vector<14x84xf32>
    %c1_42 = arith.constant 1 : index
    %c1_43 = arith.constant 1 : index
    %c0_44 = arith.constant 0 : index
    %c0_45 = arith.constant 0 : index
    %36 = vector.load %arg3[%c1_42, %c1_43, %c0_44, %c0_45] : memref<5x2x96x84xf32, #tpu.memory_space<vmem>>, vector<1x1x96x84xf32>
    %37 = vector.shape_cast %36 : vector<1x1x96x84xf32> to vector<96x84xf32>
    %cst_46 = arith.constant dense<0.000000e+00> : vector<14x84xf32>
    %38 = tpu.matmul %26, %37, %cst_46 {dimension_numbers = #tpu.dot_dimension_numbers<[1], [0], [0], [1], [0, 0, 1, 1], [], []>} : vector<14x96xf32>, vector<96x84xf32>, vector<14x84xf32> -> vector<14x84xf32>
    %39 = arith.addf %21, %38 : vector<14x84xf32>
    %cst_47 = arith.constant dense<0.000000e+00> : vector<14x84xf32>
    %40 = tpu.matmul %29, %37, %cst_47 {dimension_numbers = #tpu.dot_dimension_numbers<[1], [0], [0], [1], [0, 0, 1, 1], [], []>} : vector<14x96xf32>, vector<96x84xf32>, vector<14x84xf32> -> vector<14x84xf32>
    %41 = arith.addf %23, %40 : vector<14x84xf32>
    %c2 = arith.constant 2 : index
    %c0_48 = arith.constant 0 : index
    %c0_49 = arith.constant 0 : index
    %c0_50 = arith.constant 0 : index
    %42 = vector.load %arg2[%c2, %c0_48, %c0_49, %c0_50] : memref<5x2x14x32xf32, #tpu.memory_space<vmem>>, vector<1x1x14x32xf32>
    %43 = vector.shape_cast %42 : vector<1x1x14x32xf32> to vector<14x32xf32>
    %cst_51 = arith.constant dense<0.000000e+00> : vector<14x96xf32>
    %44 = tpu.matmul %43, %1, %cst_51 {dimension_numbers = #tpu.dot_dimension_numbers<[1], [0], [0], [1], [0, 0, 1, 1], [], []>} : vector<14x32xf32>, vector<32x96xf32>, vector<14x96xf32> -> vector<14x96xf32>
    %c2_52 = arith.constant 2 : index
    %c1_53 = arith.constant 1 : index
    %c0_54 = arith.constant 0 : index
    %c0_55 = arith.constant 0 : index
    %45 = vector.load %arg2[%c2_52, %c1_53, %c0_54, %c0_55] : memref<5x2x14x32xf32, #tpu.memory_space<vmem>>, vector<1x1x14x32xf32>
    %46 = vector.shape_cast %45 : vector<1x1x14x32xf32> to vector<14x32xf32>
    %cst_56 = arith.constant dense<0.000000e+00> : vector<14x96xf32>
    %47 = tpu.matmul %46, %1, %cst_56 {dimension_numbers = #tpu.dot_dimension_numbers<[1], [0], [0], [1], [0, 0, 1, 1], [], []>} : vector<14x32xf32>, vector<32x96xf32>, vector<14x96xf32> -> vector<14x96xf32>
    %c2_57 = arith.constant 2 : index
    %c0_58 = arith.constant 0 : index
    %c0_59 = arith.constant 0 : index
    %c0_60 = arith.constant 0 : index
    %48 = vector.load %arg3[%c2_57, %c0_58, %c0_59, %c0_60] : memref<5x2x96x84xf32, #tpu.memory_space<vmem>>, vector<1x1x96x84xf32>
    %49 = vector.shape_cast %48 : vector<1x1x96x84xf32> to vector<96x84xf32>
    %cst_61 = arith.constant dense<0.000000e+00> : vector<14x84xf32>
    %50 = tpu.matmul %44, %49, %cst_61 {dimension_numbers = #tpu.dot_dimension_numbers<[1], [0], [0], [1], [0, 0, 1, 1], [], []>} : vector<14x96xf32>, vector<96x84xf32>, vector<14x84xf32> -> vector<14x84xf32>
    %51 = arith.addf %33, %50 : vector<14x84xf32>
    %cst_62 = arith.constant dense<0.000000e+00> : vector<14x84xf32>
    %52 = tpu.matmul %47, %49, %cst_62 {dimension_numbers = #tpu.dot_dimension_numbers<[1], [0], [0], [1], [0, 0, 1, 1], [], []>} : vector<14x96xf32>, vector<96x84xf32>, vector<14x84xf32> -> vector<14x84xf32>
    %53 = arith.addf %35, %52 : vector<14x84xf32>
    %c2_63 = arith.constant 2 : index
    %c1_64 = arith.constant 1 : index
    %c0_65 = arith.constant 0 : index
    %c0_66 = arith.constant 0 : index
    %54 = vector.load %arg3[%c2_63, %c1_64, %c0_65, %c0_66] : memref<5x2x96x84xf32, #tpu.memory_space<vmem>>, vector<1x1x96x84xf32>
    %55 = vector.shape_cast %54 : vector<1x1x96x84xf32> to vector<96x84xf32>
    %cst_67 = arith.constant dense<0.000000e+00> : vector<14x84xf32>
    %56 = tpu.matmul %44, %55, %cst_67 {dimension_numbers = #tpu.dot_dimension_numbers<[1], [0], [0], [1], [0, 0, 1, 1], [], []>} : vector<14x96xf32>, vector<96x84xf32>, vector<14x84xf32> -> vector<14x84xf32>
    %57 = arith.addf %39, %56 : vector<14x84xf32>
    %cst_68 = arith.constant dense<0.000000e+00> : vector<14x84xf32>
    %58 = tpu.matmul %47, %55, %cst_68 {dimension_numbers = #tpu.dot_dimension_numbers<[1], [0], [0], [1], [0, 0, 1, 1], [], []>} : vector<14x96xf32>, vector<96x84xf32>, vector<14x84xf32> -> vector<14x84xf32>
    %59 = arith.addf %41, %58 : vector<14x84xf32>
    %c3 = arith.constant 3 : index
    %c0_69 = arith.constant 0 : index
    %c0_70 = arith.constant 0 : index
    %c0_71 = arith.constant 0 : index
    %60 = vector.load %arg2[%c3, %c0_69, %c0_70, %c0_71] : memref<5x2x14x32xf32, #tpu.memory_space<vmem>>, vector<1x1x14x32xf32>
    %61 = vector.shape_cast %60 : vector<1x1x14x32xf32> to vector<14x32xf32>
    %cst_72 = arith.constant dense<0.000000e+00> : vector<14x96xf32>
    %62 = tpu.matmul %61, %1, %cst_72 {dimension_numbers = #tpu.dot_dimension_numbers<[1], [0], [0], [1], [0, 0, 1, 1], [], []>} : vector<14x32xf32>, vector<32x96xf32>, vector<14x96xf32> -> vector<14x96xf32>
    %c3_73 = arith.constant 3 : index
    %c1_74 = arith.constant 1 : index
    %c0_75 = arith.constant 0 : index
    %c0_76 = arith.constant 0 : index
    %63 = vector.load %arg2[%c3_73, %c1_74, %c0_75, %c0_76] : memref<5x2x14x32xf32, #tpu.memory_space<vmem>>, vector<1x1x14x32xf32>
    %64 = vector.shape_cast %63 : vector<1x1x14x32xf32> to vector<14x32xf32>
    %cst_77 = arith.constant dense<0.000000e+00> : vector<14x96xf32>
    %65 = tpu.matmul %64, %1, %cst_77 {dimension_numbers = #tpu.dot_dimension_numbers<[1], [0], [0], [1], [0, 0, 1, 1], [], []>} : vector<14x32xf32>, vector<32x96xf32>, vector<14x96xf32> -> vector<14x96xf32>
    %c3_78 = arith.constant 3 : index
    %c0_79 = arith.constant 0 : index
    %c0_80 = arith.constant 0 : index
    %c0_81 = arith.constant 0 : index
    %66 = vector.load %arg3[%c3_78, %c0_79, %c0_80, %c0_81] : memref<5x2x96x84xf32, #tpu.memory_space<vmem>>, vector<1x1x96x84xf32>
    %67 = vector.shape_cast %66 : vector<1x1x96x84xf32> to vector<96x84xf32>
    %cst_82 = arith.constant dense<0.000000e+00> : vector<14x84xf32>
    %68 = tpu.matmul %62, %67, %cst_82 {dimension_numbers = #tpu.dot_dimension_numbers<[1], [0], [0], [1], [0, 0, 1, 1], [], []>} : vector<14x96xf32>, vector<96x84xf32>, vector<14x84xf32> -> vector<14x84xf32>
    %69 = arith.addf %51, %68 : vector<14x84xf32>
    %cst_83 = arith.constant dense<0.000000e+00> : vector<14x84xf32>
    %70 = tpu.matmul %65, %67, %cst_83 {dimension_numbers = #tpu.dot_dimension_numbers<[1], [0], [0], [1], [0, 0, 1, 1], [], []>} : vector<14x96xf32>, vector<96x84xf32>, vector<14x84xf32> -> vector<14x84xf32>
    %71 = arith.addf %53, %70 : vector<14x84xf32>
    %c3_84 = arith.constant 3 : index
    %c1_85 = arith.constant 1 : index
    %c0_86 = arith.constant 0 : index
    %c0_87 = arith.constant 0 : index
    %72 = vector.load %arg3[%c3_84, %c1_85, %c0_86, %c0_87] : memref<5x2x96x84xf32, #tpu.memory_space<vmem>>, vector<1x1x96x84xf32>
    %73 = vector.shape_cast %72 : vector<1x1x96x84xf32> to vector<96x84xf32>
    %cst_88 = arith.constant dense<0.000000e+00> : vector<14x84xf32>
    %74 = tpu.matmul %62, %73, %cst_88 {dimension_numbers = #tpu.dot_dimension_numbers<[1], [0], [0], [1], [0, 0, 1, 1], [], []>} : vector<14x96xf32>, vector<96x84xf32>, vector<14x84xf32> -> vector<14x84xf32>
    %75 = arith.addf %57, %74 : vector<14x84xf32>
    %cst_89 = arith.constant dense<0.000000e+00> : vector<14x84xf32>
    %76 = tpu.matmul %65, %73, %cst_89 {dimension_numbers = #tpu.dot_dimension_numbers<[1], [0], [0], [1], [0, 0, 1, 1], [], []>} : vector<14x96xf32>, vector<96x84xf32>, vector<14x84xf32> -> vector<14x84xf32>
    %77 = arith.addf %59, %76 : vector<14x84xf32>
    %c4 = arith.constant 4 : index
    %c0_90 = arith.constant 0 : index
    %c0_91 = arith.constant 0 : index
    %c0_92 = arith.constant 0 : index
    %78 = vector.load %arg2[%c4, %c0_90, %c0_91, %c0_92] : memref<5x2x14x32xf32, #tpu.memory_space<vmem>>, vector<1x1x14x32xf32>
    %79 = vector.shape_cast %78 : vector<1x1x14x32xf32> to vector<14x32xf32>
    %cst_93 = arith.constant dense<0.000000e+00> : vector<14x96xf32>
    %80 = tpu.matmul %79, %1, %cst_93 {dimension_numbers = #tpu.dot_dimension_numbers<[1], [0], [0], [1], [0, 0, 1, 1], [], []>} : vector<14x32xf32>, vector<32x96xf32>, vector<14x96xf32> -> vector<14x96xf32>
    %c4_94 = arith.constant 4 : index
    %c1_95 = arith.constant 1 : index
    %c0_96 = arith.constant 0 : index
    %c0_97 = arith.constant 0 : index
    %81 = vector.load %arg2[%c4_94, %c1_95, %c0_96, %c0_97] : memref<5x2x14x32xf32, #tpu.memory_space<vmem>>, vector<1x1x14x32xf32>
    %82 = vector.shape_cast %81 : vector<1x1x14x32xf32> to vector<14x32xf32>
    %cst_98 = arith.constant dense<0.000000e+00> : vector<14x96xf32>
    %83 = tpu.matmul %82, %1, %cst_98 {dimension_numbers = #tpu.dot_dimension_numbers<[1], [0], [0], [1], [0, 0, 1, 1], [], []>} : vector<14x32xf32>, vector<32x96xf32>, vector<14x96xf32> -> vector<14x96xf32>
    %c4_99 = arith.constant 4 : index
    %c0_100 = arith.constant 0 : index
    %c0_101 = arith.constant 0 : index
    %c0_102 = arith.constant 0 : index
    %84 = vector.load %arg3[%c4_99, %c0_100, %c0_101, %c0_102] : memref<5x2x96x84xf32, #tpu.memory_space<vmem>>, vector<1x1x96x84xf32>
    %85 = vector.shape_cast %84 : vector<1x1x96x84xf32> to vector<96x84xf32>
    %cst_103 = arith.constant dense<0.000000e+00> : vector<14x84xf32>
    %86 = tpu.matmul %80, %85, %cst_103 {dimension_numbers = #tpu.dot_dimension_numbers<[1], [0], [0], [1], [0, 0, 1, 1], [], []>} : vector<14x96xf32>, vector<96x84xf32>, vector<14x84xf32> -> vector<14x84xf32>
    %87 = arith.addf %69, %86 : vector<14x84xf32>
    %cst_104 = arith.constant dense<0.000000e+00> : vector<14x84xf32>
    %88 = tpu.matmul %83, %85, %cst_104 {dimension_numbers = #tpu.dot_dimension_numbers<[1], [0], [0], [1], [0, 0, 1, 1], [], []>} : vector<14x96xf32>, vector<96x84xf32>, vector<14x84xf32> -> vector<14x84xf32>
    %89 = arith.addf %71, %88 : vector<14x84xf32>
    %c4_105 = arith.constant 4 : index
    %c1_106 = arith.constant 1 : index
    %c0_107 = arith.constant 0 : index
    %c0_108 = arith.constant 0 : index
    %90 = vector.load %arg3[%c4_105, %c1_106, %c0_107, %c0_108] : memref<5x2x96x84xf32, #tpu.memory_space<vmem>>, vector<1x1x96x84xf32>
    %91 = vector.shape_cast %90 : vector<1x1x96x84xf32> to vector<96x84xf32>
    %cst_109 = arith.constant dense<0.000000e+00> : vector<14x84xf32>
    %92 = tpu.matmul %80, %91, %cst_109 {dimension_numbers = #tpu.dot_dimension_numbers<[1], [0], [0], [1], [0, 0, 1, 1], [], []>} : vector<14x96xf32>, vector<96x84xf32>, vector<14x84xf32> -> vector<14x84xf32>
    %93 = arith.addf %75, %92 : vector<14x84xf32>
    %cst_110 = arith.constant dense<0.000000e+00> : vector<14x84xf32>
    %94 = tpu.matmul %83, %91, %cst_110 {dimension_numbers = #tpu.dot_dimension_numbers<[1], [0], [0], [1], [0, 0, 1, 1], [], []>} : vector<14x96xf32>, vector<96x84xf32>, vector<14x84xf32> -> vector<14x84xf32>
    %95 = arith.addf %77, %94 : vector<14x84xf32>
    %96 = arith.maximumf %87, %93 : vector<14x84xf32>
    %97 = arith.maximumf %89, %95 : vector<14x84xf32>
    %98 = arith.maximumf %96, %97 : vector<14x84xf32>
    %c0_111 = arith.constant 0 : index
    %c0_112 = arith.constant 0 : index
    %99 = vector.load %arg4[%c0_111, %c0_112] : memref<1x84xf32, #tpu.memory_space<vmem>>, vector<1x84xf32>
    %100 = vector.broadcast %99 : vector<1x84xf32> to vector<14x84xf32>
    %101 = arith.addf %98, %100 : vector<14x84xf32>
    %cst_113 = arith.constant 0.000000e+00 : f32
    %102 = vector.broadcast %cst_113 : f32 to vector<14x84xf32>
    %103 = arith.maximumf %101, %102 : vector<14x84xf32>
    %cst_114 = arith.constant 0.000000e+00 : f32
    %104 = vector.broadcast %cst_114 : f32 to vector<5x80xf32>
    %cst_115 = arith.constant 0.000000e+00 : f32
    %105 = vector.broadcast %cst_115 : f32 to vector<5x80xf32>
    %cst_116 = arith.constant 0.000000e+00 : f32
    %106 = vector.broadcast %cst_116 : f32 to vector<5x80xf32>
    %cst_117 = arith.constant 0.000000e+00 : f32
    %107 = vector.broadcast %cst_117 : f32 to vector<5x80xf32>
    %c0_118 = arith.constant 0 : index
    %c0_119 = arith.constant 0 : index
    %c0_120 = arith.constant 0 : index
    %c0_121 = arith.constant 0 : index
    %108 = vector.load %arg5[%c0_118, %c0_119, %c0_120, %c0_121] : memref<5x2x5x14xf32, #tpu.memory_space<vmem>>, vector<1x1x5x14xf32>
    %109 = vector.shape_cast %108 : vector<1x1x5x14xf32> to vector<5x14xf32>
    %cst_122 = arith.constant dense<0.000000e+00> : vector<5x84xf32>
    %110 = tpu.matmul %109, %103, %cst_122 {dimension_numbers = #tpu.dot_dimension_numbers<[1], [0], [0], [1], [0, 0, 1, 1], [], []>} : vector<5x14xf32>, vector<14x84xf32>, vector<5x84xf32> -> vector<5x84xf32>
    %c0_123 = arith.constant 0 : index
    %c1_124 = arith.constant 1 : index
    %c0_125 = arith.constant 0 : index
    %c0_126 = arith.constant 0 : index
    %111 = vector.load %arg5[%c0_123, %c1_124, %c0_125, %c0_126] : memref<5x2x5x14xf32, #tpu.memory_space<vmem>>, vector<1x1x5x14xf32>
    %112 = vector.shape_cast %111 : vector<1x1x5x14xf32> to vector<5x14xf32>
    %cst_127 = arith.constant dense<0.000000e+00> : vector<5x84xf32>
    %113 = tpu.matmul %112, %103, %cst_127 {dimension_numbers = #tpu.dot_dimension_numbers<[1], [0], [0], [1], [0, 0, 1, 1], [], []>} : vector<5x14xf32>, vector<14x84xf32>, vector<5x84xf32> -> vector<5x84xf32>
    %c0_128 = arith.constant 0 : index
    %c0_129 = arith.constant 0 : index
    %c0_130 = arith.constant 0 : index
    %c0_131 = arith.constant 0 : index
    %114 = vector.load %arg6[%c0_128, %c0_129, %c0_130, %c0_131] : memref<5x2x84x80xf32, #tpu.memory_space<vmem>>, vector<1x1x84x80xf32>
    %115 = vector.shape_cast %114 : vector<1x1x84x80xf32> to vector<84x80xf32>
    %cst_132 = arith.constant dense<0.000000e+00> : vector<5x80xf32>
    %116 = tpu.matmul %110, %115, %cst_132 {dimension_numbers = #tpu.dot_dimension_numbers<[1], [0], [0], [1], [0, 0, 1, 1], [], []>} : vector<5x84xf32>, vector<84x80xf32>, vector<5x80xf32> -> vector<5x80xf32>
    %117 = arith.addf %104, %116 : vector<5x80xf32>
    %cst_133 = arith.constant dense<0.000000e+00> : vector<5x80xf32>
    %118 = tpu.matmul %113, %115, %cst_133 {dimension_numbers = #tpu.dot_dimension_numbers<[1], [0], [0], [1], [0, 0, 1, 1], [], []>} : vector<5x84xf32>, vector<84x80xf32>, vector<5x80xf32> -> vector<5x80xf32>
    %119 = arith.addf %106, %118 : vector<5x80xf32>
    %c0_134 = arith.constant 0 : index
    %c1_135 = arith.constant 1 : index
    %c0_136 = arith.constant 0 : index
    %c0_137 = arith.constant 0 : index
    %120 = vector.load %arg6[%c0_134, %c1_135, %c0_136, %c0_137] : memref<5x2x84x80xf32, #tpu.memory_space<vmem>>, vector<1x1x84x80xf32>
    %121 = vector.shape_cast %120 : vector<1x1x84x80xf32> to vector<84x80xf32>
    %cst_138 = arith.constant dense<0.000000e+00> : vector<5x80xf32>
    %122 = tpu.matmul %110, %121, %cst_138 {dimension_numbers = #tpu.dot_dimension_numbers<[1], [0], [0], [1], [0, 0, 1, 1], [], []>} : vector<5x84xf32>, vector<84x80xf32>, vector<5x80xf32> -> vector<5x80xf32>
    %123 = arith.addf %105, %122 : vector<5x80xf32>
    %cst_139 = arith.constant dense<0.000000e+00> : vector<5x80xf32>
    %124 = tpu.matmul %113, %121, %cst_139 {dimension_numbers = #tpu.dot_dimension_numbers<[1], [0], [0], [1], [0, 0, 1, 1], [], []>} : vector<5x84xf32>, vector<84x80xf32>, vector<5x80xf32> -> vector<5x80xf32>
    %125 = arith.addf %107, %124 : vector<5x80xf32>
    %c1_140 = arith.constant 1 : index
    %c0_141 = arith.constant 0 : index
    %c0_142 = arith.constant 0 : index
    %c0_143 = arith.constant 0 : index
    %126 = vector.load %arg5[%c1_140, %c0_141, %c0_142, %c0_143] : memref<5x2x5x14xf32, #tpu.memory_space<vmem>>, vector<1x1x5x14xf32>
    %127 = vector.shape_cast %126 : vector<1x1x5x14xf32> to vector<5x14xf32>
    %cst_144 = arith.constant dense<0.000000e+00> : vector<5x84xf32>
    %128 = tpu.matmul %127, %103, %cst_144 {dimension_numbers = #tpu.dot_dimension_numbers<[1], [0], [0], [1], [0, 0, 1, 1], [], []>} : vector<5x14xf32>, vector<14x84xf32>, vector<5x84xf32> -> vector<5x84xf32>
    %c1_145 = arith.constant 1 : index
    %c1_146 = arith.constant 1 : index
    %c0_147 = arith.constant 0 : index
    %c0_148 = arith.constant 0 : index
    %129 = vector.load %arg5[%c1_145, %c1_146, %c0_147, %c0_148] : memref<5x2x5x14xf32, #tpu.memory_space<vmem>>, vector<1x1x5x14xf32>
    %130 = vector.shape_cast %129 : vector<1x1x5x14xf32> to vector<5x14xf32>
    %cst_149 = arith.constant dense<0.000000e+00> : vector<5x84xf32>
    %131 = tpu.matmul %130, %103, %cst_149 {dimension_numbers = #tpu.dot_dimension_numbers<[1], [0], [0], [1], [0, 0, 1, 1], [], []>} : vector<5x14xf32>, vector<14x84xf32>, vector<5x84xf32> -> vector<5x84xf32>
    %c1_150 = arith.constant 1 : index
    %c0_151 = arith.constant 0 : index
    %c0_152 = arith.constant 0 : index
    %c0_153 = arith.constant 0 : index
    %132 = vector.load %arg6[%c1_150, %c0_151, %c0_152, %c0_153] : memref<5x2x84x80xf32, #tpu.memory_space<vmem>>, vector<1x1x84x80xf32>
    %133 = vector.shape_cast %132 : vector<1x1x84x80xf32> to vector<84x80xf32>
    %cst_154 = arith.constant dense<0.000000e+00> : vector<5x80xf32>
    %134 = tpu.matmul %128, %133, %cst_154 {dimension_numbers = #tpu.dot_dimension_numbers<[1], [0], [0], [1], [0, 0, 1, 1], [], []>} : vector<5x84xf32>, vector<84x80xf32>, vector<5x80xf32> -> vector<5x80xf32>
    %135 = arith.addf %117, %134 : vector<5x80xf32>
    %cst_155 = arith.constant dense<0.000000e+00> : vector<5x80xf32>
    %136 = tpu.matmul %131, %133, %cst_155 {dimension_numbers = #tpu.dot_dimension_numbers<[1], [0], [0], [1], [0, 0, 1, 1], [], []>} : vector<5x84xf32>, vector<84x80xf32>, vector<5x80xf32> -> vector<5x80xf32>
    %137 = arith.addf %119, %136 : vector<5x80xf32>
    %c1_156 = arith.constant 1 : index
    %c1_157 = arith.constant 1 : index
    %c0_158 = arith.constant 0 : index
    %c0_159 = arith.constant 0 : index
    %138 = vector.load %arg6[%c1_156, %c1_157, %c0_158, %c0_159] : memref<5x2x84x80xf32, #tpu.memory_space<vmem>>, vector<1x1x84x80xf32>
    %139 = vector.shape_cast %138 : vector<1x1x84x80xf32> to vector<84x80xf32>
    %cst_160 = arith.constant dense<0.000000e+00> : vector<5x80xf32>
    %140 = tpu.matmul %128, %139, %cst_160 {dimension_numbers = #tpu.dot_dimension_numbers<[1], [0], [0], [1], [0, 0, 1, 1], [], []>} : vector<5x84xf32>, vector<84x80xf32>, vector<5x80xf32> -> vector<5x80xf32>
    %141 = arith.addf %123, %140 : vector<5x80xf32>
    %cst_161 = arith.constant dense<0.000000e+00> : vector<5x80xf32>
    %142 = tpu.matmul %131, %139, %cst_161 {dimension_numbers = #tpu.dot_dimension_numbers<[1], [0], [0], [1], [0, 0, 1, 1], [], []>} : vector<5x84xf32>, vector<84x80xf32>, vector<5x80xf32> -> vector<5x80xf32>
    %143 = arith.addf %125, %142 : vector<5x80xf32>
    %c2_162 = arith.constant 2 : index
    %c0_163 = arith.constant 0 : index
    %c0_164 = arith.constant 0 : index
    %c0_165 = arith.constant 0 : index
    %144 = vector.load %arg5[%c2_162, %c0_163, %c0_164, %c0_165] : memref<5x2x5x14xf32, #tpu.memory_space<vmem>>, vector<1x1x5x14xf32>
    %145 = vector.shape_cast %144 : vector<1x1x5x14xf32> to vector<5x14xf32>
    %cst_166 = arith.constant dense<0.000000e+00> : vector<5x84xf32>
    %146 = tpu.matmul %145, %103, %cst_166 {dimension_numbers = #tpu.dot_dimension_numbers<[1], [0], [0], [1], [0, 0, 1, 1], [], []>} : vector<5x14xf32>, vector<14x84xf32>, vector<5x84xf32> -> vector<5x84xf32>
    %c2_167 = arith.constant 2 : index
    %c1_168 = arith.constant 1 : index
    %c0_169 = arith.constant 0 : index
    %c0_170 = arith.constant 0 : index
    %147 = vector.load %arg5[%c2_167, %c1_168, %c0_169, %c0_170] : memref<5x2x5x14xf32, #tpu.memory_space<vmem>>, vector<1x1x5x14xf32>
    %148 = vector.shape_cast %147 : vector<1x1x5x14xf32> to vector<5x14xf32>
    %cst_171 = arith.constant dense<0.000000e+00> : vector<5x84xf32>
    %149 = tpu.matmul %148, %103, %cst_171 {dimension_numbers = #tpu.dot_dimension_numbers<[1], [0], [0], [1], [0, 0, 1, 1], [], []>} : vector<5x14xf32>, vector<14x84xf32>, vector<5x84xf32> -> vector<5x84xf32>
    %c2_172 = arith.constant 2 : index
    %c0_173 = arith.constant 0 : index
    %c0_174 = arith.constant 0 : index
    %c0_175 = arith.constant 0 : index
    %150 = vector.load %arg6[%c2_172, %c0_173, %c0_174, %c0_175] : memref<5x2x84x80xf32, #tpu.memory_space<vmem>>, vector<1x1x84x80xf32>
    %151 = vector.shape_cast %150 : vector<1x1x84x80xf32> to vector<84x80xf32>
    %cst_176 = arith.constant dense<0.000000e+00> : vector<5x80xf32>
    %152 = tpu.matmul %146, %151, %cst_176 {dimension_numbers = #tpu.dot_dimension_numbers<[1], [0], [0], [1], [0, 0, 1, 1], [], []>} : vector<5x84xf32>, vector<84x80xf32>, vector<5x80xf32> -> vector<5x80xf32>
    %153 = arith.addf %135, %152 : vector<5x80xf32>
    %cst_177 = arith.constant dense<0.000000e+00> : vector<5x80xf32>
    %154 = tpu.matmul %149, %151, %cst_177 {dimension_numbers = #tpu.dot_dimension_numbers<[1], [0], [0], [1], [0, 0, 1, 1], [], []>} : vector<5x84xf32>, vector<84x80xf32>, vector<5x80xf32> -> vector<5x80xf32>
    %155 = arith.addf %137, %154 : vector<5x80xf32>
    %c2_178 = arith.constant 2 : index
    %c1_179 = arith.constant 1 : index
    %c0_180 = arith.constant 0 : index
    %c0_181 = arith.constant 0 : index
    %156 = vector.load %arg6[%c2_178, %c1_179, %c0_180, %c0_181] : memref<5x2x84x80xf32, #tpu.memory_space<vmem>>, vector<1x1x84x80xf32>
    %157 = vector.shape_cast %156 : vector<1x1x84x80xf32> to vector<84x80xf32>
    %cst_182 = arith.constant dense<0.000000e+00> : vector<5x80xf32>
    %158 = tpu.matmul %146, %157, %cst_182 {dimension_numbers = #tpu.dot_dimension_numbers<[1], [0], [0], [1], [0, 0, 1, 1], [], []>} : vector<5x84xf32>, vector<84x80xf32>, vector<5x80xf32> -> vector<5x80xf32>
    %159 = arith.addf %141, %158 : vector<5x80xf32>
    %cst_183 = arith.constant dense<0.000000e+00> : vector<5x80xf32>
    %160 = tpu.matmul %149, %157, %cst_183 {dimension_numbers = #tpu.dot_dimension_numbers<[1], [0], [0], [1], [0, 0, 1, 1], [], []>} : vector<5x84xf32>, vector<84x80xf32>, vector<5x80xf32> -> vector<5x80xf32>
    %161 = arith.addf %143, %160 : vector<5x80xf32>
    %c3_184 = arith.constant 3 : index
    %c0_185 = arith.constant 0 : index
    %c0_186 = arith.constant 0 : index
    %c0_187 = arith.constant 0 : index
    %162 = vector.load %arg5[%c3_184, %c0_185, %c0_186, %c0_187] : memref<5x2x5x14xf32, #tpu.memory_space<vmem>>, vector<1x1x5x14xf32>
    %163 = vector.shape_cast %162 : vector<1x1x5x14xf32> to vector<5x14xf32>
    %cst_188 = arith.constant dense<0.000000e+00> : vector<5x84xf32>
    %164 = tpu.matmul %163, %103, %cst_188 {dimension_numbers = #tpu.dot_dimension_numbers<[1], [0], [0], [1], [0, 0, 1, 1], [], []>} : vector<5x14xf32>, vector<14x84xf32>, vector<5x84xf32> -> vector<5x84xf32>
    %c3_189 = arith.constant 3 : index
    %c1_190 = arith.constant 1 : index
    %c0_191 = arith.constant 0 : index
    %c0_192 = arith.constant 0 : index
    %165 = vector.load %arg5[%c3_189, %c1_190, %c0_191, %c0_192] : memref<5x2x5x14xf32, #tpu.memory_space<vmem>>, vector<1x1x5x14xf32>
    %166 = vector.shape_cast %165 : vector<1x1x5x14xf32> to vector<5x14xf32>
    %cst_193 = arith.constant dense<0.000000e+00> : vector<5x84xf32>
    %167 = tpu.matmul %166, %103, %cst_193 {dimension_numbers = #tpu.dot_dimension_numbers<[1], [0], [0], [1], [0, 0, 1, 1], [], []>} : vector<5x14xf32>, vector<14x84xf32>, vector<5x84xf32> -> vector<5x84xf32>
    %c3_194 = arith.constant 3 : index
    %c0_195 = arith.constant 0 : index
    %c0_196 = arith.constant 0 : index
    %c0_197 = arith.constant 0 : index
    %168 = vector.load %arg6[%c3_194, %c0_195, %c0_196, %c0_197] : memref<5x2x84x80xf32, #tpu.memory_space<vmem>>, vector<1x1x84x80xf32>
    %169 = vector.shape_cast %168 : vector<1x1x84x80xf32> to vector<84x80xf32>
    %cst_198 = arith.constant dense<0.000000e+00> : vector<5x80xf32>
    %170 = tpu.matmul %164, %169, %cst_198 {dimension_numbers = #tpu.dot_dimension_numbers<[1], [0], [0], [1], [0, 0, 1, 1], [], []>} : vector<5x84xf32>, vector<84x80xf32>, vector<5x80xf32> -> vector<5x80xf32>
    %171 = arith.addf %153, %170 : vector<5x80xf32>
    %cst_199 = arith.constant dense<0.000000e+00> : vector<5x80xf32>
    %172 = tpu.matmul %167, %169, %cst_199 {dimension_numbers = #tpu.dot_dimension_numbers<[1], [0], [0], [1], [0, 0, 1, 1], [], []>} : vector<5x84xf32>, vector<84x80xf32>, vector<5x80xf32> -> vector<5x80xf32>
    %173 = arith.addf %155, %172 : vector<5x80xf32>
    %c3_200 = arith.constant 3 : index
    %c1_201 = arith.constant 1 : index
    %c0_202 = arith.constant 0 : index
    %c0_203 = arith.constant 0 : index
    %174 = vector.load %arg6[%c3_200, %c1_201, %c0_202, %c0_203] : memref<5x2x84x80xf32, #tpu.memory_space<vmem>>, vector<1x1x84x80xf32>
    %175 = vector.shape_cast %174 : vector<1x1x84x80xf32> to vector<84x80xf32>
    %cst_204 = arith.constant dense<0.000000e+00> : vector<5x80xf32>
    %176 = tpu.matmul %164, %175, %cst_204 {dimension_numbers = #tpu.dot_dimension_numbers<[1], [0], [0], [1], [0, 0, 1, 1], [], []>} : vector<5x84xf32>, vector<84x80xf32>, vector<5x80xf32> -> vector<5x80xf32>
    %177 = arith.addf %159, %176 : vector<5x80xf32>
    %cst_205 = arith.constant dense<0.000000e+00> : vector<5x80xf32>
    %178 = tpu.matmul %167, %175, %cst_205 {dimension_numbers = #tpu.dot_dimension_numbers<[1], [0], [0], [1], [0, 0, 1, 1], [], []>} : vector<5x84xf32>, vector<84x80xf32>, vector<5x80xf32> -> vector<5x80xf32>
    %179 = arith.addf %161, %178 : vector<5x80xf32>
    %c4_206 = arith.constant 4 : index
    %c0_207 = arith.constant 0 : index
    %c0_208 = arith.constant 0 : index
    %c0_209 = arith.constant 0 : index
    %180 = vector.load %arg5[%c4_206, %c0_207, %c0_208, %c0_209] : memref<5x2x5x14xf32, #tpu.memory_space<vmem>>, vector<1x1x5x14xf32>
    %181 = vector.shape_cast %180 : vector<1x1x5x14xf32> to vector<5x14xf32>
    %cst_210 = arith.constant dense<0.000000e+00> : vector<5x84xf32>
    %182 = tpu.matmul %181, %103, %cst_210 {dimension_numbers = #tpu.dot_dimension_numbers<[1], [0], [0], [1], [0, 0, 1, 1], [], []>} : vector<5x14xf32>, vector<14x84xf32>, vector<5x84xf32> -> vector<5x84xf32>
    %c4_211 = arith.constant 4 : index
    %c1_212 = arith.constant 1 : index
    %c0_213 = arith.constant 0 : index
    %c0_214 = arith.constant 0 : index
    %183 = vector.load %arg5[%c4_211, %c1_212, %c0_213, %c0_214] : memref<5x2x5x14xf32, #tpu.memory_space<vmem>>, vector<1x1x5x14xf32>
    %184 = vector.shape_cast %183 : vector<1x1x5x14xf32> to vector<5x14xf32>
    %cst_215 = arith.constant dense<0.000000e+00> : vector<5x84xf32>
    %185 = tpu.matmul %184, %103, %cst_215 {dimension_numbers = #tpu.dot_dimension_numbers<[1], [0], [0], [1], [0, 0, 1, 1], [], []>} : vector<5x14xf32>, vector<14x84xf32>, vector<5x84xf32> -> vector<5x84xf32>
    %c4_216 = arith.constant 4 : index
    %c0_217 = arith.constant 0 : index
    %c0_218 = arith.constant 0 : index
    %c0_219 = arith.constant 0 : index
    %186 = vector.load %arg6[%c4_216, %c0_217, %c0_218, %c0_219] : memref<5x2x84x80xf32, #tpu.memory_space<vmem>>, vector<1x1x84x80xf32>
    %187 = vector.shape_cast %186 : vector<1x1x84x80xf32> to vector<84x80xf32>
    %cst_220 = arith.constant dense<0.000000e+00> : vector<5x80xf32>
    %188 = tpu.matmul %182, %187, %cst_220 {dimension_numbers = #tpu.dot_dimension_numbers<[1], [0], [0], [1], [0, 0, 1, 1], [], []>} : vector<5x84xf32>, vector<84x80xf32>, vector<5x80xf32> -> vector<5x80xf32>
    %189 = arith.addf %171, %188 : vector<5x80xf32>
    %cst_221 = arith.constant dense<0.000000e+00> : vector<5x80xf32>
    %190 = tpu.matmul %185, %187, %cst_221 {dimension_numbers = #tpu.dot_dimension_numbers<[1], [0], [0], [1], [0, 0, 1, 1], [], []>} : vector<5x84xf32>, vector<84x80xf32>, vector<5x80xf32> -> vector<5x80xf32>
    %191 = arith.addf %173, %190 : vector<5x80xf32>
    %c4_222 = arith.constant 4 : index
    %c1_223 = arith.constant 1 : index
    %c0_224 = arith.constant 0 : index
    %c0_225 = arith.constant 0 : index
    %192 = vector.load %arg6[%c4_222, %c1_223, %c0_224, %c0_225] : memref<5x2x84x80xf32, #tpu.memory_space<vmem>>, vector<1x1x84x80xf32>
    %193 = vector.shape_cast %192 : vector<1x1x84x80xf32> to vector<84x80xf32>
    %cst_226 = arith.constant dense<0.000000e+00> : vector<5x80xf32>
    %194 = tpu.matmul %182, %193, %cst_226 {dimension_numbers = #tpu.dot_dimension_numbers<[1], [0], [0], [1], [0, 0, 1, 1], [], []>} : vector<5x84xf32>, vector<84x80xf32>, vector<5x80xf32> -> vector<5x80xf32>
    %195 = arith.addf %177, %194 : vector<5x80xf32>
    %cst_227 = arith.constant dense<0.000000e+00> : vector<5x80xf32>
    %196 = tpu.matmul %185, %193, %cst_227 {dimension_numbers = #tpu.dot_dimension_numbers<[1], [0], [0], [1], [0, 0, 1, 1], [], []>} : vector<5x84xf32>, vector<84x80xf32>, vector<5x80xf32> -> vector<5x80xf32>
    %197 = arith.addf %179, %196 : vector<5x80xf32>
    %198 = arith.maximumf %189, %195 : vector<5x80xf32>
    %199 = arith.maximumf %191, %197 : vector<5x80xf32>
    %200 = arith.maximumf %198, %199 : vector<5x80xf32>
    %c0_228 = arith.constant 0 : index
    %c0_229 = arith.constant 0 : index
    %201 = vector.load %arg7[%c0_228, %c0_229] : memref<1x80xf32, #tpu.memory_space<vmem>>, vector<1x80xf32>
    %202 = vector.broadcast %201 : vector<1x80xf32> to vector<5x80xf32>
    %203 = arith.addf %200, %202 : vector<5x80xf32>
    %cst_230 = arith.constant 0.000000e+00 : f32
    %204 = vector.broadcast %cst_230 : f32 to vector<5x80xf32>
    %205 = arith.maximumf %203, %204 : vector<5x80xf32>
    %c0_231 = arith.constant 0 : index
    %c0_232 = arith.constant 0 : index
    %206 = vector.load %arg15[%c0_231, %c0_232] : memref<5x80xf32, #tpu.memory_space<vmem>>, vector<5x80xf32>
    tpu.vector_store %arg15[%c0_231, %c0_232], %205 {strides = array<i32>} : memref<5x80xf32, #tpu.memory_space<vmem>>, vector<5x80xf32>,
    %cst_233 = arith.constant 0.000000e+00 : f32
    %207 = vector.broadcast %cst_233 : f32 to vector<1x120xf32>
    %c0_234 = arith.constant 0 : index
    %c0_235 = arith.constant 0 : index
    %208 = vector.load %arg15[%c0_234, %c0_235] : memref<5x80xf32, #tpu.memory_space<vmem>>, vector<1x80xf32>
    %c0_236 = arith.constant 0 : index
    %c0_237 = arith.constant 0 : index
    %c0_238 = arith.constant 0 : index
    %209 = vector.load %arg8[%c0_236, %c0_237, %c0_238] : memref<5x80x120xf32, #tpu.memory_space<vmem>>, vector<1x80x120xf32>
    %210 = vector.shape_cast %209 : vector<1x80x120xf32> to vector<80x120xf32>
    %cst_239 = arith.constant dense<0.000000e+00> : vector<1x120xf32>
    %211 = tpu.matmul %208, %210, %cst_239 {dimension_numbers = #tpu.dot_dimension_numbers<[1], [0], [0], [1], [0, 0, 1, 1], [], []>} : vector<1x80xf32>, vector<80x120xf32>, vector<1x120xf32> -> vector<1x120xf32>
    %212 = arith.addf %207, %211 : vector<1x120xf32>
    %c1_240 = arith.constant 1 : index
    %c0_241 = arith.constant 0 : index
    %213 = vector.load %arg15[%c1_240, %c0_241] : memref<5x80xf32, #tpu.memory_space<vmem>>, vector<1x80xf32>
    %c1_242 = arith.constant 1 : index
    %c0_243 = arith.constant 0 : index
    %c0_244 = arith.constant 0 : index
    %214 = vector.load %arg8[%c1_242, %c0_243, %c0_244] : memref<5x80x120xf32, #tpu.memory_space<vmem>>, vector<1x80x120xf32>
    %215 = vector.shape_cast %214 : vector<1x80x120xf32> to vector<80x120xf32>
    %cst_245 = arith.constant dense<0.000000e+00> : vector<1x120xf32>
    %216 = tpu.matmul %213, %215, %cst_245 {dimension_numbers = #tpu.dot_dimension_numbers<[1], [0], [0], [1], [0, 0, 1, 1], [], []>} : vector<1x80xf32>, vector<80x120xf32>, vector<1x120xf32> -> vector<1x120xf32>
    %217 = arith.addf %212, %216 : vector<1x120xf32>
    %c2_246 = arith.constant 2 : index
    %c0_247 = arith.constant 0 : index
    %218 = vector.load %arg15[%c2_246, %c0_247] : memref<5x80xf32, #tpu.memory_space<vmem>>, vector<1x80xf32>
    %c2_248 = arith.constant 2 : index
    %c0_249 = arith.constant 0 : index
    %c0_250 = arith.constant 0 : index
    %219 = vector.load %arg8[%c2_248, %c0_249, %c0_250] : memref<5x80x120xf32, #tpu.memory_space<vmem>>, vector<1x80x120xf32>
    %220 = vector.shape_cast %219 : vector<1x80x120xf32> to vector<80x120xf32>
    %cst_251 = arith.constant dense<0.000000e+00> : vector<1x120xf32>
    %221 = tpu.matmul %218, %220, %cst_251 {dimension_numbers = #tpu.dot_dimension_numbers<[1], [0], [0], [1], [0, 0, 1, 1], [], []>} : vector<1x80xf32>, vector<80x120xf32>, vector<1x120xf32> -> vector<1x120xf32>
    %222 = arith.addf %217, %221 : vector<1x120xf32>
    %c3_252 = arith.constant 3 : index
    %c0_253 = arith.constant 0 : index
    %223 = vector.load %arg15[%c3_252, %c0_253] : memref<5x80xf32, #tpu.memory_space<vmem>>, vector<1x80xf32>
    %c3_254 = arith.constant 3 : index
    %c0_255 = arith.constant 0 : index
    %c0_256 = arith.constant 0 : index
    %224 = vector.load %arg8[%c3_254, %c0_255, %c0_256] : memref<5x80x120xf32, #tpu.memory_space<vmem>>, vector<1x80x120xf32>
    %225 = vector.shape_cast %224 : vector<1x80x120xf32> to vector<80x120xf32>
    %cst_257 = arith.constant dense<0.000000e+00> : vector<1x120xf32>
    %226 = tpu.matmul %223, %225, %cst_257 {dimension_numbers = #tpu.dot_dimension_numbers<[1], [0], [0], [1], [0, 0, 1, 1], [], []>} : vector<1x80xf32>, vector<80x120xf32>, vector<1x120xf32> -> vector<1x120xf32>
    %227 = arith.addf %222, %226 : vector<1x120xf32>
    %c4_258 = arith.constant 4 : index
    %c0_259 = arith.constant 0 : index
    %228 = vector.load %arg15[%c4_258, %c0_259] : memref<5x80xf32, #tpu.memory_space<vmem>>, vector<1x80xf32>
    %c4_260 = arith.constant 4 : index
    %c0_261 = arith.constant 0 : index
    %c0_262 = arith.constant 0 : index
    %229 = vector.load %arg8[%c4_260, %c0_261, %c0_262] : memref<5x80x120xf32, #tpu.memory_space<vmem>>, vector<1x80x120xf32>
    %230 = vector.shape_cast %229 : vector<1x80x120xf32> to vector<80x120xf32>
    %cst_263 = arith.constant dense<0.000000e+00> : vector<1x120xf32>
    %231 = tpu.matmul %228, %230, %cst_263 {dimension_numbers = #tpu.dot_dimension_numbers<[1], [0], [0], [1], [0, 0, 1, 1], [], []>} : vector<1x80xf32>, vector<80x120xf32>, vector<1x120xf32> -> vector<1x120xf32>
    %232 = arith.addf %227, %231 : vector<1x120xf32>
    %c0_264 = arith.constant 0 : index
    %c0_265 = arith.constant 0 : index
    %233 = vector.load %arg9[%c0_264, %c0_265] : memref<1x120xf32, #tpu.memory_space<vmem>>, vector<1x120xf32>
    %234 = arith.addf %232, %233 : vector<1x120xf32>
    %cst_266 = arith.constant 0.000000e+00 : f32
    %235 = vector.broadcast %cst_266 : f32 to vector<1x120xf32>
    %236 = arith.maximumf %234, %235 : vector<1x120xf32>
    %c0_267 = arith.constant 0 : index
    %c0_268 = arith.constant 0 : index
    %237 = vector.load %arg10[%c0_267, %c0_268] : memref<120x84xf32, #tpu.memory_space<vmem>>, vector<120x84xf32>
    %cst_269 = arith.constant dense<0.000000e+00> : vector<1x84xf32>
    %238 = tpu.matmul %236, %237, %cst_269 {dimension_numbers = #tpu.dot_dimension_numbers<[1], [0], [0], [1], [0, 0, 1, 1], [], []>} : vector<1x120xf32>, vector<120x84xf32>, vector<1x84xf32> -> vector<1x84xf32>
    %c0_270 = arith.constant 0 : index
    %c0_271 = arith.constant 0 : index
    %239 = vector.load %arg11[%c0_270, %c0_271] : memref<1x84xf32, #tpu.memory_space<vmem>>, vector<1x84xf32>
    %240 = arith.addf %238, %239 : vector<1x84xf32>
    %cst_272 = arith.constant 0.000000e+00 : f32
    %241 = vector.broadcast %cst_272 : f32 to vector<1x84xf32>
    %242 = arith.maximumf %240, %241 : vector<1x84xf32>
    %c0_273 = arith.constant 0 : index
    %c0_274 = arith.constant 0 : index
    %243 = vector.load %arg12[%c0_273, %c0_274] : memref<84x10xf32, #tpu.memory_space<vmem>>, vector<84x10xf32>
    %cst_275 = arith.constant dense<0.000000e+00> : vector<1x10xf32>
    %244 = tpu.matmul %242, %243, %cst_275 {dimension_numbers = #tpu.dot_dimension_numbers<[1], [0], [0], [1], [0, 0, 1, 1], [], []>} : vector<1x84xf32>, vector<84x10xf32>, vector<1x10xf32> -> vector<1x10xf32>
    %c0_276 = arith.constant 0 : index
    %c0_277 = arith.constant 0 : index
    %245 = vector.load %arg13[%c0_276, %c0_277] : memref<1x10xf32, #tpu.memory_space<vmem>>, vector<1x10xf32>
    %246 = arith.addf %244, %245 : vector<1x10xf32>
    %c0_278 = arith.constant 0 : index
    %c0_279 = arith.constant 0 : index
    %c0_280 = arith.constant 0 : index
    %247 = vector.load %arg14[%c0_278, %c0_279, %c0_280] : memref<1x1x10xf32, #tpu.memory_space<vmem>>, vector<1x1x10xf32>
    %248 = vector.shape_cast %247 : vector<1x1x10xf32> to vector<1x10xf32>
    %249 = vector.shape_cast %246 : vector<1x10xf32> to vector<1x1x10xf32>
    tpu.vector_store %arg14[%c0_278, %c0_279, %c0_280], %249 {strides = array<i32>} : memref<1x1x10xf32, #tpu.memory_space<vmem>>, vector<1x1x10xf32>,
    return
  }
  func.func @transform_0(%arg0: i32) -> (i32, i32, i32) {
    %c0_i32 = arith.constant 0 : i32
    %c0_i32_0 = arith.constant 0 : i32
    %c0_i32_1 = arith.constant 0 : i32
    return %arg0, %c0_i32, %c0_i32_0 : i32, i32, i32
  }
  func.func @transform_1(%arg0: i32) -> (i32, i32, i32, i32) {
    %c0_i32 = arith.constant 0 : i32
    %c0_i32_0 = arith.constant 0 : i32
    %c0_i32_1 = arith.constant 0 : i32
    %c0_i32_2 = arith.constant 0 : i32
    %c0_i32_3 = arith.constant 0 : i32
    return %c0_i32, %c0_i32_0, %c0_i32_1, %c0_i32_2 : i32, i32, i32, i32
  }
  func.func @transform_2(%arg0: i32) -> (i32, i32, i32, i32) {
    %c0_i32 = arith.constant 0 : i32
    %c0_i32_0 = arith.constant 0 : i32
    %c0_i32_1 = arith.constant 0 : i32
    %c0_i32_2 = arith.constant 0 : i32
    %c0_i32_3 = arith.constant 0 : i32
    return %c0_i32, %c0_i32_0, %c0_i32_1, %c0_i32_2 : i32, i32, i32, i32
  }
  func.func @transform_3(%arg0: i32) -> (i32, i32) {
    %c0_i32 = arith.constant 0 : i32
    %c0_i32_0 = arith.constant 0 : i32
    %c0_i32_1 = arith.constant 0 : i32
    return %c0_i32, %c0_i32_0 : i32, i32
  }
  func.func @transform_4(%arg0: i32) -> (i32, i32, i32, i32) {
    %c0_i32 = arith.constant 0 : i32
    %c0_i32_0 = arith.constant 0 : i32
    %c0_i32_1 = arith.constant 0 : i32
    %c0_i32_2 = arith.constant 0 : i32
    %c0_i32_3 = arith.constant 0 : i32
    return %c0_i32, %c0_i32_0, %c0_i32_1, %c0_i32_2 : i32, i32, i32, i32
  }
  func.func @transform_5(%arg0: i32) -> (i32, i32, i32, i32) {
    %c0_i32 = arith.constant 0 : i32
    %c0_i32_0 = arith.constant 0 : i32
    %c0_i32_1 = arith.constant 0 : i32
    %c0_i32_2 = arith.constant 0 : i32
    %c0_i32_3 = arith.constant 0 : i32
    return %c0_i32, %c0_i32_0, %c0_i32_1, %c0_i32_2 : i32, i32, i32, i32
  }
  func.func @transform_6(%arg0: i32) -> (i32, i32) {
    %c0_i32 = arith.constant 0 : i32
    %c0_i32_0 = arith.constant 0 : i32
    %c0_i32_1 = arith.constant 0 : i32
    return %c0_i32, %c0_i32_0 : i32, i32
  }
  func.func @transform_7(%arg0: i32) -> (i32, i32, i32) {
    %c0_i32 = arith.constant 0 : i32
    %c0_i32_0 = arith.constant 0 : i32
    %c0_i32_1 = arith.constant 0 : i32
    %c0_i32_2 = arith.constant 0 : i32
    return %c0_i32, %c0_i32_0, %c0_i32_1 : i32, i32, i32
  }
  func.func @transform_8(%arg0: i32) -> (i32, i32) {
    %c0_i32 = arith.constant 0 : i32
    %c0_i32_0 = arith.constant 0 : i32
    %c0_i32_1 = arith.constant 0 : i32
    return %c0_i32, %c0_i32_0 : i32, i32
  }
  func.func @transform_9(%arg0: i32) -> (i32, i32) {
    %c0_i32 = arith.constant 0 : i32
    %c0_i32_0 = arith.constant 0 : i32
    %c0_i32_1 = arith.constant 0 : i32
    return %c0_i32, %c0_i32_0 : i32, i32
  }
  func.func @transform_10(%arg0: i32) -> (i32, i32) {
    %c0_i32 = arith.constant 0 : i32
    %c0_i32_0 = arith.constant 0 : i32
    %c0_i32_1 = arith.constant 0 : i32
    return %c0_i32, %c0_i32_0 : i32, i32
  }
  func.func @transform_11(%arg0: i32) -> (i32, i32) {
    %c0_i32 = arith.constant 0 : i32
    %c0_i32_0 = arith.constant 0 : i32
    %c0_i32_1 = arith.constant 0 : i32
    return %c0_i32, %c0_i32_0 : i32, i32
  }
  func.func @transform_12(%arg0: i32) -> (i32, i32) {
    %c0_i32 = arith.constant 0 : i32
    %c0_i32_0 = arith.constant 0 : i32
    %c0_i32_1 = arith.constant 0 : i32
    return %c0_i32, %c0_i32_0 : i32, i32
  }
  func.func @transform_13(%arg0: i32) -> (i32, i32, i32) {
    %c0_i32 = arith.constant 0 : i32
    %c0_i32_0 = arith.constant 0 : i32
    %c0_i32_1 = arith.constant 0 : i32
    return %arg0, %c0_i32, %c0_i32_0 : i32, i32, i32
  }
}

</mosaic_0001>

<bundles_post_ra>
// kernel: tile.13
= control target key start
LH: loop header
LB: loop body
LE: loop exit
PB: predicated region body
PF: predicated region fallthrough
CT: control target
= control target key end

     0   :  { %s28_s0 = inlined_call_operand.vmem [shape: f32[6], index: 0, kind: input, shape index: {}]   ;;  %s29_s1 = inlined_call_operand.vmem [shape: f32[14,6], index: 1, kind: output, shape index: {}]  }
   0x1   :  { %v4_v0 = vld [vmem:[%s28_s0] ss:$0 sm:$0xff] }
   0x2   :  { %5 = vst [vmem:[%s29_s1] sm:$0xff] %v4_v0  ;;  %8 = vst [vmem:[%s29_s1 + $0x8] sm:$0xff] %v4_v0 }

// kernel: tile.14
= control target key start
LH: loop header
LB: loop body
LE: loop exit
PB: predicated region body
PF: predicated region fallthrough
CT: control target
= control target key end

     0   :  { %s115_s10 = smov 78   ;;  %s116_s11 = smov 66   ;;  %vm3_vm0 = vcmask 48128   ;;  %vm9_vm1 = vcmask 687728   ;;  %vm15_vm2 = vcmask 638528   ;;  %vm21_vm3 = vcmask 589328   ;;  %s183_s0 = inlined_call_operand.vmem [shape: f32[14,6], index: 0, kind: input, shape index: {}]   ;;  %s184_s1 = inlined_call_operand.vmem [shape: f32[1,84], index: 1, kind: output, shape index: {}]  }
   0x1   :  { %v89_v0 = vld [vmem:[%s183_s0 + $0xd] sm:$0x1]   ;;  %v91_v1 = vld [vmem:[%s183_s0 + $0xb] sm:$0x1]   ;;  %v90_v2 = vld [vmem:[%s183_s0 + $0xc] sm:$0x1]  }
   0x2   :  { %7 = vrot.lane.b32.xlu0 %v89_v0, %s115_s10  ;;  %19 = vrot.lane.b32.xlu1 %v91_v1, %s116_s11  ;;  %v92_v3 = vld [vmem:[%s183_s0 + $0xa] sm:$0x1]   ;;  %s117_s16 = smov 72   ;;  %s118_s17 = smov 60   ;;  %v93_v4 = vld [vmem:[%s183_s0 + $0x9] sm:$0x1]  }
   0x3   :  { %v94_v5 = vld [vmem:[%s183_s0 + $0x8] sm:$0x1]   ;;  %v2_v6 = vld [vmem:[%s183_s0] sm:$0x1]   ;;  %s119_s24 = smov 54   ;;  %s120_s25 = smov 48  }
   0x4   :  { %4 = vst.msk [vmem:[#allocation0] sm:$0x1] %vm3_vm0, %v2_v6   ;;  %v95_v7 = vld [vmem:[%s183_s0 + $0x7] sm:$0x1]   ;;  %v96_v8 = vld [vmem:[%s183_s0 + $0x6] sm:$0x1]  }
   0x5   :  { %s121_s30 = smov 42   ;;  %s122_s2 = smov 36   ;;  %v97_v9 = vld [vmem:[%s183_s0 + $0x5] sm:$0x1]   ;;  %v98_v10 = vld [vmem:[%s183_s0 + $0x4] sm:$0x1]  }
   0x6   :  { %13 = vrot.lane.b32.xlu0 %v90_v2, %s117_s16  ;;  %25 = vrot.lane.b32.xlu1 %v92_v3, %s118_s17  ;;  %s123_s7 = smov 30   ;;  %s124_s8 = smov 24   ;;  %v99_v11 = vld [vmem:[%s183_s0 + $0x3] sm:$0x1]   ;;  %v100_v12 = vld [vmem:[%s183_s0 + $0x2] sm:$0x1]  }
   0x7   :  { %s125_s13 = smov 18   ;;  %s126_s14 = smov 12   ;;  %v101_v13 = vld [vmem:[%s183_s0 + $0x1] sm:$0x1]   ;;  %vm27_vm4 = vcmask 540128   ;;  %vm33_vm5 = vcmask 490928  }
   0x8   :  { %s127_s0 = smov 6   ;;  %vm39_vm6 = vcmask 441728   ;;  %vm45_vm7 = vcmask 392528   ;;  %vm51_vm8 = vcmask 343328   ;;  %vm57_vm9 = vcmask 294128  }
   0x9   :  { %vm63_vm10 = vcmask 244928   ;;  %vm69_vm11 = vcmask 195728   ;;  %vm75_vm12 = vcmask 146528   ;;  %vm81_vm13 = vcmask 97328  }
   0xa   :  { %31 = vrot.lane.b32.xlu0 %v93_v4, %s119_s24  ;;  %37 = vrot.lane.b32.xlu1 %v94_v5, %s120_s25 }
   0xe   :  { %43 = vrot.lane.b32.xlu0 %v95_v7, %s121_s30  ;;  %49 = vrot.lane.b32.xlu1 %v96_v8, %s122_s2 }
  0x12   :  { %55 = vrot.lane.b32.xlu0 %v97_v9, %s123_s7  ;;  %61 = vrot.lane.b32.xlu1 %v98_v10, %s124_s8 }
  0x16   :  { %67 = vrot.lane.b32.xlu0 %v99_v11, %s125_s13  ;;  %73 = vrot.lane.b32.xlu1 %v100_v12, %s126_s14 }
  0x1a   :  { %79 = vrot.lane.b32.xlu0 %v101_v13, %s127_s0 }
  0x74   :  { %v8_v14 = vpop.permute.xlu0 %7   ;;  %v20_v15 = vpop.permute.xlu1 %19  }
  0x75   :  { %10 = vst.msk [vmem:[#allocation0] sm:$0x1] %vm9_vm1, %v8_v14  }
  0x78   :  { %v14_v16 = vpop.permute.xlu0 %13   ;;  %v26_v17 = vpop.permute.xlu1 %25  }
  0x79   :  { %16 = vst.msk [vmem:[#allocation0] sm:$0x1] %vm15_vm2, %v14_v16  }
  0x7a   :  { %22 = vst.msk [vmem:[#allocation0] sm:$0x1] %vm21_vm3, %v20_v15  }
  0x7b   :  { %28 = vst.msk [vmem:[#allocation0] sm:$0x1] %vm27_vm4, %v26_v17  }
  0x7c   :  { %v32_v18 = vpop.permute.xlu0 %31   ;;  %v38_v19 = vpop.permute.xlu1 %37  }
  0x7d   :  { %34 = vst.msk [vmem:[#allocation0] sm:$0x1] %vm33_vm5, %v32_v18  }
  0x7e   :  { %40 = vst.msk [vmem:[#allocation0] sm:$0x1] %vm39_vm6, %v38_v19  }
  0x80   :  { %v44_v20 = vpop.permute.xlu0 %43   ;;  %v50_v21 = vpop.permute.xlu1 %49  }
  0x81   :  { %46 = vst.msk [vmem:[#allocation0] sm:$0x1] %vm45_vm7, %v44_v20  }
  0x82   :  { %52 = vst.msk [vmem:[#allocation0] sm:$0x1] %vm51_vm8, %v50_v21  }
  0x84   :  { %v56_v22 = vpop.permute.xlu0 %55   ;;  %v62_v23 = vpop.permute.xlu1 %61  }
  0x85   :  { %58 = vst.msk [vmem:[#allocation0] sm:$0x1] %vm57_vm9, %v56_v22  }
  0x86   :  { %64 = vst.msk [vmem:[#allocation0] sm:$0x1] %vm63_vm10, %v62_v23  }
  0x88   :  { %v68_v24 = vpop.permute.xlu0 %67   ;;  %v74_v25 = vpop.permute.xlu1 %73  }
  0x89   :  { %70 = vst.msk [vmem:[#allocation0] sm:$0x1] %vm69_vm11, %v68_v24  }
  0x8a   :  { %76 = vst.msk [vmem:[#allocation0] sm:$0x1] %vm75_vm12, %v74_v25  }
  0x8c   :  { %v80_v26 = vpop.permute.xlu0 %79  }
  0x8d   :  { %82 = vst.msk [vmem:[#allocation0] sm:$0x1] %vm81_vm13, %v80_v26  }
  0x94   :  { %v86_v27 = vld [vmem:[#allocation0] sm:$0x1] }
  0x95   :  { %88 = vst [vmem:[%s184_s1] sm:$0x1] %v86_v27 }

// kernel: tile.18
= control target key start
LH: loop header
LB: loop body
LE: loop exit
PB: predicated region body
PF: predicated region fallthrough
CT: control target
= control target key end

     0   :  { %s22_s0 = inlined_call_operand.vmem [shape: f32[16], index: 0, kind: input, shape index: {}]   ;;  %s23_s1 = inlined_call_operand.vmem [shape: f32[5,16], index: 1, kind: output, shape index: {}]  }
   0x1   :  { %v4_v0 = vld [vmem:[%s22_s0] ss:$0 sm:$0xff] }
   0x2   :  { %5 = vst [vmem:[%s23_s1] sm:$0xff] %v4_v0 }

// kernel: tile.19
= control target key start
LH: loop header
LB: loop body
LE: loop exit
PB: predicated region body
PF: predicated region fallthrough
CT: control target
= control target key end

     0   :  { %s43_s10 = smov 64   ;;  %s44_s11 = smov 32   ;;  %vm3_vm0 = vcmask 130048   ;;  %vm9_vm1 = vcmask 654848   ;;  %vm15_vm2 = vcmask 523648   ;;  %vm21_vm3 = vcmask 392448   ;;  %s75_s0 = inlined_call_operand.vmem [shape: f32[5,16], index: 0, kind: input, shape index: {}]   ;;  %s76_s1 = inlined_call_operand.vmem [shape: f32[1,80], index: 1, kind: output, shape index: {}]  }
   0x1   :  { %v35_v0 = vld [vmem:[%s75_s0 + $0x4] sm:$0x1]   ;;  %v37_v1 = vld [vmem:[%s75_s0 + $0x2] sm:$0x1]   ;;  %v36_v2 = vld [vmem:[%s75_s0 + $0x3] sm:$0x1]  }
   0x2   :  { %7 = vrot.lane.b32.xlu0 %v35_v0, %s43_s10  ;;  %19 = vrot.lane.b32.xlu1 %v37_v1, %s44_s11  ;;  %v38_v3 = vld [vmem:[%s75_s0 + $0x1] sm:$0x1]   ;;  %v2_v4 = vld [vmem:[%s75_s0] sm:$0x1]   ;;  %s45_s0 = smov 48   ;;  %s46_s18 = smov 16  }
   0x3   :  { %4 = vst.msk [vmem:[#allocation0] sm:$0x1] %vm3_vm0, %v2_v4   ;;  %vm27_vm4 = vcmask 261248  }
   0x6   :  { %13 = vrot.lane.b32.xlu0 %v36_v2, %s45_s0  ;;  %25 = vrot.lane.b32.xlu1 %v38_v3, %s46_s18 }
  0x74   :  { %v8_v5 = vpop.permute.xlu0 %7   ;;  %v20_v6 = vpop.permute.xlu1 %19  }
  0x75   :  { %10 = vst.msk [vmem:[#allocation0] sm:$0x1] %vm9_vm1, %v8_v5  }
  0x78   :  { %v14_v7 = vpop.permute.xlu0 %13   ;;  %v26_v8 = vpop.permute.xlu1 %25  }
  0x79   :  { %16 = vst.msk [vmem:[#allocation0] sm:$0x1] %vm15_vm2, %v14_v7  }
  0x7a   :  { %22 = vst.msk [vmem:[#allocation0] sm:$0x1] %vm21_vm3, %v20_v6  }
  0x7b   :  { %28 = vst.msk [vmem:[#allocation0] sm:$0x1] %vm27_vm4, %v26_v8  }
  0x82   :  { %v32_v9 = vld [vmem:[#allocation0] sm:$0x1] }
  0x83   :  { %34 = vst [vmem:[%s76_s1] sm:$0x1] %v32_v9 }

// kernel: net_forward.1
= control target key start
LH: loop header
LB: loop body
LE: loop exit
PB: predicated region body
PF: predicated region fallthrough
CT: control target
= control target key end

     0   :  { %s11414_s0 = inlined_call_operand.vmem [shape: f32[2,32,96], index: 0, kind: input, shape index: {}]   ;;  %s11415_s1 = inlined_call_operand.vmem [shape: f32[5,2,14,32], index: 1, kind: input, shape index: {}]   ;;  %s11416_s2 = inlined_call_operand.vmem [shape: f32[5,2,96,84], index: 2, kind: input, shape index: {}]   ;;  %s11417_s3 = inlined_call_operand.vmem [shape: f32[1,84], index: 3, kind: input, shape index: {}]   ;;  %s11418_s4 = inlined_call_operand.vmem [shape: f32[5,2,5,14], index: 4, kind: input, shape index: {}]   ;;  %s11419_s5 = inlined_call_operand.vmem [shape: f32[5,2,84,80], index: 5, kind: input, shape index: {}]   ;;  %s11420_s6 = inlined_call_operand.vmem [shape: f32[1,80], index: 6, kind: input, shape index: {}]   ;;  %s11421_s7 = inlined_call_operand.vmem [shape: f32[5,80,120], index: 7, kind: input, shape index: {}]   ;;  %s11422_s8 = inlined_call_operand.vmem [shape: f32[1,120], index: 8, kind: input, shape index: {}]   ;;  %s11423_s9 = inlined_call_operand.vmem [shape: f32[120,84], index: 9, kind: input, shape index: {}]   ;;  %s11424_s10 = inlined_call_operand.vmem [shape: f32[1,84], index: 10, kind: input, shape index: {}]   ;;  %s11425_s11 = inlined_call_operand.vmem [shape: f32[84,10], index: 11, kind: input, shape index: {}]   ;;  %s11426_s12 = inlined_call_operand.vmem [shape: f32[1,10], index: 12, kind: input, shape index: {}]   ;;  %s11427_s13 = inlined_call_operand.hbm [shape: f32[2,1,10], index: 13, kind: output, shape index: {}]  }
   0x1   :  { %11428 = sst [smem:[#allocation7_spill]] %s11414_s0 }
   0x2   :  { %11429 = sst [smem:[#allocation8_spill]] %s11415_s1 }
   0x3   :  { %18 = vsyncpa [#allocation4], 0 }
   0x4   :  { %20 = vsyncpa [#allocation4 + $0x1], 0  ;;  %s9811_s25 = smov 0   ;;  %s9813_s26 = smov 0  }
   0x5   :  { %s9815_s27 = smov 0   ;;  %s9817_s28 = smov 0  }
   0x6 LB: > { %s9832_s29 = sadd.s32 4294967295, %s9734_s28   ;;  %s6054_s30 = sadd.s32 4294967294, %s9734_s28   ;;  %s9734_s28 = sphi %s9817_s28, %s11441_s28   ;;  %s9730_s27 = sphi %s9815_s27, %s11440_s27   ;;  %s9726_s26 = sphi %s9813_s26, %s11439_s26   ;;  %s9722_s25 = sphi %s9811_s25, %s11438_s25  }
   0x7   : > { %s9836_s14 = sadd.s32 1, %s9734_s28   ;;  %s311_s15 = sadd.s32 1, %s9730_s27 }
   0x8   : > { %s308_s16 = ssub.s32 %s9734_s28, %s9836_s14  ;;  %p321_p0 = scmp.ne.s32.totalorder %s9730_s27, %s9726_s26 }
   0x9   : > { %p309_p1 = scmp.eq.s32.totalorder %s308_s16, 0  ;;  %p322_p2 = scmp.eq.s32.totalorder %s9832_s29, 1 }
   0xa   : > { %p327_p3 = scmp.ne.s32.totalorder %s9726_s26, %s9722_s25  ;;  %p328_p4 = scmp.eq.s32.totalorder %s6054_s30, 1 }
   0xb   : > { %s9847_s17 = scalar_select %p309_p1, %s9730_s27, %s311_s15  }
   0xc   : > { %p9849_p5 = por %p322_p2, %p321_p0  ;;  %p9853_p6 = por %p328_p4, %p327_p3 }
   0xd   : > { %11430 = sst [smem:[#allocation6_spill]] %s9847_s17  ;;  %p6057_p7 = scmp.ge.s32.totalorder %s9734_s28, 1 }
   0xe   : > { %p390_p8 = scmp.lt.s32.totalorder %s9734_s28, 3 }
  0x10   : > { %p391_p9 = pnand %p6057_p7, %p390_p8 }
  0x11   : > { %p433_p10 = scmp.lt.s32.totalorder (!%p391_p9), %s9832_s29, 1  ;;  %s11433_s1 = sld [smem:[#allocation8_spill]] (!%p391_p9)  ;;  %vm444_vm0 = vcmask (!%p391_p9), 261120   ;;  %v6086_v8 = vld [vmem:[%s11416_s2 + $0xc0] sm:$0xff] (!%p391_p9)  ;;  %v6087_v9 = vld [vmem:[%s11416_s2 + $0xc8] sm:$0xff] (!%p391_p9)  ;;  %v6088_v11 = vld [vmem:[%s11416_s2 + $0xd0] sm:$0xff] (!%p391_p9) }
  0x12   : > { %394 = sbr.rel (%p391_p9) target bundleno = 3238 (0xca6), region = 72  ;;  %s11434_s0 = sld [smem:[#allocation7_spill]] (!%p391_p9)  ;;  %v8586_v10 = vpack.c.bf16 (!%p391_p9), %v6087_v9, %v6086_v8  ;;  %v6089_v12 = vld [vmem:[%s11416_s2 + $0xd8] sm:$0xff] (!%p391_p9)  ;;  %v6090_v17 = vld [vmem:[%s11416_s2 + $0xe0] sm:$0xff] (!%p391_p9)  ;;  %v6091_v18 = vld [vmem:[%s11416_s2 + $0xe8] sm:$0xff] (!%p391_p9)  ;;  %vm816_vm1 = vcmask (!%p391_p9), 785408  }
  0x13   : > { %v8590_v16 = vpack.c.bf16 (!%p391_p9), %v6089_v12, %v6088_v11  ;;  %v8594_v19 = vpack.c.bf16 (!%p391_p9), %v6091_v18, %v6090_v17  ;;  %v6092_v20 = vld [vmem:[%s11416_s2 + $0xf0] sm:$0xff] (!%p391_p9)  ;;  %v6093_v21 = vld [vmem:[%s11416_s2 + $0xf8] sm:$0xff] (!%p391_p9)  ;;  %v6094_v25 = vld [vmem:[%s11416_s2 + $0x100] sm:$0xff] (!%p391_p9)  ;;  %vm9737_vm2 = vmmov (!%p391_p9), 0   ;;  %vm3018_vm3 = vcmask (!%p391_p9), 1045504   ;;  %s6464_s21 = sshll.u32 (!%p391_p9), %s9832_s29, 4 }
  0x14   : > { %v8598_v24 = vpack.c.bf16 (!%p391_p9), %v6093_v21, %v6092_v20  ;;  %v6095_v26 = vld [vmem:[%s11416_s2 + $0x108] sm:$0xff] (!%p391_p9)  ;;  %v6096_v28 = vld [vmem:[%s11416_s2 + $0x110] sm:$0xff] (!%p391_p9)  ;;  %v6097_v29 = vld [vmem:[%s11416_s2 + $0x118] sm:$0xff] (!%p391_p9)  ;;  %vm9739_vm4 = vmmov (!%p391_p9), 1   ;;  %vm3014_vm6 = vcmask (!%p391_p9), 113664   ;;  %vm3356_vm7 = vcmask (!%p391_p9), 1043456  }
  0x15   : > { %v8602_v27 = vpack.c.bf16 (!%p391_p9), %v6095_v26, %v6094_v25  ;;  %v8606_v31 = vpack.c.bf16 (!%p391_p9), %v6097_v29, %v6096_v28  ;;  %v610_v32 = vld [vmem:[%s11416_s2] sm:$0xff] (!%p391_p9)  ;;  %v611_v33 = vld [vmem:[%s11416_s2 + $0x8] sm:$0xff] (!%p391_p9)  ;;  %v612_v35 = vld [vmem:[%s11416_s2 + $0x10] sm:$0xff] (!%p391_p9)  ;;  %vm3352_vm8 = vcmask (!%p391_p9), 687104   ;;  %vm5372_vm9 = vcmask (!%p391_p9), 651264  }
  0x16   : > { %v8610_v34 = vpack.c.bf16 (!%p391_p9), %v611_v33, %v610_v32  ;;  %v613_v36 = vld [vmem:[%s11416_s2 + $0x18] sm:$0xff] (!%p391_p9)  ;;  %v614_v42 = vld [vmem:[%s11416_s2 + $0x20] sm:$0xff] (!%p391_p9)  ;;  %v615_v43 = vld [vmem:[%s11416_s2 + $0x28] sm:$0xff] (!%p391_p9)  ;;  %vm5397_vm10 = vcmask (!%p391_p9), 654336   ;;  %vm5821_vm11 = vcmask (!%p391_p9), 982016   ;;  %vm5984_vm12 = vcmask (!%p391_p9), 73728  }
  0x17   : > { %v442_v0 = vld [vmem:[%s11433_s1] sm:$0xff] (!%p391_p9)  ;;  %v443_v13 = vld [vmem:[%s11433_s1 + $0x8] sm:$0x3f] (!%p391_p9)  ;;  %v6062_v15 = vld [vmem:[%s11433_s1 + $0x10] sm:$0xff] (!%p391_p9)  ;;  %v8614_v41 = vpack.c.bf16 (!%p391_p9), %v613_v36, %v612_v35  ;;  %v8618_v44 = vpack.c.bf16 (!%p391_p9), %v615_v43, %v614_v42 }
  0x18   : > { %v6078_v1 = vld [vmem:[%s11433_s1 + $0x20] sm:$0xff] (!%p391_p9)  ;;  %7169 = vmatprep.mubr.msk.f32.mxu1 (!%p391_p9), %vm444_vm0, %v442_v0  ;;  %v6079_v14 = vld [vmem:[%s11433_s1 + $0x28] sm:$0x3f] (!%p391_p9)  ;;  %v6063_v22 = vld [vmem:[%s11433_s1 + $0x18] sm:$0x3f] (!%p391_p9) }
  0x19   : > { %7191 = vmatprep.mubr.msk.f32.mxu0 %vm444_vm0, %v6078_v1  ;;  %s434_s24 = scalar_select %p433_p10, %s9832_s29, 1  ;;  %v6082_v23 = vld [vmem:[%s11433_s1 + $0x30] sm:$0xff]  ;;  %v6083_v30 = vld [vmem:[%s11433_s1 + $0x38] sm:$0x3f]  ;;  %v618_v50 = vld [vmem:[%s11416_s2 + $0x40] sm:$0xff] }
  0x1a   : > { %v616_v45 = vld [vmem:[%s11416_s2 + $0x30] sm:$0xff]  ;;  %v617_v46 = vld [vmem:[%s11416_s2 + $0x38] sm:$0xff]  ;;  %v619_v51 = vld [vmem:[%s11416_s2 + $0x48] sm:$0xff]  ;;  %s9740_s29 = smov [#allocation3]  }
  0x1b   : > { %s6467_s30 = sshll.u32 %s434_s24, 5  ;;  %v8622_v49 = vpack.c.bf16 %v617_v46, %v616_v45  ;;  %v8626_v52 = vpack.c.bf16 %v619_v51, %v618_v50  ;;  %v620_v53 = vld [vmem:[%s11416_s2 + $0x50] sm:$0xff]  ;;  %v621_v54 = vld [vmem:[%s11416_s2 + $0x58] sm:$0xff]  ;;  %v6106_v58 = vld [vmem:[%s11416_s2 + $0x120] sm:$0xff]  ;;  %s9676_s20 = sshll.u32 %s9740_s29, 4  ;;  %s9677_s20 = int_to_ptr.vmem [resolvable:$false] %s9676_s20 }
  0x1c   : > { %s437_s17 = scalar_lea.vmem %s11434_s0, %s6467_s30  ;;  %v8630_v57 = vpack.c.bf16 %v621_v54, %v620_v53  ;;  %v6107_v59 = vld [vmem:[%s11416_s2 + $0x128] sm:$0xff]  ;;  %v6108_v61 = vld [vmem:[%s11416_s2 + $0x130] sm:$0xff]  ;;  %v6109_v62 = vld [vmem:[%s11416_s2 + $0x138] sm:$0xff]  ;;  %s431_s0 = sand.u32 1, %s9726_s26  }
  0x1d   : > { %v438_v2 = vld [vmem:[%s437_s17] sm:$0xff]  ;;  %v439_v3 = vld [vmem:[%s437_s17 + $0x8] sm:$0xff]  ;;  %v440_v4 = vld [vmem:[%s437_s17 + $0x10] sm:$0xff]  ;;  %v8682_v60 = vpack.c.bf16 %v6107_v59, %v6106_v58  ;;  %v8686_v63 = vpack.c.bf16 %v6109_v62, %v6108_v61  ;;  %s432_s22 = scalar_lea.vmem [#allocation3], %s431_s0  ;;  %s11372_s30 = scalar_lea.hbm %s11427_s13, %s6464_s21 }
  0x1e   : > { %v9872_v5 = vpack.c.bf16 %v439_v3, %v438_v2  ;;  %v441_v6 = vld [vmem:[%s437_s17 + $0x18] sm:$0xff]  ;;  %v6110_v0 = vld [vmem:[%s11416_s2 + $0x140] sm:$0xff]  ;;  %v6111_v1 = vld [vmem:[%s11416_s2 + $0x148] sm:$0xff]  ;;  %s5999_s23 = sshll.u32 %s432_s22, 4  ;;  %s5987_s15 = scalar_lea.sflag [#allocation4], %s431_s0  ;;  %s11374_s23 = int_to_ptr.vmem [resolvable:$true] %s5999_s23 }
  0x1f   : > { %v9874_v7 = vpack.c.bf16 %v441_v6, %v440_v4  ;;  %v8690_v2 = vpack.c.bf16 %v6111_v1, %v6110_v0  ;;  %v6112_v3 = vld [vmem:[%s11416_s2 + $0x150] sm:$0xff]  ;;  %v6113_v4 = vld [vmem:[%s11416_s2 + $0x158] sm:$0xff]  ;;  %v6114_v8 = vld [vmem:[%s11416_s2 + $0x160] sm:$0xff]  ;;  %s9672_s16 = scalar_lea.vmem %s11374_s23, 16  ;;  %p9679_p0 = scmp.lt.s32.totalorder %s11374_s23, %s9677_s20 }
  0x20   : > { %8555 = vmatprep.subr.bf16.mxu1 %v9872_v5  ;;  %8571 = vmatprep.subr.bf16.mxu0 %v9872_v5  ;;  %v8694_v6 = vpack.c.bf16 %v6113_v4, %v6112_v3  ;;  %v6115_v9 = vld [vmem:[%s11416_s2 + $0x168] sm:$0xff]  ;;  %v6116_v11 = vld [vmem:[%s11416_s2 + $0x170] sm:$0xff]  ;;  %v6117_v12 = vld [vmem:[%s11416_s2 + $0x178] sm:$0xff]  ;;  %p9673_p11 = scmp.ne.s32.totalorder %s11374_s23, %s9672_s16 }
  0x21   : > { %8557 = vmatpush3.bf16.msra.mxu1 %v9872_v5  ;;  %8573 = vmatpush3.bf16.msra.mxu0 %v9872_v5  ;;  %v6068_v17 = vld [vmem:[%s11416_s2 + $0x70] sm:$0xff]  ;;  %v6069_v18 = vld [vmem:[%s11416_s2 + $0x78] sm:$0xff]  ;;  %v6070_v20 = vld [vmem:[%s11416_s2 + $0x80] sm:$0xff] }
  0x22   : > { %8559 = vmatprep.subr.bf16.mxu1 %v9874_v7  ;;  %8575 = vmatprep.subr.bf16.mxu0 %v9874_v7  ;;  %v6071_v21 = vld [vmem:[%s11416_s2 + $0x88] sm:$0xff]  ;;  %v6074_v26 = vld [vmem:[%s11416_s2 + $0xa0] sm:$0xff]  ;;  %v6076_v29 = vld [vmem:[%s11416_s2 + $0xb0] sm:$0xff]  ;;  %p9674_p12 = pnand %p9673_p11, %p9849_p5 }
  0x23   : > { %v6126_v32 = vld [vmem:[%s11433_s1 + $0x40] sm:$0xff]  ;;  %v6136_v36 = vld [vmem:[%s11416_s2 + $0x190] sm:$0xff]  ;;  %v6153_v58 = vld [vmem:[%s11416_s2 + $0x1f8] sm:$0xff] }
  0x24   : > { %v6134_v33 = vld [vmem:[%s11416_s2 + $0x180] sm:$0xff]  ;;  %v6140_v43 = vld [vmem:[%s11416_s2 + $0x1b0] sm:$0xff]  ;;  %vm10421_vm5 = vmpackc.low %vm3018_vm3, %vm9739_vm4  ;;  %p9675_p13 = pneg %p9674_p12 }
  0x25   : > { %8561 = vmatpush3.bf16.msra.mxu1 %v9874_v7  ;;  %8577 = vmatpush3.bf16.msra.mxu0 %v9874_v7  ;;  %v6130_v45 = vld [vmem:[%s11433_s1 + $0x50] sm:$0xff]  ;;  %v6150_v54 = vld [vmem:[%s11416_s2 + $0x1e0] sm:$0xff] }
  0x26   : > { %8563 = vmatprep.subr.bf16.mxu1 %v9872_v5  ;;  %8587 = vmatprep.subr.bf16.mxu0 %v8586_v10  ;;  %v6144_v51 = vld [vmem:[%s11416_s2 + $0x1d0] sm:$0xff]  ;;  %v6154_v62 = vld [vmem:[%s11416_s2 + $0x200] sm:$0xff] }
  0x27   : > { %v6156_v1 = vld [vmem:[%s11416_s2 + $0x210] sm:$0xff]  ;;  %v6158_v4 = vld [vmem:[%s11416_s2 + $0x220] sm:$0xff] }
  0x28   : > { %7170 = vmatmul.mubr.msk.f32.vlgmr.msra.gmra.mrb[0].mxu1 %vm444_vm0, %v443_v13  ;;  %7192 = vmatmul.mubr.msk.f32.vlgmr.msra.gmra.mrb[0].mxu0 %vm444_vm0, %v6079_v14  ;;  %v8702_v13 = vpack.c.bf16 %v6117_v12, %v6116_v11  ;;  %v6066_v14 = vld [vmem:[%s11416_s2 + $0x60] sm:$0xff] }
  0x29   : > { %8565 = vmatpush3.bf16.msra.mxu1 %v9872_v5  ;;  %7180 = vmatprep.mubr.msk.f32.mxu1 %vm444_vm0, %v6062_v15  ;;  %v6067_v15 = vld [vmem:[%s11416_s2 + $0x68] sm:$0xff] }
  0x2a   : > { %8567 = vmatprep.subr.bf16.mxu1 %v9874_v7  ;;  %8589 = vmatpush3.bf16.msra.mxu0 %v8586_v10 }
  0x2b   : > { %8591 = vmatprep.subr.bf16.mxu0 %v8590_v16 }
  0x2d   : > { %8569 = vmatpush3.bf16.msra.mxu1 %v9874_v7 }
  0x2e   : > { %8579 = vmatprep.subr.bf16.mxu1 %v9872_v5  ;;  %8593 = vmatpush3.bf16.msra.mxu0 %v8590_v16 }
  0x2f   : > { %8595 = vmatprep.subr.bf16.mxu0 %v8594_v19 }
  0x30   : > { %7181 = vmatmul.mubr.msk.f32.vlgmr.msra.gmra.mrb[2].mxu1 %vm444_vm0, %v6063_v22  ;;  %v8714_v22 = vpack.c.bf16 %v6071_v21, %v6070_v20  ;;  %v6167_v20 = vld [vmem:[%s11433_s1 + $0x68] sm:$0x3f] }
  0x31   : > { %8581 = vmatpush3.bf16.msra.mxu1 %v9872_v5  ;;  %7202 = vmatprep.mubr.msk.f32.mxu1 %vm444_vm0, %v6082_v23  ;;  %v6072_v23 = vld [vmem:[%s11416_s2 + $0x90] sm:$0xff] }
  0x32   : > { %8583 = vmatprep.subr.bf16.mxu1 %v9874_v7  ;;  %8597 = vmatpush3.bf16.msra.mxu0 %v8594_v19 }
  0x33   : > { %8599 = vmatprep.subr.bf16.mxu0 %v8598_v24 }
  0x35   : > { %8585 = vmatpush3.bf16.msra.mxu1 %v9874_v7 }
  0x36   : > { %8601 = vmatpush3.bf16.msra.mxu0 %v8598_v24  ;;  %8635 = vmatprep.subr.bf16.mxu1 %v8586_v10 }
  0x37   : > { %8603 = vmatprep.subr.bf16.mxu0 %v8602_v27 }
  0x38   : > { %7203 = vmatmul.mubr.msk.f32.vlgmr.msra.gmra.mrb[4].mxu1 %vm444_vm0, %v6083_v30  ;;  %v6077_v30 = vld [vmem:[%s11416_s2 + $0xb8] sm:$0xff] }
  0x39   : > { %8637 = vmatpush3.bf16.msra.mxu1 %v8586_v10  ;;  %v8698_v10 = vpack.c.bf16 %v6115_v9, %v6114_v8  ;;  %v6160_v9 = vld [vmem:[%s11416_s2 + $0x230] sm:$0xff] }
  0x3a   : > { %8605 = vmatpush3.bf16.msra.mxu0 %v8602_v27  ;;  %8639 = vmatprep.subr.bf16.mxu1 %v8590_v16 }
  0x3b   : > { %8607 = vmatprep.subr.bf16.mxu0 %v8606_v31 }
  0x3d   : > { %8641 = vmatpush3.bf16.msra.mxu1 %v8590_v16  ;;  %v8706_v16 = vpack.c.bf16 %v6067_v15, %v6066_v14  ;;  %v6166_v14 = vld [vmem:[%s11433_s1 + $0x60] sm:$0xff] }
  0x3e   : > { %8609 = vmatpush3.bf16.msra.mxu0 %v8606_v31  ;;  %8643 = vmatprep.subr.bf16.mxu1 %v8594_v19  ;;  %v6174_v15 = vld [vmem:[%s11416_s2 + $0x240] sm:$0xff] }
  0x3f   : > { %8611 = vmatprep.subr.bf16.mxu0 %v8610_v34 }
  0x41   : > { %8645 = vmatpush3.bf16.msra.mxu1 %v8594_v19  ;;  %v8710_v19 = vpack.c.bf16 %v6069_v18, %v6068_v17  ;;  %v6176_v18 = vld [vmem:[%s11416_s2 + $0x250] sm:$0xff] }
  0x42   : > { %8647 = vmatprep.subr.bf16.mxu1 %v8598_v24 }
  0x45   : > { %8649 = vmatpush3.bf16.msra.mxu1 %v8598_v24  ;;  %v6073_v24 = vld [vmem:[%s11416_s2 + $0x98] sm:$0xff] }
  0x46   : > { %8651 = vmatprep.subr.bf16.mxu1 %v8602_v27  ;;  %v8718_v25 = vpack.c.bf16 %v6073_v24, %v6072_v23  ;;  %v6179_v23 = vld [vmem:[%s11416_s2 + $0x268] sm:$0xff] }
  0x49   : > { %8653 = vmatpush3.bf16.msra.mxu1 %v8602_v27  ;;  %v6075_v27 = vld [vmem:[%s11416_s2 + $0xa8] sm:$0xff] }
  0x4a   : > { %8655 = vmatprep.subr.bf16.mxu1 %v8606_v31  ;;  %v8722_v28 = vpack.c.bf16 %v6075_v27, %v6074_v26  ;;  %v6181_v26 = vld [vmem:[%s11416_s2 + $0x278] sm:$0xff]  ;;  %v6170_v27 = vld [vmem:[%s11433_s1 + $0x70] sm:$0xff] }
  0x4d   : > { %8657 = vmatpush3.bf16.msra.mxu1 %v8606_v31  ;;  %v8726_v31 = vpack.c.bf16 %v6077_v30, %v6076_v29  ;;  %v6182_v29 = vld [vmem:[%s11416_s2 + $0x280] sm:$0xff]  ;;  %v6183_v30 = vld [vmem:[%s11416_s2 + $0x288] sm:$0xff] }
  0x4e   : > { %8659 = vmatprep.subr.bf16.mxu1 %v8610_v34 }
  0xfb   : > { %v9964_v37 = vpop.f32.mrb[0].mxu1  ;;  %v9966_v38 = vpop.f32.mrb[0].mxu0 }
  0xfc   : > { %v9968_v39 = vpop.f32.mrb[1].mxu1  ;;  %v710_v40 = vpop.f32.mrb[1].mxu0 }
  0xfd   : > { %7229 = vmatprep.mubr.msk.f32.mxu0 %vm816_vm1, %v710_v40 }
  0xfe   : > { %7230 = vmatmul.mubr.msk.f32.vlgmr.msra.gmra.mrb[2].mxu0 %vm816_vm1, %v9966_v38 }
  0xff   : > { %8613 = vmatpush3.bf16.msra.mxu0 %v8610_v34  ;;  %7256 = vmatprep.mubr.msk.f32.mxu0 %vm816_vm1, %v9968_v39 }
 0x100   : > { %8615 = vmatprep.subr.bf16.mxu0 %v8614_v41 }
 0x103   : > { %8617 = vmatpush3.bf16.msra.mxu0 %v8614_v41  ;;  %v9987_v47 = vpop.f32.mrb[2].mxu1 }
 0x104   : > { %v9989_v48 = vpop.f32.mrb[3].mxu1  ;;  %8619 = vmatprep.subr.bf16.mxu0 %v8618_v44 }
 0x107   : > { %8621 = vmatpush3.bf16.msra.mxu0 %v8618_v44 }
 0x108   : > { %8623 = vmatprep.subr.bf16.mxu0 %v8622_v49 }
 0x10b   : > { %8625 = vmatpush3.bf16.msra.mxu0 %v8622_v49  ;;  %v10003_v55 = vpop.f32.mrb[4].mxu1 }
 0x10c   : > { %v794_v56 = vpop.f32.mrb[5].mxu1  ;;  %8627 = vmatprep.subr.bf16.mxu0 %v8626_v52 }
 0x10d   : > { %7283 = vmatprep.mubr.msk.f32.mxu1 %vm816_vm1, %v794_v56 }
 0x10e   : > { %7284 = vmatmul.mubr.msk.f32.vlgmr.msra.gmra.mrb[6].mxu1 %vm816_vm1, %v10003_v55 }
 0x10f   : > { %8629 = vmatpush3.bf16.msra.mxu0 %v8626_v52  ;;  %8661 = vmatpush3.bf16.msra.mxu1 %v8610_v34  ;;  %v6135_v34 = vld [vmem:[%s11416_s2 + $0x188] sm:$0xff] }
 0x110   : > { %7310 = vmatprep.mubr.msk.f32.mxu1 %vm816_vm1, %v9989_v48  ;;  %8631 = vmatprep.subr.bf16.mxu0 %v8630_v57  ;;  %v8794_v35 = vpack.c.bf16 %v6135_v34, %v6134_v33  ;;  %v6185_v33 = vld [vmem:[%s11416_s2 + $0x298] sm:$0xff] }
 0x111   : > { %8663 = vmatprep.subr.bf16.mxu1 %v8614_v41  ;;  %v6171_v34 = vld [vmem:[%s11433_s1 + $0x78] sm:$0x3f] }
 0x113   : > { %8633 = vmatpush3.bf16.msra.mxu0 %v8630_v57  ;;  %8665 = vmatpush3.bf16.msra.mxu1 %v8614_v41  ;;  %v6139_v41 = vld [vmem:[%s11416_s2 + $0x1a8] sm:$0xff] }
 0x114   : > { %8667 = vmatprep.subr.bf16.mxu1 %v8618_v44  ;;  %8683 = vmatprep.subr.bf16.mxu0 %v8682_v60 }
 0x116   : > { %7257 = vmatmul.mubr.msk.f32.vlgmr.msra.gmra.mrb[2].mxu0 %vm816_vm1, %v9964_v37 }
 0x117   : > { %8669 = vmatpush3.bf16.msra.mxu1 %v8618_v44  ;;  %8685 = vmatpush3.bf16.msra.mxu0 %v8682_v60  ;;  %v6141_v44 = vld [vmem:[%s11416_s2 + $0x1b8] sm:$0xff] }
 0x118   : > { %7337 = vmatprep.mubr.msk.f32.mxu0 %vm816_vm1, %v710_v40  ;;  %8671 = vmatprep.subr.bf16.mxu1 %v8622_v49  ;;  %v6138_v40 = vld [vmem:[%s11416_s2 + $0x1a0] sm:$0xff]  ;;  %v8806_v46 = vpack.c.bf16 %v6141_v44, %v6140_v43 }
 0x119   : > { %8687 = vmatprep.subr.bf16.mxu0 %v8686_v63  ;;  %v8802_v42 = vpack.c.bf16 %v6139_v41, %v6138_v40  ;;  %v6193_v40 = vld [vmem:[%s11416_s2 + $0x2b8] sm:$0xff]  ;;  %v6194_v44 = vld [vmem:[%s11416_s2 + $0x2c0] sm:$0xff] }
 0x11b   : > { %8673 = vmatpush3.bf16.msra.mxu1 %v8622_v49  ;;  %8689 = vmatpush3.bf16.msra.mxu0 %v8686_v63  ;;  %v6143_v49 = vld [vmem:[%s11416_s2 + $0x1c8] sm:$0xff] }
 0x11c   : > { %8675 = vmatprep.subr.bf16.mxu1 %v8626_v52  ;;  %8691 = vmatprep.subr.bf16.mxu0 %v8690_v2 }
 0x11f   : > { %8677 = vmatpush3.bf16.msra.mxu1 %v8626_v52  ;;  %8693 = vmatpush3.bf16.msra.mxu0 %v8690_v2  ;;  %v6145_v52 = vld [vmem:[%s11416_s2 + $0x1d8] sm:$0xff] }
 0x120   : > { %8679 = vmatprep.subr.bf16.mxu1 %v8630_v57  ;;  %8695 = vmatprep.subr.bf16.mxu0 %v8694_v6  ;;  %v8814_v53 = vpack.c.bf16 %v6145_v52, %v6144_v51  ;;  %v6198_v51 = vld [vmem:[%s11416_s2 + $0x2e0] sm:$0xff]  ;;  %v6199_v52 = vld [vmem:[%s11416_s2 + $0x2e8] sm:$0xff] }
 0x123   : > { %8681 = vmatpush3.bf16.msra.mxu1 %v8630_v57  ;;  %8697 = vmatpush3.bf16.msra.mxu0 %v8694_v6  ;;  %v6152_v57 = vld [vmem:[%s11416_s2 + $0x1f0] sm:$0xff] }
 0x124   : > { %8699 = vmatprep.subr.bf16.mxu0 %v8698_v10  ;;  %8731 = vmatprep.subr.bf16.mxu1 %v8682_v60  ;;  %v8846_v61 = vpack.c.bf16 %v6153_v58, %v6152_v57  ;;  %v6206_v58 = vld [vmem:[%s11433_s1 + $0x80] sm:$0xff] }
 0x126   : > { %7311 = vmatmul.mubr.msk.f32.vlgmr.msra.gmra.mrb[6].mxu1 %vm816_vm1, %v9987_v47 }
 0x127   : > { %8701 = vmatpush3.bf16.msra.mxu0 %v8698_v10  ;;  %8733 = vmatpush3.bf16.msra.mxu1 %v8682_v60 }
 0x128   : > { %7391 = vmatprep.mubr.msk.f32.mxu1 %vm816_vm1, %v794_v56  ;;  %8703 = vmatprep.subr.bf16.mxu0 %v8702_v13 }
 0x129   : > { %8735 = vmatprep.subr.bf16.mxu1 %v8686_v63 }
 0x12b   : > { %8705 = vmatpush3.bf16.msra.mxu0 %v8702_v13  ;;  %8737 = vmatpush3.bf16.msra.mxu1 %v8686_v63  ;;  %v6155_v63 = vld [vmem:[%s11416_s2 + $0x208] sm:$0xff] }
 0x12c   : > { %8707 = vmatprep.subr.bf16.mxu0 %v8706_v16  ;;  %8739 = vmatprep.subr.bf16.mxu1 %v8690_v2  ;;  %v8850_v0 = vpack.c.bf16 %v6155_v63, %v6154_v62  ;;  %v6216_v62 = vld [vmem:[%s11416_s2 + $0x310] sm:$0xff]  ;;  %v6217_v63 = vld [vmem:[%s11416_s2 + $0x318] sm:$0xff] }
 0x12e   : > { %7338 = vmatmul.mubr.msk.f32.vlgmr.msra.gmra.mrb[4].mxu0 %vm816_vm1, %v9966_v38  ;;  %v6137_v38 = vld [vmem:[%s11416_s2 + $0x198] sm:$0xff] }
 0x12f   : > { %8709 = vmatpush3.bf16.msra.mxu0 %v8706_v16  ;;  %7364 = vmatprep.mubr.msk.f32.mxu0 %vm816_vm1, %v9968_v39  ;;  %v8798_v39 = vpack.c.bf16 %v6137_v38, %v6136_v36  ;;  %v6190_v36 = vld [vmem:[%s11416_s2 + $0x2a0] sm:$0xff]  ;;  %v6191_v38 = vld [vmem:[%s11416_s2 + $0x2a8] sm:$0xff] }
 0x130   : > { %8741 = vmatpush3.bf16.msra.mxu1 %v8690_v2  ;;  %8711 = vmatprep.subr.bf16.mxu0 %v8710_v19  ;;  %v6157_v2 = vld [vmem:[%s11416_s2 + $0x218] sm:$0xff] }
 0x131   : > { %8743 = vmatprep.subr.bf16.mxu1 %v8694_v6  ;;  %v8854_v3 = vpack.c.bf16 %v6157_v2, %v6156_v1  ;;  %v9022_v1 = vpack.c.bf16 %v6217_v63, %v6216_v62  ;;  %v6218_v2 = vld [vmem:[%s11416_s2 + $0x320] sm:$0xff]  ;;  %v6249_v62 = vld [vmem:[%s11418_s4 + $0x8] sm:$0x1f]  ;;  %v6269_v63 = vld [vmem:[%s11419_s5 + $0xb0] sm:$0xff] }
 0x133   : > { %8713 = vmatpush3.bf16.msra.mxu0 %v8710_v19 }
 0x134   : > { %8745 = vmatpush3.bf16.msra.mxu1 %v8694_v6  ;;  %8715 = vmatprep.subr.bf16.mxu0 %v8714_v22  ;;  %v6159_v6 = vld [vmem:[%s11416_s2 + $0x228] sm:$0xff] }
 0x135   : > { %8747 = vmatprep.subr.bf16.mxu1 %v8698_v10  ;;  %v8858_v8 = vpack.c.bf16 %v6159_v6, %v6158_v4  ;;  %v6220_v6 = vld [vmem:[%s11416_s2 + $0x330] sm:$0xff] }
 0x137   : > { %8717 = vmatpush3.bf16.msra.mxu0 %v8714_v22 }
 0x138   : > { %8749 = vmatpush3.bf16.msra.mxu1 %v8698_v10  ;;  %8719 = vmatprep.subr.bf16.mxu0 %v8718_v25  ;;  %v6161_v10 = vld [vmem:[%s11416_s2 + $0x238] sm:$0xff] }
 0x139   : > { %8751 = vmatprep.subr.bf16.mxu1 %v8702_v13 }
 0x13b   : > { %8721 = vmatpush3.bf16.msra.mxu0 %v8718_v25 }
 0x13c   : > { %8753 = vmatpush3.bf16.msra.mxu1 %v8702_v13  ;;  %8723 = vmatprep.subr.bf16.mxu0 %v8722_v28  ;;  %v8862_v13 = vpack.c.bf16 %v6161_v10, %v6160_v9  ;;  %v6210_v9 = vld [vmem:[%s11433_s1 + $0x90] sm:$0xff] }
 0x13d   : > { %8755 = vmatprep.subr.bf16.mxu1 %v8706_v16 }
 0x13f   : > { %7392 = vmatmul.mubr.msk.f32.vlgmr.msra.gmra.mrb[8].mxu1 %vm816_vm1, %v10003_v55  ;;  %8725 = vmatpush3.bf16.msra.mxu0 %v8722_v28  ;;  %v6151_v55 = vld [vmem:[%s11416_s2 + $0x1e8] sm:$0xff] }
 0x140   : > { %8757 = vmatpush3.bf16.msra.mxu1 %v8706_v16  ;;  %7418 = vmatprep.mubr.msk.f32.mxu1 %vm816_vm1, %v9989_v48  ;;  %v6142_v48 = vld [vmem:[%s11416_s2 + $0x1c0] sm:$0xff]  ;;  %v8842_v56 = vpack.c.bf16 %v6151_v55, %v6150_v54  ;;  %v6175_v16 = vld [vmem:[%s11416_s2 + $0x248] sm:$0xff]  ;;  %v6201_v54 = vld [vmem:[%s11416_s2 + $0x2f8] sm:$0xff] }
 0x141   : > { %8727 = vmatprep.subr.bf16.mxu0 %v8726_v31  ;;  %8759 = vmatprep.subr.bf16.mxu1 %v8710_v19  ;;  %v8810_v50 = vpack.c.bf16 %v6143_v49, %v6142_v48  ;;  %v8906_v17 = vpack.c.bf16 %v6175_v16, %v6174_v15  ;;  %v6196_v48 = vld [vmem:[%s11416_s2 + $0x2d0] sm:$0xff]  ;;  %v6197_v49 = vld [vmem:[%s11416_s2 + $0x2d8] sm:$0xff] }
 0x142   : > { %v6225_v15 = vld [vmem:[%s11416_s2 + $0x358] sm:$0xff] }
 0x143   : > { %8729 = vmatpush3.bf16.msra.mxu0 %v8726_v31 }
 0x144   : > { %8761 = vmatpush3.bf16.msra.mxu1 %v8710_v19  ;;  %8779 = vmatprep.subr.bf16.mxu0 %v9872_v5  ;;  %v6177_v19 = vld [vmem:[%s11416_s2 + $0x258] sm:$0xff] }
 0x145   : > { %8763 = vmatprep.subr.bf16.mxu1 %v8714_v22  ;;  %v8910_v21 = vpack.c.bf16 %v6177_v19, %v6176_v18  ;;  %v6232_v19 = vld [vmem:[%s11416_s2 + $0x370] sm:$0xff] }
 0x146   : > { %7365 = vmatmul.mubr.msk.f32.vlgmr.msra.gmra.mrb[4].mxu0 %vm816_vm1, %v9964_v37  ;;  %v6127_v37 = vld [vmem:[%s11433_s1 + $0x48] sm:$0x3f] }
 0x147   : > { %8781 = vmatpush3.bf16.msra.mxu0 %v9872_v5  ;;  %7429 = vmatprep.mubr.msk.f32.mxu0 %vm444_vm0, %v6126_v32  ;;  %v6184_v32 = vld [vmem:[%s11416_s2 + $0x290] sm:$0xff] }
 0x148   : > { %8765 = vmatpush3.bf16.msra.mxu1 %v8714_v22  ;;  %8783 = vmatprep.subr.bf16.mxu0 %v9874_v7  ;;  %v6178_v22 = vld [vmem:[%s11416_s2 + $0x260] sm:$0xff] }
 0x149   : > { %8767 = vmatprep.subr.bf16.mxu1 %v8718_v25  ;;  %v8914_v24 = vpack.c.bf16 %v6179_v23, %v6178_v22 }
 0x14b   : > { %8785 = vmatpush3.bf16.msra.mxu0 %v9874_v7 }
 0x14c   : > { %8769 = vmatpush3.bf16.msra.mxu1 %v8718_v25  ;;  %8795 = vmatprep.subr.bf16.mxu0 %v8794_v35  ;;  %v6180_v25 = vld [vmem:[%s11416_s2 + $0x270] sm:$0xff] }
 0x14d   : > { %8771 = vmatprep.subr.bf16.mxu1 %v8722_v28 }
 0x14e   : > { %7430 = vmatmul.mubr.msk.f32.vlgmr.msra.gmra.mrb[6].mxu0 %vm444_vm0, %v6127_v37  ;;  %v8954_v37 = vpack.c.bf16 %v6191_v38, %v6190_v36 }
 0x14f   : > { %8797 = vmatpush3.bf16.msra.mxu0 %v8794_v35 }
 0x150   : > { %8773 = vmatpush3.bf16.msra.mxu1 %v8722_v28  ;;  %8799 = vmatprep.subr.bf16.mxu0 %v8798_v39  ;;  %v8918_v28 = vpack.c.bf16 %v6181_v26, %v6180_v25  ;;  %v6235_v25 = vld [vmem:[%s11416_s2 + $0x388] sm:$0xff] }
 0x151   : > { %8775 = vmatprep.subr.bf16.mxu1 %v8726_v31 }
 0x153   : > { %8801 = vmatpush3.bf16.msra.mxu0 %v8798_v39 }
 0x154   : > { %8777 = vmatpush3.bf16.msra.mxu1 %v8726_v31  ;;  %8803 = vmatprep.subr.bf16.mxu0 %v8802_v42  ;;  %v8922_v31 = vpack.c.bf16 %v6183_v30, %v6182_v29  ;;  %v6238_v30 = vld [vmem:[%s11416_s2 + $0x3a0] sm:$0xff] }
 0x155   : > { %8787 = vmatprep.subr.bf16.mxu1 %v9872_v5 }
 0x157   : > { %7419 = vmatmul.mubr.msk.f32.vlgmr.msra.gmra.mrb[8].mxu1 %vm816_vm1, %v9987_v47  ;;  %8805 = vmatpush3.bf16.msra.mxu0 %v8802_v42  ;;  %v6131_v47 = vld [vmem:[%s11433_s1 + $0x58] sm:$0x3f] }
 0x158   : > { %8789 = vmatpush3.bf16.msra.mxu1 %v9872_v5  ;;  %7440 = vmatprep.mubr.msk.f32.mxu1 %vm444_vm0, %v6130_v45  ;;  %v6195_v45 = vld [vmem:[%s11416_s2 + $0x2c8] sm:$0xff] }
 0x159   : > { %8791 = vmatprep.subr.bf16.mxu1 %v9874_v7  ;;  %8807 = vmatprep.subr.bf16.mxu0 %v8806_v46 }
 0x15b   : > { %8809 = vmatpush3.bf16.msra.mxu0 %v8806_v46 }
 0x15c   : > { %8793 = vmatpush3.bf16.msra.mxu1 %v9874_v7  ;;  %8811 = vmatprep.subr.bf16.mxu0 %v8810_v50 }
 0x15d   : > { %8819 = vmatprep.subr.bf16.mxu1 %v8794_v35 }
 0x15f   : > { %7441 = vmatmul.mubr.msk.f32.vlgmr.msra.gmra.mrb[10].mxu1 %vm444_vm0, %v6131_v47  ;;  %8813 = vmatpush3.bf16.msra.mxu0 %v8810_v50  ;;  %v8970_v47 = vpack.c.bf16 %v6199_v52, %v6198_v51  ;;  %v6246_v52 = vld [vmem:[%s11417_s3] ss:$0 sm:$0xff] }
 0x160   : > { %8821 = vmatpush3.bf16.msra.mxu1 %v8794_v35  ;;  %8815 = vmatprep.subr.bf16.mxu0 %v8814_v53  ;;  %v8926_v35 = vpack.c.bf16 %v6185_v33, %v6184_v32  ;;  %v6240_v33 = vld [vmem:[%s11416_s2 + $0x3b0] sm:$0xff] }
 0x161   : > { %8823 = vmatprep.subr.bf16.mxu1 %v8798_v39 }
 0x163   : > { %8817 = vmatpush3.bf16.msra.mxu0 %v8814_v53 }
 0x164   : > { %8825 = vmatpush3.bf16.msra.mxu1 %v8798_v39  ;;  %8843 = vmatprep.subr.bf16.mxu0 %v8842_v56  ;;  %v6192_v39 = vld [vmem:[%s11416_s2 + $0x2b0] sm:$0xff] }
 0x165   : > { %8827 = vmatprep.subr.bf16.mxu1 %v8802_v42  ;;  %v8958_v43 = vpack.c.bf16 %v6193_v40, %v6192_v39  ;;  %v9738_v39 = vmov 0.0  }
 0x168   : > { %8829 = vmatpush3.bf16.msra.mxu1 %v8802_v42 }
 0x169   : > { %8831 = vmatprep.subr.bf16.mxu1 %v8806_v46 }
 0x16c   : > { %8833 = vmatpush3.bf16.msra.mxu1 %v8806_v46  ;;  %v8962_v46 = vpack.c.bf16 %v6195_v45, %v6194_v44 }
 0x16d   : > { %8835 = vmatprep.subr.bf16.mxu1 %v8810_v50 }
 0x170   : > { %8837 = vmatpush3.bf16.msra.mxu1 %v8810_v50  ;;  %v8966_v50 = vpack.c.bf16 %v6197_v49, %v6196_v48 }
 0x171   : > { %8839 = vmatprep.subr.bf16.mxu1 %v8814_v53 }
 0x174   : > { %8841 = vmatpush3.bf16.msra.mxu1 %v8814_v53  ;;  %v6200_v53 = vld [vmem:[%s11416_s2 + $0x2f0] sm:$0xff] }
 0x175   : > { %8867 = vmatprep.subr.bf16.mxu1 %v8842_v56  ;;  %v8974_v57 = vpack.c.bf16 %v6201_v54, %v6200_v53 }
 0x221   : > { %v7431_v59 = vpop.f32.mrb[6].mxu0 }
 0x222   : > { %v1529_v60 = vpop.f32.mrb[7].mxu0 }
 0x223   : > { %7467 = vmatprep.mubr.msk.f32.mxu0 %vm816_vm1, %v1529_v60 }
 0x224   : > { %7468 = vmatmul.mubr.msk.f32.vlgmr.msra.gmra.mrb[2].mxu0 %vm816_vm1, %v7431_v59 }
 0x225   : > { %8845 = vmatpush3.bf16.msra.mxu0 %v8842_v56  ;;  %7521 = vmatprep.mubr.msk.f32.mxu0 %vm816_vm1, %v1529_v60  ;;  %v6215_v60 = vld [vmem:[%s11416_s2 + $0x308] sm:$0xff] }
 0x226   : > { %8847 = vmatprep.subr.bf16.mxu0 %v8846_v61 }
 0x229   : > { %8849 = vmatpush3.bf16.msra.mxu0 %v8846_v61 }
 0x22a   : > { %8851 = vmatprep.subr.bf16.mxu0 %v8850_v0 }
 0x22d   : > { %8853 = vmatpush3.bf16.msra.mxu0 %v8850_v0 }
 0x22e   : > { %8855 = vmatprep.subr.bf16.mxu0 %v8854_v3 }
 0x231   : > { %8857 = vmatpush3.bf16.msra.mxu0 %v8854_v3 }
 0x232   : > { %v7442_v11 = vpop.f32.mrb[10].mxu1  ;;  %8859 = vmatprep.subr.bf16.mxu0 %v8858_v8 }
 0x233   : > { %v1613_v12 = vpop.f32.mrb[11].mxu1 }
 0x234   : > { %7494 = vmatprep.mubr.msk.f32.mxu1 %vm816_vm1, %v1613_v12 }
 0x235   : > { %7495 = vmatmul.mubr.msk.f32.vlgmr.msra.gmra.mrb[6].mxu1 %vm816_vm1, %v7442_v11  ;;  %8861 = vmatpush3.bf16.msra.mxu0 %v8858_v8 }
 0x236   : > { %8869 = vmatpush3.bf16.msra.mxu1 %v8842_v56  ;;  %7548 = vmatprep.mubr.msk.f32.mxu1 %vm816_vm1, %v1613_v12  ;;  %v6223_v12 = vld [vmem:[%s11416_s2 + $0x348] sm:$0xff] }
 0x237   : > { %8863 = vmatprep.subr.bf16.mxu0 %v8862_v13  ;;  %8871 = vmatprep.subr.bf16.mxu1 %v8846_v61 }
 0x239   : > { %8865 = vmatpush3.bf16.msra.mxu0 %v8862_v13 }
 0x23a   : > { %8873 = vmatpush3.bf16.msra.mxu1 %v8846_v61  ;;  %8891 = vmatprep.subr.bf16.mxu0 %v9872_v5 }
 0x23b   : > { %8875 = vmatprep.subr.bf16.mxu1 %v8850_v0 }
 0x23c   : > { %7522 = vmatmul.mubr.msk.f32.vlgmr.msra.gmra.mrb[4].mxu0 %vm816_vm1, %v7431_v59  ;;  %v6214_v59 = vld [vmem:[%s11416_s2 + $0x300] sm:$0xff] }
 0x23d   : > { %8893 = vmatpush3.bf16.msra.mxu0 %v9872_v5  ;;  %7559 = vmatprep.mubr.msk.f32.mxu0 %vm444_vm0, %v6166_v14  ;;  %v9018_v61 = vpack.c.bf16 %v6215_v60, %v6214_v59  ;;  %v6224_v14 = vld [vmem:[%s11416_s2 + $0x350] sm:$0xff] }
 0x23e   : > { %8877 = vmatpush3.bf16.msra.mxu1 %v8850_v0  ;;  %8895 = vmatprep.subr.bf16.mxu0 %v9874_v7  ;;  %v6207_v0 = vld [vmem:[%s11433_s1 + $0x88] sm:$0x3f]  ;;  %v9038_v16 = vpack.c.bf16 %v6225_v15, %v6224_v14  ;;  %v6277_v15 = vld [vmem:[%s11419_s5 + $0xf0] sm:$0xff] }
 0x23f   : > { %8879 = vmatprep.subr.bf16.mxu1 %v8854_v3  ;;  %v6387_v59 = vld [vmem:[%s11419_s5 + $0x2d0] sm:$0xff] }
 0x241   : > { %8897 = vmatpush3.bf16.msra.mxu0 %v9874_v7 }
 0x242   : > { %8881 = vmatpush3.bf16.msra.mxu1 %v8854_v3  ;;  %8907 = vmatprep.subr.bf16.mxu0 %v8906_v17  ;;  %v6219_v3 = vld [vmem:[%s11416_s2 + $0x328] sm:$0xff] }
 0x243   : > { %8883 = vmatprep.subr.bf16.mxu1 %v8858_v8  ;;  %v9026_v4 = vpack.c.bf16 %v6219_v3, %v6218_v2  ;;  %v6266_v2 = vld [vmem:[%s11418_s4 + $0x18] sm:$0x1f] }
 0x244   : > { %7560 = vmatmul.mubr.msk.f32.vlgmr.msra.gmra.mrb[8].mxu0 %vm444_vm0, %v6167_v20  ;;  %v6233_v20 = vld [vmem:[%s11416_s2 + $0x378] sm:$0xff] }
 0x245   : > { %8909 = vmatpush3.bf16.msra.mxu0 %v8906_v17  ;;  %v9070_v23 = vpack.c.bf16 %v6233_v20, %v6232_v19 }
 0x246   : > { %8885 = vmatpush3.bf16.msra.mxu1 %v8858_v8  ;;  %8911 = vmatprep.subr.bf16.mxu0 %v8910_v21  ;;  %v6221_v8 = vld [vmem:[%s11416_s2 + $0x338] sm:$0xff] }
 0x247   : > { %8887 = vmatprep.subr.bf16.mxu1 %v8862_v13  ;;  %v9030_v10 = vpack.c.bf16 %v6221_v8, %v6220_v6  ;;  %v6272_v6 = vld [vmem:[%s11419_s5 + $0xc8] sm:$0xff] }
 0x249   : > { %8913 = vmatpush3.bf16.msra.mxu0 %v8910_v21 }
 0x24a   : > { %8889 = vmatpush3.bf16.msra.mxu1 %v8862_v13  ;;  %8915 = vmatprep.subr.bf16.mxu0 %v8914_v24 }
 0x24b   : > { %8899 = vmatprep.subr.bf16.mxu1 %v9872_v5 }
 0x24d   : > { %7549 = vmatmul.mubr.msk.f32.vlgmr.msra.gmra.mrb[8].mxu1 %vm816_vm1, %v7442_v11  ;;  %8917 = vmatpush3.bf16.msra.mxu0 %v8914_v24  ;;  %v6222_v11 = vld [vmem:[%s11416_s2 + $0x340] sm:$0xff] }
 0x24e   : > { %8901 = vmatpush3.bf16.msra.mxu1 %v9872_v5  ;;  %7570 = vmatprep.mubr.msk.f32.mxu1 %vm444_vm0, %v6170_v27  ;;  %v9034_v13 = vpack.c.bf16 %v6223_v12, %v6222_v11  ;;  %v6236_v27 = vld [vmem:[%s11416_s2 + $0x390] sm:$0xff]  ;;  %v6275_v12 = vld [vmem:[%s11419_s5 + $0xe0] sm:$0xff] }
 0x24f   : > { %8903 = vmatprep.subr.bf16.mxu1 %v9874_v7  ;;  %8919 = vmatprep.subr.bf16.mxu0 %v8918_v28 }
 0x251   : > { %8921 = vmatpush3.bf16.msra.mxu0 %v8918_v28 }
 0x252   : > { %8905 = vmatpush3.bf16.msra.mxu1 %v9874_v7  ;;  %8923 = vmatprep.subr.bf16.mxu0 %v8922_v31 }
 0x253   : > { %8931 = vmatprep.subr.bf16.mxu1 %v8906_v17 }
 0x255   : > { %7571 = vmatmul.mubr.msk.f32.vlgmr.msra.gmra.mrb[12].mxu1 %vm444_vm0, %v6171_v34  ;;  %8925 = vmatpush3.bf16.msra.mxu0 %v8922_v31  ;;  %v6241_v34 = vld [vmem:[%s11416_s2 + $0x3b8] sm:$0xff] }
 0x256   : > { %8933 = vmatpush3.bf16.msra.mxu1 %v8906_v17  ;;  %8927 = vmatprep.subr.bf16.mxu0 %v8926_v35  ;;  %v6231_v17 = vld [vmem:[%s11416_s2 + $0x368] sm:$0xff]  ;;  %v9086_v38 = vpack.c.bf16 %v6241_v34, %v6240_v33  ;;  %v3173_v34 = vld [vmem:[%s11419_s5 + $0x30] sm:$0xff] }
 0x257   : > { %8935 = vmatprep.subr.bf16.mxu1 %v8910_v21 }
 0x259   : > { %8929 = vmatpush3.bf16.msra.mxu0 %v8926_v35 }
 0x25a   : > { %8937 = vmatpush3.bf16.msra.mxu1 %v8910_v21  ;;  %8955 = vmatprep.subr.bf16.mxu0 %v8954_v37 }
 0x25b   : > { %8939 = vmatprep.subr.bf16.mxu1 %v8914_v24 }
 0x25e   : > { %8941 = vmatpush3.bf16.msra.mxu1 %v8914_v24  ;;  %v6234_v24 = vld [vmem:[%s11416_s2 + $0x380] sm:$0xff] }
 0x25f   : > { %8943 = vmatprep.subr.bf16.mxu1 %v8918_v28  ;;  %v9074_v26 = vpack.c.bf16 %v6235_v25, %v6234_v24  ;;  %v3169_v24 = vld [vmem:[%s11419_s5 + $0x10] sm:$0xff]  ;;  %v3170_v25 = vld [vmem:[%s11419_s5 + $0x18] sm:$0xff] }
 0x262   : > { %8945 = vmatpush3.bf16.msra.mxu1 %v8918_v28  ;;  %v6237_v28 = vld [vmem:[%s11416_s2 + $0x398] sm:$0xff] }
 0x263   : > { %8947 = vmatprep.subr.bf16.mxu1 %v8922_v31  ;;  %v9078_v29 = vpack.c.bf16 %v6237_v28, %v6236_v27 }
 0x266   : > { %8949 = vmatpush3.bf16.msra.mxu1 %v8922_v31  ;;  %v6239_v31 = vld [vmem:[%s11416_s2 + $0x3a8] sm:$0xff] }
 0x267   : > { %8951 = vmatprep.subr.bf16.mxu1 %v8926_v35  ;;  %v9082_v32 = vpack.c.bf16 %v6239_v31, %v6238_v30  ;;  %v9149_v30 = vpack.c.bf16 %v3170_v25, %v3169_v24  ;;  %v3171_v31 = vld [vmem:[%s11419_s5 + $0x20] sm:$0xff]  ;;  %v6319_v24 = vld [vmem:[%s11419_s5 + $0x190] sm:$0xff]  ;;  %v6320_v25 = vld [vmem:[%s11419_s5 + $0x198] sm:$0xff] }
 0x26a   : > { %8953 = vmatpush3.bf16.msra.mxu1 %v8926_v35 }
 0x26b   : > { %8979 = vmatprep.subr.bf16.mxu1 %v8954_v37 }
 0x317   : > { %v7561_v41 = vpop.f32.mrb[8].mxu0 }
 0x318   : > { %v2043_v42 = vpop.f32.mrb[9].mxu0 }
 0x319   : > { %7597 = vmatprep.mubr.msk.f32.mxu0 %vm816_vm1, %v2043_v42 }
 0x31a   : > { %7598 = vmatmul.mubr.msk.f32.vlgmr.msra.gmra.mrb[2].mxu0 %vm816_vm1, %v7561_v41 }
 0x31b   : > { %8957 = vmatpush3.bf16.msra.mxu0 %v8954_v37  ;;  %7651 = vmatprep.mubr.msk.f32.mxu0 %vm816_vm1, %v2043_v42 }
 0x31c   : > { %8959 = vmatprep.subr.bf16.mxu0 %v8958_v43 }
 0x31f   : > { %8961 = vmatpush3.bf16.msra.mxu0 %v8958_v43 }
 0x320   : > { %8963 = vmatprep.subr.bf16.mxu0 %v8962_v46 }
 0x323   : > { %8965 = vmatpush3.bf16.msra.mxu0 %v8962_v46 }
 0x324   : > { %8967 = vmatprep.subr.bf16.mxu0 %v8966_v50 }
 0x327   : > { %8969 = vmatpush3.bf16.msra.mxu0 %v8966_v50 }
 0x328   : > { %v7572_v55 = vpop.f32.mrb[12].mxu1  ;;  %8971 = vmatprep.subr.bf16.mxu0 %v8970_v47 }
 0x329   : > { %v2127_v56 = vpop.f32.mrb[13].mxu1 }
 0x32a   : > { %7624 = vmatprep.mubr.msk.f32.mxu1 %vm816_vm1, %v2127_v56 }
 0x32b   : > { %7625 = vmatmul.mubr.msk.f32.vlgmr.msra.gmra.mrb[6].mxu1 %vm816_vm1, %v7572_v55  ;;  %8973 = vmatpush3.bf16.msra.mxu0 %v8970_v47 }
 0x32c   : > { %8981 = vmatpush3.bf16.msra.mxu1 %v8954_v37  ;;  %7678 = vmatprep.mubr.msk.f32.mxu1 %vm816_vm1, %v2127_v56  ;;  %v9736_v37 = vmov 0.0|0.0  }
 0x32d   : > { %8975 = vmatprep.subr.bf16.mxu0 %v8974_v57  ;;  %8983 = vmatprep.subr.bf16.mxu1 %v8958_v43 }
 0x32f   : > { %8977 = vmatpush3.bf16.msra.mxu0 %v8974_v57 }
 0x330   : > { %8985 = vmatpush3.bf16.msra.mxu1 %v8958_v43  ;;  %9003 = vmatprep.subr.bf16.mxu0 %v9872_v5 }
 0x331   : > { %8987 = vmatprep.subr.bf16.mxu1 %v8962_v46 }
 0x332   : > { %7652 = vmatmul.mubr.msk.f32.vlgmr.msra.gmra.mrb[4].mxu0 %vm816_vm1, %v7561_v41 }
 0x333   : > { %9005 = vmatpush3.bf16.msra.mxu0 %v9872_v5  ;;  %7689 = vmatprep.mubr.msk.f32.mxu0 %vm444_vm0, %v6206_v58 }
 0x334   : > { %8989 = vmatpush3.bf16.msra.mxu1 %v8962_v46  ;;  %9007 = vmatprep.subr.bf16.mxu0 %v9874_v7 }
 0x335   : > { %8991 = vmatprep.subr.bf16.mxu1 %v8966_v50 }
 0x337   : > { %9009 = vmatpush3.bf16.msra.mxu0 %v9874_v7 }
 0x338   : > { %8993 = vmatpush3.bf16.msra.mxu1 %v8966_v50  ;;  %9019 = vmatprep.subr.bf16.mxu0 %v9018_v61 }
 0x339   : > { %8995 = vmatprep.subr.bf16.mxu1 %v8970_v47 }
 0x33a   : > { %7690 = vmatmul.mubr.msk.f32.vlgmr.msra.gmra.mrb[10].mxu0 %vm444_vm0, %v6207_v0  ;;  %v6270_v0 = vld [vmem:[%s11419_s5 + $0xb8] sm:$0xff] }
 0x33b   : > { %9021 = vmatpush3.bf16.msra.mxu0 %v9018_v61  ;;  %v9131_v3 = vpack.c.bf16 %v6270_v0, %v6269_v63  ;;  %v6254_v0 = vld [vmem:[%s11419_s5 + $0x68] sm:$0xff] }
 0x33c   : > { %8997 = vmatpush3.bf16.msra.mxu1 %v8970_v47  ;;  %9023 = vmatprep.subr.bf16.mxu0 %v9022_v1 }
 0x33d   : > { %8999 = vmatprep.subr.bf16.mxu1 %v8974_v57 }
 0x33f   : > { %9025 = vmatpush3.bf16.msra.mxu0 %v9022_v1 }
 0x340   : > { %9001 = vmatpush3.bf16.msra.mxu1 %v8974_v57  ;;  %9027 = vmatprep.subr.bf16.mxu0 %v9026_v4 }
 0x341   : > { %9011 = vmatprep.subr.bf16.mxu1 %v9872_v5 }
 0x343   : > { %7679 = vmatmul.mubr.msk.f32.vlgmr.msra.gmra.mrb[8].mxu1 %vm816_vm1, %v7572_v55  ;;  %9029 = vmatpush3.bf16.msra.mxu0 %v9026_v4 }
 0x344   : > { %9013 = vmatpush3.bf16.msra.mxu1 %v9872_v5  ;;  %7700 = vmatprep.mubr.msk.f32.mxu1 %vm444_vm0, %v6210_v9  ;;  %v6211_v5 = vld [vmem:[%s11433_s1 + $0x98] sm:$0x3f]  ;;  %v6273_v9 = vld [vmem:[%s11419_s5 + $0xd0] sm:$0xff]  ;;  %s9678_s1 = scalar_lea.vmem %s9677_s20, 32 }
 0x345   : > { %9015 = vmatprep.subr.bf16.mxu1 %v9874_v7  ;;  %9031 = vmatprep.subr.bf16.mxu0 %v9030_v10  ;;  %p9680_p1 = scmp.lt.s32.totalorder %s9678_s1, %s9672_s16 }
 0x347   : > { %9033 = vmatpush3.bf16.msra.mxu0 %v9030_v10  ;;  %p9681_p2 = por %p9680_p1, %p9679_p0 }
 0x348   : > { %9017 = vmatpush3.bf16.msra.mxu1 %v9874_v7  ;;  %9035 = vmatprep.subr.bf16.mxu0 %v9034_v13  ;;  %v6230_v7 = vld [vmem:[%s11416_s2 + $0x360] sm:$0xff] }
 0x349   : > { %9043 = vmatprep.subr.bf16.mxu1 %v9018_v61  ;;  %v9066_v18 = vpack.c.bf16 %v6231_v17, %v6230_v7  ;;  %v6279_v7 = vld [vmem:[%s11419_s5 + $0x100] sm:$0xf]  ;;  %p9682_p3 = pnand %p9681_p2, %p9675_p13 }
 0x34a   : > { %v3167_v17 = vld [vmem:[%s11419_s5] sm:$0xff] }
 0x34b   : > { %7701 = vmatmul.mubr.msk.f32.vlgmr.msra.gmra.mrb[14].mxu1 %vm444_vm0, %v6211_v5  ;;  %9037 = vmatpush3.bf16.msra.mxu0 %v9034_v13  ;;  %v6278_v5 = vld [vmem:[%s11419_s5 + $0xf8] sm:$0xff] }
 0x34c   : > { %9045 = vmatpush3.bf16.msra.mxu1 %v9018_v61  ;;  %9039 = vmatprep.subr.bf16.mxu0 %v9038_v16  ;;  %v3013_v61 = vld [vmem:[%s11418_s4] sm:$0x1f] }
 0x34d   : > { %9047 = vmatprep.subr.bf16.mxu1 %v9022_v1 }
 0x34f   : > { %9041 = vmatpush3.bf16.msra.mxu0 %v9038_v16 }
 0x350   : > { %9049 = vmatpush3.bf16.msra.mxu1 %v9022_v1  ;;  %9067 = vmatprep.subr.bf16.mxu0 %v9066_v18  ;;  %v6263_v1 = vld [vmem:[%s11418_s4 + $0x10] sm:$0x1f] }
 0x351   : > { %9051 = vmatprep.subr.bf16.mxu1 %v9026_v4 }
 0x354   : > { %9053 = vmatpush3.bf16.msra.mxu1 %v9026_v4  ;;  %v6271_v4 = vld [vmem:[%s11419_s5 + $0xc0] sm:$0xff] }
 0x355   : > { %9055 = vmatprep.subr.bf16.mxu1 %v9030_v10  ;;  %v9134_v8 = vpack.c.bf16 %v6272_v6, %v6271_v4  ;;  %v6257_v4 = vld [vmem:[%s11419_s5 + $0x80] sm:$0xff] }
 0x358   : > { %9057 = vmatpush3.bf16.msra.mxu1 %v9030_v10  ;;  %v6274_v10 = vld [vmem:[%s11419_s5 + $0xd8] sm:$0xff] }
 0x359   : > { %9059 = vmatprep.subr.bf16.mxu1 %v9034_v13  ;;  %v9137_v11 = vpack.c.bf16 %v6274_v10, %v6273_v9  ;;  %v6259_v9 = vld [vmem:[%s11419_s5 + $0x90] sm:$0xff] }
 0x35c   : > { %9061 = vmatpush3.bf16.msra.mxu1 %v9034_v13  ;;  %v6276_v13 = vld [vmem:[%s11419_s5 + $0xe8] sm:$0xff] }
 0x35d   : > { %9063 = vmatprep.subr.bf16.mxu1 %v9038_v16  ;;  %v9140_v14 = vpack.c.bf16 %v6276_v13, %v6275_v12  ;;  %v6261_v12 = vld [vmem:[%s11419_s5 + $0xa0] sm:$0xff] }
 0x360   : > { %9065 = vmatpush3.bf16.msra.mxu1 %v9038_v16  ;;  %v9143_v16 = vpack.c.bf16 %v6278_v5, %v6277_v15  ;;  %v6313_v15 = vld [vmem:[%s11419_s5 + $0x160] sm:$0xff]  ;;  %v6314_v5 = vld [vmem:[%s11419_s5 + $0x168] sm:$0xff] }
 0x361   : > { %9091 = vmatprep.subr.bf16.mxu1 %v9066_v18 }
 0x40d   : > { %v7691_v21 = vpop.f32.mrb[10].mxu0 }
 0x40e   : > { %v2557_v22 = vpop.f32.mrb[11].mxu0 }
 0x40f   : > { %7727 = vmatprep.mubr.msk.f32.mxu0 %vm816_vm1, %v2557_v22 }
 0x410   : > { %7728 = vmatmul.mubr.msk.f32.vlgmr.msra.gmra.mrb[2].mxu0 %vm816_vm1, %v7691_v21 }
 0x411   : > { %9069 = vmatpush3.bf16.msra.mxu0 %v9066_v18  ;;  %7781 = vmatprep.mubr.msk.f32.mxu0 %vm816_vm1, %v2557_v22 }
 0x412   : > { %9071 = vmatprep.subr.bf16.mxu0 %v9070_v23 }
 0x415   : > { %9073 = vmatpush3.bf16.msra.mxu0 %v9070_v23 }
 0x416   : > { %9075 = vmatprep.subr.bf16.mxu0 %v9074_v26 }
 0x419   : > { %9077 = vmatpush3.bf16.msra.mxu0 %v9074_v26 }
 0x41a   : > { %9079 = vmatprep.subr.bf16.mxu0 %v9078_v29 }
 0x41d   : > { %9081 = vmatpush3.bf16.msra.mxu0 %v9078_v29 }
 0x41e   : > { %v7702_v35 = vpop.f32.mrb[14].mxu1  ;;  %9083 = vmatprep.subr.bf16.mxu0 %v9082_v32 }
 0x41f   : > { %v2641_v36 = vpop.f32.mrb[15].mxu1 }
 0x420   : > { %7754 = vmatprep.mubr.msk.f32.mxu1 %vm816_vm1, %v2641_v36 }
 0x421   : > { %7755 = vmatmul.mubr.msk.f32.vlgmr.msra.gmra.mrb[6].mxu1 %vm816_vm1, %v7702_v35  ;;  %9085 = vmatpush3.bf16.msra.mxu0 %v9082_v32 }
 0x422   : > { %9093 = vmatpush3.bf16.msra.mxu1 %v9066_v18  ;;  %7808 = vmatprep.mubr.msk.f32.mxu1 %vm816_vm1, %v2641_v36  ;;  %v3168_v18 = vld [vmem:[%s11419_s5 + $0x8] sm:$0xff] }
 0x423   : > { %9087 = vmatprep.subr.bf16.mxu0 %v9086_v38  ;;  %9095 = vmatprep.subr.bf16.mxu1 %v9070_v23 }
 0x425   : > { %9089 = vmatpush3.bf16.msra.mxu0 %v9086_v38 }
 0x426   : > { %9097 = vmatpush3.bf16.msra.mxu1 %v9070_v23  ;;  %9114 = vmatprep.subr.bf16.mxu0 %v9736_v37  ;;  %v9146_v23 = vpack.c.bf16 %v3168_v18, %v3167_v17  ;;  %v9259_v17 = vpack.c.bf16 %v6314_v5, %v6313_v15  ;;  %v6315_v18 = vld [vmem:[%s11419_s5 + $0x170] sm:$0xff]  ;;  %v6367_v15 = vld [vmem:[%s11419_s5 + $0x280] sm:$0xff] }
 0x427   : > { %9099 = vmatprep.subr.bf16.mxu1 %v9074_v26 }
 0x428   : > { %7782 = vmatmul.mubr.msk.f32.vlgmr.msra.gmra.mrb[4].mxu0 %vm816_vm1, %v7691_v21 }
 0x429   : > { %7815 = vmatprep.mubr.msk.f32.mxu0 %vm9737_vm2, %v9738_v39 }
 0x42a   : > { %9101 = vmatpush3.bf16.msra.mxu1 %v9074_v26 }
 0x42b   : > { %9103 = vmatprep.subr.bf16.mxu1 %v9078_v29 }
 0x42e   : > { %9105 = vmatpush3.bf16.msra.mxu1 %v9078_v29 }
 0x42f   : > { %9107 = vmatprep.subr.bf16.mxu1 %v9082_v32 }
 0x432   : > { %9109 = vmatpush3.bf16.msra.mxu1 %v9082_v32  ;;  %v3172_v32 = vld [vmem:[%s11419_s5 + $0x28] sm:$0xff] }
 0x433   : > { %9111 = vmatprep.subr.bf16.mxu1 %v9086_v38  ;;  %v9152_v33 = vpack.c.bf16 %v3172_v32, %v3171_v31  ;;  %v6328_v31 = vld [vmem:[%s11419_s5 + $0x1b8] sm:$0xff]  ;;  %v6329_v32 = vld [vmem:[%s11419_s5 + $0x1c0] sm:$0xff] }
 0x436   : > { %9113 = vmatpush3.bf16.msra.mxu1 %v9086_v38  ;;  %v3175_v38 = vld [vmem:[%s11419_s5 + $0x40] sm:$0xff] }
 0x437   : > { %9118 = vmatprep.subr.bf16.mxu1 %v9736_v37 }
 0x439   : > { %7809 = vmatmul.mubr.msk.f32.vlgmr.msra.gmra.mrb[8].mxu1 %vm816_vm1, %v7702_v35  ;;  %v3174_v35 = vld [vmem:[%s11419_s5 + $0x38] sm:$0xff] }
 0x43a   : > { %7822 = vmatprep.mubr.msk.f32.mxu1 %vm9737_vm2, %v9738_v39  ;;  %v9155_v36 = vpack.c.bf16 %v3174_v35, %v3173_v34  ;;  %v6330_v34 = vld [vmem:[%s11419_s5 + $0x1c8] sm:$0xff]  ;;  %v6331_v35 = vld [vmem:[%s11419_s5 + $0x1d0] sm:$0xff] }
 0x4e3   : > { %v7729_v40 = vpop.f32.mrb[2].mxu0 }
 0x4e4   : > { %v2735_v41 = vpop.f32.mrb[3].mxu0 }
 0x4f4   : > { %v7756_v42 = vpop.f32.mrb[6].mxu1 }
 0x4f5   : > { %v2818_v43 = vpop.f32.mrb[7].mxu1 }
 0x4fb   : > { %v7783_v44 = vpop.f32.mrb[4].mxu0 }
 0x4fc   : > { %v2997_v45 = vmax.f32 %v7729_v40, %v7783_v44  ;;  %v2908_v46 = vpop.f32.mrb[5].mxu0  ;;  %v3176_v40 = vld [vmem:[%s11419_s5 + $0x48] sm:$0xff]  ;;  %v3177_v44 = vld [vmem:[%s11419_s5 + $0x50] sm:$0xf] }
 0x4fd   : > { %v2996_v48 = vmax.f32 %v2735_v41, %v2908_v46  ;;  %v9158_v41 = vpack.c.bf16 %v3176_v40, %v3175_v38  ;;  %v6290_v46 = vld [vmem:[%s11419_s5 + $0x118] sm:$0xff] }
 0x50c   : > { %v7810_v49 = vpop.f32.mrb[8].mxu1 }
 0x50d   : > { %v2999_v50 = vmax.f32 %v7756_v42, %v7810_v49  ;;  %v2985_v51 = vpop.f32.mrb[9].mxu1  ;;  %v6288_v42 = vld [vmem:[%s11419_s5 + $0x108] sm:$0xff] }
 0x50e   : > { %v2998_v47 = vmax.f32 %v2818_v43, %v2985_v51  ;;  %v6289_v43 = vld [vmem:[%s11419_s5 + $0x110] sm:$0xff] }
 0x50f   : > { %v3001_v53 = vmax.f32 %v2997_v45, %v2999_v50  ;;  %v9191_v45 = vpack.c.bf16 %v6289_v43, %v6288_v42  ;;  %v6292_v50 = vld [vmem:[%s11419_s5 + $0x128] sm:$0xff]  ;;  %v6293_v51 = vld [vmem:[%s11419_s5 + $0x130] sm:$0xff]  ;;  %v9292_v42 = vpack.c.bf16 %v6331_v35, %v6330_v34  ;;  %v6332_v43 = vld [vmem:[%s11419_s5 + $0x1d8] sm:$0xff] }
 0x510   : > { %v3000_v54 = vmax.f32 %v2996_v48, %v2998_v47  ;;  %v6291_v48 = vld [vmem:[%s11419_s5 + $0x120] sm:$0xff]  ;;  %v6294_v47 = vld [vmem:[%s11419_s5 + $0x138] sm:$0xff] }
 0x511   : > { %v3010_v55 = vadd.f32 %v6246_v52, %v3001_v53  ;;  %v9194_v49 = vpack.c.bf16 %v6291_v48, %v6290_v46  ;;  %v6295_v53 = vld [vmem:[%s11419_s5 + $0x140] sm:$0xff]  ;;  %v6334_v46 = vld [vmem:[%s11419_s5 + $0x1e8] sm:$0xff]  ;;  %v6335_v48 = vld [vmem:[%s11419_s5 + $0x1f0] sm:$0xff] }
 0x512   : > { %v3009_v56 = vadd.f32 %v6246_v52, %v3000_v54  ;;  %v9197_v52 = vpack.c.bf16 %v6293_v51, %v6292_v50  ;;  %v9200_v54 = vpack.c.bf16 %v6295_v53, %v6294_v47  ;;  %v6336_v50 = vld [vmem:[%s11419_s5 + $0x1f8] sm:$0xff]  ;;  %v6337_v51 = vld [vmem:[%s11419_s5 + $0x200] sm:$0xff]  ;;  %v6338_v47 = vld [vmem:[%s11419_s5 + $0x208] sm:$0xf] }
 0x513   : > { %v3012_v57 = vmax.f32 %v3010_v55, 0.0  ;;  %v6296_v55 = vld [vmem:[%s11419_s5 + $0x148] sm:$0xff]  ;;  %v6349_v53 = vld [vmem:[%s11419_s5 + $0x210] sm:$0xff]  ;;  %v6389_v35 = vld [vmem:[%s11419_s5 + $0x2e0] sm:$0xff] }
 0x514   : > { %v3011_v58 = vmax.f32 %v3009_v56, 0.0  ;;  %v6297_v56 = vld [vmem:[%s11419_s5 + $0x150] sm:$0xff] }
 0x516   : > { %v10425_v60 = vpack.c.bf16 %v3012_v57, %v3011_v58  ;;  %v9203_v57 = vpack.c.bf16 %v6297_v56, %v6296_v55  ;;  %v6252_v58 = vld [vmem:[%s11419_s5 + $0x58] sm:$0xff]  ;;  %v6343_v55 = vld [vmem:[%s11418_s4 + $0x30] sm:$0x1f] }
 0x517   : > { %v6346_v56 = vld [vmem:[%s11418_s4 + $0x38] sm:$0x1f] }
 0x518   : > { %9117 = vmatpush3.bf16.msk.msra.mxu0 %vm10421_vm5, %v10425_v60  ;;  %9121 = vmatpush3.bf16.msk.msra.mxu1 %vm10421_vm5, %v10425_v60 }
 0x519   : > { %9122 = vmatprep.subr.bf16.mxu0 %v9736_v37  ;;  %9126 = vmatprep.subr.bf16.mxu1 %v9736_v37 }
 0x51b   : > { %7816 = vmatmul.mubr.msk.f32.vlgmr.msra.gmra.mrb[12].mxu0 %vm3014_vm6, %v3013_v61  ;;  %7823 = vmatmul.mubr.msk.f32.vlgmr.msra.gmra.mrb[16].mxu1 %vm3014_vm6, %v6249_v62  ;;  %v6253_v61 = vld [vmem:[%s11419_s5 + $0x60] sm:$0xff]  ;;  %v6298_v62 = vld [vmem:[%s11419_s5 + $0x158] sm:$0xf] }
 0x51c   : > { %9125 = vmatpush3.bf16.msk.msra.mxu0 %vm10421_vm5, %v10425_v60  ;;  %9129 = vmatpush3.bf16.msk.msra.mxu1 %vm10421_vm5, %v10425_v60  ;;  %v9206_v63 = vpack.c.bf16 %v6253_v61, %v6252_v58  ;;  %v6351_v58 = vld [vmem:[%s11419_s5 + $0x220] sm:$0xff]  ;;  %v6352_v61 = vld [vmem:[%s11419_s5 + $0x228] sm:$0xff] }
 0x51d   : > { %7829 = vmatprep.mubr.msk.f32.mxu0 %vm9737_vm2, %v9738_v39  ;;  %7836 = vmatprep.mubr.msk.f32.mxu1 %vm9737_vm2, %v9738_v39 }
 0x51e   : > { %9130 = vmatprep.subr.bf16.mxu0 %v9736_v37  ;;  %9160 = vmatprep.subr.bf16.mxu1 %v9736_v37 }
 0x51f   : > { %7830 = vmatmul.mubr.msk.f32.vlgmr.msra.gmra.mrb[14].mxu0 %vm3014_vm6, %v6263_v1  ;;  %7837 = vmatmul.mubr.msk.f32.vlgmr.msra.gmra.mrb[18].mxu1 %vm3014_vm6, %v6266_v2  ;;  %v6255_v1 = vld [vmem:[%s11419_s5 + $0x70] sm:$0xff] }
 0x520   : > { %9132 = vmatpush3.bf16.msra.mxu0 %v9131_v3  ;;  %9162 = vmatpush3.bf16.msra.mxu1 %v9131_v3  ;;  %v9209_v2 = vpack.c.bf16 %v6255_v1, %v6254_v0  ;;  %v6256_v3 = vld [vmem:[%s11419_s5 + $0x78] sm:$0xff] }
 0x521   : > { %9133 = vmatprep.subr.bf16.mxu0 %v9736_v37  ;;  %9163 = vmatprep.subr.bf16.mxu1 %v9736_v37  ;;  %v9212_v6 = vpack.c.bf16 %v6257_v4, %v6256_v3  ;;  %v6354_v0 = vld [vmem:[%s11419_s5 + $0x238] sm:$0xff]  ;;  %v6356_v3 = vld [vmem:[%s11419_s5 + $0x248] sm:$0xff] }
 0x522   : > { %7861 = vmatprep.mubr.msk.f32.mxu0 %vm9737_vm2, %v9738_v39  ;;  %7911 = vmatprep.mubr.msk.f32.mxu1 %vm9737_vm2, %v9738_v39 }
 0x524   : > { %9135 = vmatpush3.bf16.msra.mxu0 %v9134_v8  ;;  %9165 = vmatpush3.bf16.msra.mxu1 %v9134_v8  ;;  %v6258_v8 = vld [vmem:[%s11419_s5 + $0x88] sm:$0xff] }
 0x525   : > { %9136 = vmatprep.subr.bf16.mxu0 %v9736_v37  ;;  %9166 = vmatprep.subr.bf16.mxu1 %v9736_v37  ;;  %v9215_v10 = vpack.c.bf16 %v6259_v9, %v6258_v8  ;;  %v6358_v8 = vld [vmem:[%s11419_s5 + $0x258] sm:$0xff] }
 0x528   : > { %9138 = vmatpush3.bf16.msra.mxu0 %v9137_v11  ;;  %9168 = vmatpush3.bf16.msra.mxu1 %v9137_v11  ;;  %v6260_v11 = vld [vmem:[%s11419_s5 + $0x98] sm:$0xff] }
 0x529   : > { %9139 = vmatprep.subr.bf16.mxu0 %v9736_v37  ;;  %9169 = vmatprep.subr.bf16.mxu1 %v9736_v37  ;;  %v9218_v13 = vpack.c.bf16 %v6261_v12, %v6260_v11  ;;  %v6364_v11 = vld [vmem:[%s11419_s5 + $0x268] sm:$0xff]  ;;  %v6365_v12 = vld [vmem:[%s11419_s5 + $0x270] sm:$0xff] }
 0x52c   : > { %9141 = vmatpush3.bf16.msra.mxu0 %v9140_v14  ;;  %9171 = vmatpush3.bf16.msra.mxu1 %v9140_v14  ;;  %v6262_v14 = vld [vmem:[%s11419_s5 + $0xa8] sm:$0xf] }
 0x52d   : > { %9142 = vmatprep.subr.bf16.mxu0 %v9736_v37  ;;  %9172 = vmatprep.subr.bf16.mxu1 %v9736_v37 }
 0x530   : > { %9144 = vmatpush3.bf16.msra.mxu0 %v9143_v16  ;;  %9174 = vmatpush3.bf16.msra.mxu1 %v9143_v16  ;;  %v6307_v16 = vld [vmem:[%s11418_s4 + $0x20] sm:$0x1f] }
 0x531   : > { %7859 = vmatprep.subr.mxu0 %v9738_v39  ;;  %7909 = vmatprep.subr.mxu1 %v9738_v39 }
 0x534   : > { %7860 = vmatpush3.msk.msra.mxu0 %vm3356_vm7, %v6279_v7  ;;  %7910 = vmatpush3.msk.msra.mxu1 %vm3356_vm7, %v6279_v7  ;;  %v6310_v7 = vld [vmem:[%s11418_s4 + $0x28] sm:$0x1f] }
 0x535   : > { %9145 = vmatprep.subr.bf16.mxu0 %v9736_v37  ;;  %9175 = vmatprep.subr.bf16.mxu1 %v9736_v37 }
 0x5ee   : > { %v10520_v19 = vpop.f32.mrb[12].mxu0  ;;  %v10522_v20 = vpop.f32.mrb[16].mxu1 }
 0x5ef   : > { %v7817_v21 = vpop.f32.mrb[13].mxu0  ;;  %v7824_v22 = vpop.f32.mrb[17].mxu1 }
 0x5f0   : > { %v6317_v21 = vld [vmem:[%s11419_s5 + $0x180] sm:$0xff]  ;;  %v6318_v22 = vld [vmem:[%s11419_s5 + $0x188] sm:$0xff] }
 0x5f2   : > { %v10530_v26 = vpop.f32.mrb[14].mxu0  ;;  %v10532_v27 = vpop.f32.mrb[18].mxu1 }
 0x5f3   : > { %v7831_v28 = vpop.f32.mrb[15].mxu0  ;;  %v7838_v29 = vpop.f32.mrb[19].mxu1  ;;  %7862 = vmatmul.mubr.msk.f32.vlgmr.msra.gmra.mrb[16].mxu0 %vm3352_vm8, %v10530_v26  ;;  %7912 = vmatmul.mubr.msk.f32.vlgmr.msra.gmra.mrb[20].mxu1 %vm3352_vm8, %v10532_v27 }
 0x5f4   : > { %9147 = vmatpush3.bf16.msra.mxu0 %v9146_v23  ;;  %9177 = vmatpush3.bf16.msra.mxu1 %v9146_v23  ;;  %v9265_v23 = vpack.c.bf16 %v6318_v22, %v6317_v21  ;;  %v6322_v28 = vld [vmem:[%s11419_s5 + $0x1a8] sm:$0xff]  ;;  %v6370_v22 = vld [vmem:[%s11419_s5 + $0x298] sm:$0xff] }
 0x5f5   : > { %9148 = vmatprep.subr.bf16.mxu0 %v9736_v37  ;;  %9178 = vmatprep.subr.bf16.mxu1 %v9736_v37 }
 0x5f6   : > { %7886 = vmatprep.mubr.msk.f32.mxu0 %vm9737_vm2, %v9738_v39  ;;  %7936 = vmatprep.mubr.msk.f32.mxu1 %vm9737_vm2, %v9738_v39 }
 0x5f8   : > { %9150 = vmatpush3.bf16.msra.mxu0 %v9149_v30  ;;  %9180 = vmatpush3.bf16.msra.mxu1 %v9149_v30  ;;  %v6323_v30 = vld [vmem:[%s11419_s5 + $0x1b0] sm:$0xf] }
 0x5f9   : > { %9151 = vmatprep.subr.bf16.mxu0 %v9736_v37  ;;  %9181 = vmatprep.subr.bf16.mxu1 %v9736_v37 }
 0x5fc   : > { %9153 = vmatpush3.bf16.msra.mxu0 %v9152_v33  ;;  %9183 = vmatpush3.bf16.msra.mxu1 %v9152_v33  ;;  %v9289_v33 = vpack.c.bf16 %v6329_v32, %v6328_v31  ;;  %v6379_v31 = vld [vmem:[%s11418_s4 + $0x40] sm:$0x1f]  ;;  %v6382_v32 = vld [vmem:[%s11418_s4 + $0x48] sm:$0x1f] }
 0x5fd   : > { %9154 = vmatprep.subr.bf16.mxu0 %v9736_v37  ;;  %9184 = vmatprep.subr.bf16.mxu1 %v9736_v37 }
 0x600   : > { %9156 = vmatpush3.bf16.msra.mxu0 %v9155_v36  ;;  %9186 = vmatpush3.bf16.msra.mxu1 %v9155_v36 }
 0x601   : > { %9157 = vmatprep.subr.bf16.mxu0 %v9736_v37  ;;  %9187 = vmatprep.subr.bf16.mxu1 %v9736_v37 }
 0x604   : > { %9159 = vmatpush3.bf16.msra.mxu0 %v9158_v41  ;;  %9189 = vmatpush3.bf16.msra.mxu1 %v9158_v41 }
 0x605   : > { %7884 = vmatprep.subr.mxu0 %v9738_v39  ;;  %7934 = vmatprep.subr.mxu1 %v9738_v39 }
 0x608   : > { %7885 = vmatpush3.msk.msra.mxu0 %vm3356_vm7, %v3177_v44  ;;  %7935 = vmatpush3.msk.msra.mxu1 %vm3356_vm7, %v3177_v44  ;;  %v6333_v44 = vld [vmem:[%s11419_s5 + $0x1e0] sm:$0xff] }
 0x609   : > { %7887 = vmatmul.mubr.msk.f32.vlgmr.msra.gmra.mrb[16].mxu0 %vm3352_vm8, %v10520_v19  ;;  %7937 = vmatmul.mubr.msk.f32.vlgmr.msra.gmra.mrb[20].mxu1 %vm3352_vm8, %v10522_v20 }
 0x60a   : > { %9190 = vmatprep.subr.bf16.mxu0 %v9736_v37  ;;  %9220 = vmatprep.subr.bf16.mxu1 %v9736_v37 }
 0x60b   : > { %9192 = vmatpush3.bf16.msra.mxu0 %v9191_v45  ;;  %9222 = vmatpush3.bf16.msra.mxu1 %v9191_v45  ;;  %v9295_v45 = vpack.c.bf16 %v6333_v44, %v6332_v43  ;;  %v6393_v43 = vld [vmem:[%s11419_s5 + $0x300] sm:$0xff]  ;;  %v6394_v44 = vld [vmem:[%s11419_s5 + $0x308] sm:$0xff] }
 0x60c   : > { %9193 = vmatprep.subr.bf16.mxu0 %v9736_v37  ;;  %9223 = vmatprep.subr.bf16.mxu1 %v9736_v37 }
 0x60d   : > { %7961 = vmatprep.mubr.msk.f32.mxu0 %vm9737_vm2, %v9738_v39  ;;  %8011 = vmatprep.mubr.msk.f32.mxu1 %vm9737_vm2, %v9738_v39 }
 0x60f   : > { %9195 = vmatpush3.bf16.msra.mxu0 %v9194_v49  ;;  %9225 = vmatpush3.bf16.msra.mxu1 %v9194_v49  ;;  %v9298_v49 = vpack.c.bf16 %v6335_v48, %v6334_v46  ;;  %v6395_v46 = vld [vmem:[%s11419_s5 + $0x310] sm:$0xf]  ;;  %v6400_v48 = vld [vmem:[%s11419_s5 + $0x318] sm:$0xff] }
 0x610   : > { %9196 = vmatprep.subr.bf16.mxu0 %v9736_v37  ;;  %9226 = vmatprep.subr.bf16.mxu1 %v9736_v37 }
 0x613   : > { %9198 = vmatpush3.bf16.msra.mxu0 %v9197_v52  ;;  %9228 = vmatpush3.bf16.msra.mxu1 %v9197_v52  ;;  %v9301_v52 = vpack.c.bf16 %v6337_v51, %v6336_v50  ;;  %v6402_v51 = vld [vmem:[%s11419_s5 + $0x328] sm:$0xff] }
 0x614   : > { %9199 = vmatprep.subr.bf16.mxu0 %v9736_v37  ;;  %9229 = vmatprep.subr.bf16.mxu1 %v9736_v37 }
 0x617   : > { %9201 = vmatpush3.bf16.msra.mxu0 %v9200_v54  ;;  %9231 = vmatpush3.bf16.msra.mxu1 %v9200_v54  ;;  %v6350_v54 = vld [vmem:[%s11419_s5 + $0x218] sm:$0xff] }
 0x618   : > { %9202 = vmatprep.subr.bf16.mxu0 %v9736_v37  ;;  %9232 = vmatprep.subr.bf16.mxu1 %v9736_v37 }
 0x61b   : > { %9204 = vmatpush3.bf16.msra.mxu0 %v9203_v57  ;;  %9234 = vmatpush3.bf16.msra.mxu1 %v9203_v57  ;;  %v9327_v57 = vpack.c.bf16 %v6350_v54, %v6349_v53 }
 0x61c   : > { %7959 = vmatprep.subr.mxu0 %v9738_v39  ;;  %8009 = vmatprep.subr.mxu1 %v9738_v39 }
 0x61f   : > { %7960 = vmatpush3.msk.msra.mxu0 %vm3356_vm7, %v6298_v62  ;;  %8010 = vmatpush3.msk.msra.mxu1 %vm3356_vm7, %v6298_v62  ;;  %v9330_v62 = vpack.c.bf16 %v6352_v61, %v6351_v58  ;;  %v6405_v58 = vld [vmem:[%s11419_s5 + $0x340] sm:$0xff] }
 0x620   : > { %7962 = vmatmul.mubr.msk.f32.vlgmr.msra.gmra.mrb[18].mxu0 %vm3352_vm8, %v10530_v26  ;;  %9205 = vmatprep.subr.bf16.mxu0 %v9736_v37  ;;  %v9268_v26 = vpack.c.bf16 %v6320_v25, %v6319_v24  ;;  %v6372_v25 = vld [vmem:[%s11419_s5 + $0x2a8] sm:$0xff] }
 0x621   : > { %8012 = vmatmul.mubr.msk.f32.vlgmr.msra.gmra.mrb[22].mxu1 %vm3352_vm8, %v10532_v27  ;;  %9235 = vmatprep.subr.bf16.mxu1 %v9736_v37  ;;  %v6321_v27 = vld [vmem:[%s11419_s5 + $0x1a0] sm:$0xff] }
 0x622   : > { %9207 = vmatpush3.bf16.msra.mxu0 %v9206_v63  ;;  %9237 = vmatpush3.bf16.msra.mxu1 %v9206_v63  ;;  %v9271_v29 = vpack.c.bf16 %v6322_v28, %v6321_v27  ;;  %v6353_v63 = vld [vmem:[%s11419_s5 + $0x230] sm:$0xff]  ;;  %v6374_v28 = vld [vmem:[%s11419_s5 + $0x2b8] sm:$0xf] }
 0x623   : > { %9208 = vmatprep.subr.bf16.mxu0 %v9736_v37  ;;  %9238 = vmatprep.subr.bf16.mxu1 %v9736_v37  ;;  %v9333_v1 = vpack.c.bf16 %v6354_v0, %v6353_v63  ;;  %v6407_v63 = vld [vmem:[%s11419_s5 + $0x350] sm:$0xff] }
 0x624   : > { %7986 = vmatprep.mubr.msk.f32.mxu0 %vm9737_vm2, %v9738_v39  ;;  %8036 = vmatprep.mubr.msk.f32.mxu1 %vm9737_vm2, %v9738_v39 }
 0x626   : > { %9210 = vmatpush3.bf16.msra.mxu0 %v9209_v2  ;;  %9240 = vmatpush3.bf16.msra.mxu1 %v9209_v2  ;;  %v6355_v2 = vld [vmem:[%s11419_s5 + $0x240] sm:$0xff] }
 0x627   : > { %9211 = vmatprep.subr.bf16.mxu0 %v9736_v37  ;;  %9241 = vmatprep.subr.bf16.mxu1 %v9736_v37  ;;  %v9336_v4 = vpack.c.bf16 %v6356_v3, %v6355_v2  ;;  %v6409_v2 = vld [vmem:[%s11419_s5 + $0x360] sm:$0xff] }
 0x62a   : > { %9213 = vmatpush3.bf16.msra.mxu0 %v9212_v6  ;;  %9243 = vmatpush3.bf16.msra.mxu1 %v9212_v6  ;;  %v6357_v6 = vld [vmem:[%s11419_s5 + $0x250] sm:$0xff] }
 0x62b   : > { %9214 = vmatprep.subr.bf16.mxu0 %v9736_v37  ;;  %9244 = vmatprep.subr.bf16.mxu1 %v9736_v37  ;;  %v9339_v9 = vpack.c.bf16 %v6358_v8, %v6357_v6  ;;  %v6416_v6 = vld [vmem:[%s11421_s7 + $0x50] sm:$0xff]  ;;  %v6417_v8 = vld [vmem:[%s11421_s7 + $0x58] sm:$0xff] }
 0x62e   : > { %9216 = vmatpush3.bf16.msra.mxu0 %v9215_v10  ;;  %9246 = vmatpush3.bf16.msra.mxu1 %v9215_v10  ;;  %v6359_v10 = vld [vmem:[%s11419_s5 + $0x260] sm:$0xf] }
 0x62f   : > { %9217 = vmatprep.subr.bf16.mxu0 %v9736_v37  ;;  %9247 = vmatprep.subr.bf16.mxu1 %v9736_v37 }
 0x632   : > { %9219 = vmatpush3.bf16.msra.mxu0 %v9218_v13  ;;  %9249 = vmatpush3.bf16.msra.mxu1 %v9218_v13  ;;  %v9357_v13 = vpack.c.bf16 %v6365_v12, %v6364_v11  ;;  %v5376_v11 = vld [vmem:[%s11421_s7 + $0x8] sm:$0xff] }
 0x633   : > { %7984 = vmatprep.subr.mxu0 %v9738_v39  ;;  %8034 = vmatprep.subr.mxu1 %v9738_v39 }
 0x636   : > { %7985 = vmatpush3.msk.msra.mxu0 %vm3356_vm7, %v6262_v14  ;;  %8035 = vmatpush3.msk.msra.mxu1 %vm3356_vm7, %v6262_v14  ;;  %v6366_v14 = vld [vmem:[%s11419_s5 + $0x278] sm:$0xff] }
 0x637   : > { %7987 = vmatmul.mubr.msk.f32.vlgmr.msra.gmra.mrb[18].mxu0 %vm3352_vm8, %v10520_v19  ;;  %8037 = vmatmul.mubr.msk.f32.vlgmr.msra.gmra.mrb[22].mxu1 %vm3352_vm8, %v10522_v20  ;;  %v6316_v19 = vld [vmem:[%s11419_s5 + $0x178] sm:$0xff] }
 0x638   : > { %9250 = vmatprep.subr.bf16.mxu0 %v9736_v37  ;;  %9254 = vmatprep.subr.bf16.mxu1 %v9736_v37  ;;  %v9262_v20 = vpack.c.bf16 %v6316_v19, %v6315_v18  ;;  %v9360_v18 = vpack.c.bf16 %v6367_v15, %v6366_v14  ;;  %v6368_v19 = vld [vmem:[%s11419_s5 + $0x288] sm:$0xff]  ;;  %v5377_v15 = vld [vmem:[%s11421_s7 + $0x10] sm:$0xff] }
 0x639   : > { %9253 = vmatpush3.bf16.msk.msra.mxu0 %vm10421_vm5, %v10425_v60  ;;  %9257 = vmatpush3.bf16.msk.msra.mxu1 %vm10421_vm5, %v10425_v60  ;;  %v6419_v14 = vld [vmem:[%s11421_s7 + $0x68] sm:$0xff] }
 0x63a   : > { %8043 = vmatprep.mubr.msk.f32.mxu0 %vm9737_vm2, %v9738_v39  ;;  %8050 = vmatprep.mubr.msk.f32.mxu1 %vm9737_vm2, %v9738_v39 }
 0x63b   : > { %9258 = vmatprep.subr.bf16.mxu0 %v9736_v37  ;;  %9273 = vmatprep.subr.bf16.mxu1 %v9736_v37 }
 0x63c   : > { %8044 = vmatmul.mubr.msk.f32.vlgmr.msra.gmra.mrb[20].mxu0 %vm3014_vm6, %v6307_v16  ;;  %8051 = vmatmul.mubr.msk.f32.vlgmr.msra.gmra.mrb[24].mxu1 %vm3014_vm6, %v6310_v7 }
 0x63d   : > { %9260 = vmatpush3.bf16.msra.mxu0 %v9259_v17  ;;  %9275 = vmatpush3.bf16.msra.mxu1 %v9259_v17 }
 0x63e   : > { %9261 = vmatprep.subr.bf16.mxu0 %v9736_v37  ;;  %9276 = vmatprep.subr.bf16.mxu1 %v9736_v37 }
 0x63f   : > { %8075 = vmatprep.mubr.msk.f32.mxu0 %vm9737_vm2, %v9738_v39  ;;  %8100 = vmatprep.mubr.msk.f32.mxu1 %vm9737_vm2, %v9738_v39 }
 0x641   : > { %9263 = vmatpush3.bf16.msra.mxu0 %v9262_v20  ;;  %9278 = vmatpush3.bf16.msra.mxu1 %v9262_v20  ;;  %v6369_v20 = vld [vmem:[%s11419_s5 + $0x290] sm:$0xff] }
 0x642   : > { %9264 = vmatprep.subr.bf16.mxu0 %v9736_v37  ;;  %9279 = vmatprep.subr.bf16.mxu1 %v9736_v37  ;;  %v9363_v21 = vpack.c.bf16 %v6369_v20, %v6368_v19  ;;  %v5379_v19 = vld [vmem:[%s11421_s7 + $0x20] sm:$0xff] }
 0x645   : > { %9266 = vmatpush3.bf16.msra.mxu0 %v9265_v23  ;;  %9281 = vmatpush3.bf16.msra.mxu1 %v9265_v23  ;;  %v6371_v23 = vld [vmem:[%s11419_s5 + $0x2a0] sm:$0xff] }
 0x646   : > { %9267 = vmatprep.subr.bf16.mxu0 %v9736_v37  ;;  %9282 = vmatprep.subr.bf16.mxu1 %v9736_v37  ;;  %v9366_v24 = vpack.c.bf16 %v6371_v23, %v6370_v22  ;;  %v6422_v23 = vld [vmem:[%s11421_s7 + $0x80] sm:$0xff] }
 0x649   : > { %9269 = vmatpush3.bf16.msra.mxu0 %v9268_v26  ;;  %9284 = vmatpush3.bf16.msra.mxu1 %v9268_v26  ;;  %v6373_v26 = vld [vmem:[%s11419_s5 + $0x2b0] sm:$0xff] }
 0x64a   : > { %9270 = vmatprep.subr.bf16.mxu0 %v9736_v37  ;;  %9285 = vmatprep.subr.bf16.mxu1 %v9736_v37  ;;  %v9369_v27 = vpack.c.bf16 %v6373_v26, %v6372_v25  ;;  %v5381_v25 = vld [vmem:[%s11421_s7 + $0x30] sm:$0xff] }
 0x64d   : > { %9272 = vmatpush3.bf16.msra.mxu0 %v9271_v29  ;;  %9287 = vmatpush3.bf16.msra.mxu1 %v9271_v29  ;;  %v6385_v29 = vld [vmem:[%s11419_s5 + $0x2c0] sm:$0xff] }
 0x64e   : > { %8073 = vmatprep.subr.mxu0 %v9738_v39  ;;  %8098 = vmatprep.subr.mxu1 %v9738_v39 }
 0x651   : > { %8074 = vmatpush3.msk.msra.mxu0 %vm3356_vm7, %v6323_v30  ;;  %8099 = vmatpush3.msk.msra.mxu1 %vm3356_vm7, %v6323_v30  ;;  %v6386_v30 = vld [vmem:[%s11419_s5 + $0x2c8] sm:$0xff] }
 0x652   : > { %9288 = vmatprep.subr.bf16.mxu0 %v9736_v37  ;;  %9303 = vmatprep.subr.bf16.mxu1 %v9736_v37 }
 0x70f   : > { %v4021_v36 = vpop.f32.mrb[20].mxu0  ;;  %v4096_v38 = vpop.f32.mrb[24].mxu1 }
 0x710   : > { %v8045_v40 = vpop.f32.mrb[21].mxu0  ;;  %v8052_v41 = vpop.f32.mrb[25].mxu1  ;;  %8076 = vmatmul.mubr.msk.f32.vlgmr.msra.gmra.mrb[16].mxu0 %vm3352_vm8, %v4021_v36  ;;  %8101 = vmatmul.mubr.msk.f32.vlgmr.msra.gmra.mrb[20].mxu1 %vm3352_vm8, %v4096_v38 }
 0x711   : > { %9290 = vmatpush3.bf16.msra.mxu0 %v9289_v33  ;;  %9305 = vmatpush3.bf16.msra.mxu1 %v9289_v33  ;;  %v9395_v33 = vpack.c.bf16 %v6386_v30, %v6385_v29  ;;  %v6391_v40 = vld [vmem:[%s11419_s5 + $0x2f0] sm:$0xff]  ;;  %v6392_v41 = vld [vmem:[%s11419_s5 + $0x2f8] sm:$0xff] }
 0x712   : > { %9291 = vmatprep.subr.bf16.mxu0 %v9736_v37  ;;  %9306 = vmatprep.subr.bf16.mxu1 %v9736_v37  ;;  %v6424_v29 = vld [vmem:[%s11421_s7 + $0x90] sm:$0xff]  ;;  %v6425_v30 = vld [vmem:[%s11421_s7 + $0x98] sm:$0xff] }
 0x713   : > { %8125 = vmatprep.mubr.msk.f32.mxu0 %vm9737_vm2, %v9738_v39  ;;  %8150 = vmatprep.mubr.msk.f32.mxu1 %vm9737_vm2, %v9738_v39 }
 0x715   : > { %9293 = vmatpush3.bf16.msra.mxu0 %v9292_v42  ;;  %9308 = vmatpush3.bf16.msra.mxu1 %v9292_v42  ;;  %v9404_v42 = vpack.c.bf16 %v6392_v41, %v6391_v40 }
 0x716   : > { %9294 = vmatprep.subr.bf16.mxu0 %v9736_v37  ;;  %9309 = vmatprep.subr.bf16.mxu1 %v9736_v37 }
 0x719   : > { %9296 = vmatpush3.bf16.msra.mxu0 %v9295_v45  ;;  %9311 = vmatpush3.bf16.msra.mxu1 %v9295_v45  ;;  %v9407_v45 = vpack.c.bf16 %v6394_v44, %v6393_v43 }
 0x71a   : > { %9297 = vmatprep.subr.bf16.mxu0 %v9736_v37  ;;  %9312 = vmatprep.subr.bf16.mxu1 %v9736_v37 }
 0x71d   : > { %9299 = vmatpush3.bf16.msra.mxu0 %v9298_v49  ;;  %9314 = vmatpush3.bf16.msra.mxu1 %v9298_v49  ;;  %v6401_v49 = vld [vmem:[%s11419_s5 + $0x320] sm:$0xff] }
 0x71e   : > { %9300 = vmatprep.subr.bf16.mxu0 %v9736_v37  ;;  %9315 = vmatprep.subr.bf16.mxu1 %v9736_v37  ;;  %v9425_v50 = vpack.c.bf16 %v6401_v49, %v6400_v48 }
 0x721   : > { %9302 = vmatpush3.bf16.msra.mxu0 %v9301_v52  ;;  %9317 = vmatpush3.bf16.msra.mxu1 %v9301_v52  ;;  %v6403_v52 = vld [vmem:[%s11419_s5 + $0x330] sm:$0xff] }
 0x722   : > { %8123 = vmatprep.subr.mxu0 %v9738_v39  ;;  %8148 = vmatprep.subr.mxu1 %v9738_v39 }
 0x725   : > { %8124 = vmatpush3.msk.msra.mxu0 %vm3356_vm7, %v6338_v47  ;;  %8149 = vmatpush3.msk.msra.mxu1 %vm3356_vm7, %v6338_v47 }
 0x726   : > { %8126 = vmatmul.mubr.msk.f32.vlgmr.msra.gmra.mrb[18].mxu0 %vm3352_vm8, %v4021_v36  ;;  %8151 = vmatmul.mubr.msk.f32.vlgmr.msra.gmra.mrb[22].mxu1 %vm3352_vm8, %v4096_v38  ;;  %v6390_v36 = vld [vmem:[%s11419_s5 + $0x2e8] sm:$0xff] }
 0x727   : > { %9318 = vmatprep.subr.bf16.mxu0 %v9736_v37  ;;  %9322 = vmatprep.subr.bf16.mxu1 %v9736_v37  ;;  %v9401_v38 = vpack.c.bf16 %v6390_v36, %v6389_v35 }
 0x728   : > { %9321 = vmatpush3.bf16.msk.msra.mxu0 %vm10421_vm5, %v10425_v60  ;;  %9325 = vmatpush3.bf16.msk.msra.mxu1 %vm10421_vm5, %v10425_v60 }
 0x729   : > { %8157 = vmatprep.mubr.msk.f32.mxu0 %vm9737_vm2, %v9738_v39  ;;  %8164 = vmatprep.mubr.msk.f32.mxu1 %vm9737_vm2, %v9738_v39 }
 0x72a   : > { %9326 = vmatprep.subr.bf16.mxu0 %v9736_v37  ;;  %9341 = vmatprep.subr.bf16.mxu1 %v9736_v37 }
 0x72b   : > { %8158 = vmatmul.mubr.msk.f32.vlgmr.msra.gmra.mrb[22].mxu0 %vm3014_vm6, %v6343_v55  ;;  %8165 = vmatmul.mubr.msk.f32.vlgmr.msra.gmra.mrb[26].mxu1 %vm3014_vm6, %v6346_v56  ;;  %v9428_v56 = vpack.c.bf16 %v6403_v52, %v6402_v51  ;;  %v6429_v51 = vld [vmem:[%s11421_s7 + $0xa8] sm:$0xff]  ;;  %v6439_v52 = vld [vmem:[%s11421_s7 + $0xf0] sm:$0xff] }
 0x72c   : > { %9328 = vmatpush3.bf16.msra.mxu0 %v9327_v57  ;;  %9343 = vmatpush3.bf16.msra.mxu1 %v9327_v57  ;;  %v6404_v57 = vld [vmem:[%s11419_s5 + $0x338] sm:$0xff] }
 0x72d   : > { %9329 = vmatprep.subr.bf16.mxu0 %v9736_v37  ;;  %9344 = vmatprep.subr.bf16.mxu1 %v9736_v37  ;;  %v9431_v61 = vpack.c.bf16 %v6405_v58, %v6404_v57  ;;  %v6441_v57 = vld [vmem:[%s11421_s7 + $0x100] sm:$0xff]  ;;  %v6442_v58 = vld [vmem:[%s11421_s7 + $0x108] sm:$0xff] }
 0x72e   : > { %8189 = vmatprep.mubr.msk.f32.mxu0 %vm9737_vm2, %v9738_v39  ;;  %8214 = vmatprep.mubr.msk.f32.mxu1 %vm9737_vm2, %v9738_v39 }
 0x730   : > { %9331 = vmatpush3.bf16.msra.mxu0 %v9330_v62  ;;  %9346 = vmatpush3.bf16.msra.mxu1 %v9330_v62  ;;  %v6406_v62 = vld [vmem:[%s11419_s5 + $0x348] sm:$0xff] }
 0x731   : > { %9332 = vmatprep.subr.bf16.mxu0 %v9736_v37  ;;  %9347 = vmatprep.subr.bf16.mxu1 %v9736_v37  ;;  %v9434_v0 = vpack.c.bf16 %v6407_v63, %v6406_v62 }
 0x734   : > { %9334 = vmatpush3.bf16.msra.mxu0 %v9333_v1  ;;  %9349 = vmatpush3.bf16.msra.mxu1 %v9333_v1  ;;  %v6408_v1 = vld [vmem:[%s11419_s5 + $0x358] sm:$0xff] }
 0x735   : > { %9335 = vmatprep.subr.bf16.mxu0 %v9736_v37  ;;  %9350 = vmatprep.subr.bf16.mxu1 %v9736_v37  ;;  %v9437_v3 = vpack.c.bf16 %v6409_v2, %v6408_v1  ;;  %v6432_v1 = vld [vmem:[%s11421_s7 + $0xc0] sm:$0xff]  ;;  %v6433_v2 = vld [vmem:[%s11421_s7 + $0xc8] sm:$0xff] }
 0x738   : > { %9337 = vmatpush3.bf16.msra.mxu0 %v9336_v4  ;;  %9352 = vmatpush3.bf16.msra.mxu1 %v9336_v4  ;;  %v6410_v4 = vld [vmem:[%s11419_s5 + $0x368] sm:$0xf] }
 0x739   : > { %9338 = vmatprep.subr.bf16.mxu0 %v9736_v37  ;;  %9353 = vmatprep.subr.bf16.mxu1 %v9736_v37 }
 0x73c   : > { %9340 = vmatpush3.bf16.msra.mxu0 %v9339_v9  ;;  %9355 = vmatpush3.bf16.msra.mxu1 %v9339_v9  ;;  %v5375_v9 = vld [vmem:[%s11421_s7] sm:$0xff] }
 0x73d   : > { %8187 = vmatprep.subr.mxu0 %v9738_v39  ;;  %8212 = vmatprep.subr.mxu1 %v9738_v39  ;;  %v9470_v12 = vpack.c.bf16 %v5376_v11, %v5375_v9  ;;  %v6434_v9 = vld [vmem:[%s11421_s7 + $0xd0] sm:$0xff]  ;;  %v6445_v11 = vld [vmem:[%s11421_s7 + $0x120] sm:$0xff] }
 0x740   : > { %8188 = vmatpush3.msk.msra.mxu0 %vm3356_vm7, %v6359_v10  ;;  %8213 = vmatpush3.msk.msra.mxu1 %vm3356_vm7, %v6359_v10  ;;  %v9455_v10 = vpack.c.bf16 %v6417_v8, %v6416_v6  ;;  %v9491_v6 = vpack.c.bf16 %v6433_v2, %v6432_v1  ;;  %v5899_v1 = vld [vmem:[%s11425_s11 + $0x18] sm:$0xff] }
 0x741   : > { %9356 = vmatprep.subr.bf16.mxu0 %v9736_v37  ;;  %9371 = vmatprep.subr.bf16.mxu1 %v9736_v37 }
 0x7fe   : > { %v4491_v5 = vpop.f32.mrb[22].mxu0  ;;  %v4566_v16 = vpop.f32.mrb[26].mxu1 }
 0x7ff   : > { %v8159_v7 = vpop.f32.mrb[23].mxu0  ;;  %v8166_v17 = vpop.f32.mrb[27].mxu1  ;;  %8190 = vmatmul.mubr.msk.f32.vlgmr.msra.gmra.mrb[16].mxu0 %vm3352_vm8, %v4491_v5  ;;  %8215 = vmatmul.mubr.msk.f32.vlgmr.msra.gmra.mrb[20].mxu1 %vm3352_vm8, %v4566_v16 }
 0x800   : > { %9358 = vmatpush3.bf16.msra.mxu0 %v9357_v13  ;;  %9373 = vmatpush3.bf16.msra.mxu1 %v9357_v13  ;;  %v6418_v13 = vld [vmem:[%s11421_s7 + $0x60] sm:$0xff]  ;;  %v6420_v17 = vld [vmem:[%s11421_s7 + $0x70] sm:$0xff] }
 0x801   : > { %9359 = vmatprep.subr.bf16.mxu0 %v9736_v37  ;;  %9374 = vmatprep.subr.bf16.mxu1 %v9736_v37 }
 0x802   : > { %8239 = vmatprep.mubr.msk.f32.mxu0 %vm9737_vm2, %v9738_v39  ;;  %8264 = vmatprep.mubr.msk.f32.mxu1 %vm9737_vm2, %v9738_v39 }
 0x804   : > { %9361 = vmatpush3.bf16.msra.mxu0 %v9360_v18  ;;  %9376 = vmatpush3.bf16.msra.mxu1 %v9360_v18  ;;  %v6421_v18 = vld [vmem:[%s11421_s7 + $0x78] sm:$0xff] }
 0x805   : > { %9362 = vmatprep.subr.bf16.mxu0 %v9736_v37  ;;  %9377 = vmatprep.subr.bf16.mxu1 %v9736_v37  ;;  %v9461_v20 = vpack.c.bf16 %v6421_v18, %v6420_v17 }
 0x808   : > { %9364 = vmatpush3.bf16.msra.mxu0 %v9363_v21  ;;  %9379 = vmatpush3.bf16.msra.mxu1 %v9363_v21  ;;  %v5380_v21 = vld [vmem:[%s11421_s7 + $0x28] sm:$0xff] }
 0x809   : > { %9365 = vmatprep.subr.bf16.mxu0 %v9736_v37  ;;  %9380 = vmatprep.subr.bf16.mxu1 %v9736_v37  ;;  %v9476_v22 = vpack.c.bf16 %v5380_v21, %v5379_v19  ;;  %v6450_v19 = vld [vmem:[%s11421_s7 + $0x140] sm:$0xff] }
 0x80c   : > { %9367 = vmatpush3.bf16.msra.mxu0 %v9366_v24  ;;  %9382 = vmatpush3.bf16.msra.mxu1 %v9366_v24  ;;  %v6423_v24 = vld [vmem:[%s11421_s7 + $0x88] sm:$0xff] }
 0x80d   : > { %9368 = vmatprep.subr.bf16.mxu0 %v9736_v37  ;;  %9383 = vmatprep.subr.bf16.mxu1 %v9736_v37  ;;  %v9464_v26 = vpack.c.bf16 %v6423_v24, %v6422_v23  ;;  %v6453_v23 = vld [vmem:[%s11421_s7 + $0x158] sm:$0xff] }
 0x810   : > { %9370 = vmatpush3.bf16.msra.mxu0 %v9369_v27  ;;  %9385 = vmatpush3.bf16.msra.mxu1 %v9369_v27  ;;  %v5382_v27 = vld [vmem:[%s11421_s7 + $0x38] sm:$0xff] }
 0x811   : > { %8237 = vmatprep.subr.mxu0 %v9738_v39  ;;  %8262 = vmatprep.subr.mxu1 %v9738_v39 }
 0x814   : > { %8238 = vmatpush3.msk.msra.mxu0 %vm3356_vm7, %v6374_v28  ;;  %8263 = vmatpush3.msk.msra.mxu1 %vm3356_vm7, %v6374_v28  ;;  %v9479_v28 = vpack.c.bf16 %v5382_v27, %v5381_v25  ;;  %v6454_v27 = vld [vmem:[%s11421_s7 + $0x160] sm:$0xff] }
 0x815   : > { %8240 = vmatmul.mubr.msk.f32.vlgmr.msra.gmra.mrb[18].mxu0 %vm3352_vm8, %v4491_v5  ;;  %8265 = vmatmul.mubr.msk.f32.vlgmr.msra.gmra.mrb[22].mxu1 %vm3352_vm8, %v4566_v16  ;;  %v9458_v5 = vpack.c.bf16 %v6419_v14, %v6418_v13  ;;  %v5378_v16 = vld [vmem:[%s11421_s7 + $0x18] sm:$0xff] }
 0x816   : > { %9386 = vmatprep.subr.bf16.mxu0 %v9736_v37  ;;  %9390 = vmatprep.subr.bf16.mxu1 %v9736_v37  ;;  %v9473_v7 = vpack.c.bf16 %v5378_v16, %v5377_v15  ;;  %v6436_v15 = vld [vmem:[%s11421_s7 + $0xe0] sm:$0xff]  ;;  %v6447_v16 = vld [vmem:[%s11421_s7 + $0x130] sm:$0xff] }
 0x817   : > { %9389 = vmatpush3.bf16.msk.msra.mxu0 %vm10421_vm5, %v10425_v60  ;;  %9393 = vmatpush3.bf16.msk.msra.mxu1 %vm10421_vm5, %v10425_v60  ;;  %v6388_v60 = vld [vmem:[%s11419_s5 + $0x2d8] sm:$0xff] }
 0x818   : > { %8271 = vmatprep.mubr.msk.f32.mxu0 %vm9737_vm2, %v9738_v39  ;;  %8278 = vmatprep.mubr.msk.f32.mxu1 %vm9737_vm2, %v9738_v39  ;;  %v9398_v34 = vpack.c.bf16 %v6388_v60, %v6387_v59 }
 0x819   : > { %9394 = vmatprep.subr.bf16.mxu0 %v9736_v37  ;;  %9409 = vmatprep.subr.bf16.mxu1 %v9736_v37 }
 0x81a   : > { %8272 = vmatmul.mubr.msk.f32.vlgmr.msra.gmra.mrb[24].mxu0 %vm3014_vm6, %v6379_v31  ;;  %8279 = vmatmul.mubr.msk.f32.vlgmr.msra.gmra.mrb[28].mxu1 %vm3014_vm6, %v6382_v32  ;;  %v5383_v31 = vld [vmem:[%s11421_s7 + $0x40] sm:$0xff]  ;;  %v9467_v32 = vpack.c.bf16 %v6425_v30, %v6424_v29  ;;  %v6456_v30 = vld [vmem:[%s11421_s7 + $0x170] sm:$0xff] }
 0x81b   : > { %9396 = vmatpush3.bf16.msra.mxu0 %v9395_v33  ;;  %9411 = vmatpush3.bf16.msra.mxu1 %v9395_v33  ;;  %v5384_v33 = vld [vmem:[%s11421_s7 + $0x48] sm:$0xff] }
 0x81c   : > { %9397 = vmatprep.subr.bf16.mxu0 %v9736_v37  ;;  %9412 = vmatprep.subr.bf16.mxu1 %v9736_v37  ;;  %v9482_v59 = vpack.c.bf16 %v5384_v33, %v5383_v31  ;;  %v6457_v31 = vld [vmem:[%s11421_s7 + $0x178] sm:$0xff]  ;;  %v6458_v33 = vld [vmem:[%s11421_s7 + $0x180] sm:$0xff] }
 0x81d   : > { %8303 = vmatprep.mubr.msk.f32.mxu0 %vm9737_vm2, %v9738_v39  ;;  %8328 = vmatprep.mubr.msk.f32.mxu1 %vm9737_vm2, %v9738_v39 }
 0x81f   : > { %9399 = vmatpush3.bf16.msra.mxu0 %v9398_v34  ;;  %9414 = vmatpush3.bf16.msra.mxu1 %v9398_v34 }
 0x820   : > { %9400 = vmatprep.subr.bf16.mxu0 %v9736_v37  ;;  %9415 = vmatprep.subr.bf16.mxu1 %v9736_v37 }
 0x823   : > { %9402 = vmatpush3.bf16.msra.mxu0 %v9401_v38  ;;  %9417 = vmatpush3.bf16.msra.mxu1 %v9401_v38 }
 0x824   : > { %9403 = vmatprep.subr.bf16.mxu0 %v9736_v37  ;;  %9418 = vmatprep.subr.bf16.mxu1 %v9736_v37 }
 0x827   : > { %9405 = vmatpush3.bf16.msra.mxu0 %v9404_v42  ;;  %9420 = vmatpush3.bf16.msra.mxu1 %v9404_v42 }
 0x828   : > { %9406 = vmatprep.subr.bf16.mxu0 %v9736_v37  ;;  %9421 = vmatprep.subr.bf16.mxu1 %v9736_v37 }
 0x82b   : > { %9408 = vmatpush3.bf16.msra.mxu0 %v9407_v45  ;;  %9423 = vmatpush3.bf16.msra.mxu1 %v9407_v45  ;;  %v6415_v45 = vld [vmem:[%s11420_s6] ss:$0 sm:$0xff] }
 0x82c   : > { %8301 = vmatprep.subr.mxu0 %v9738_v39  ;;  %8326 = vmatprep.subr.mxu1 %v9738_v39 }
 0x82f   : > { %8302 = vmatpush3.msk.msra.mxu0 %vm3356_vm7, %v6395_v46  ;;  %8327 = vmatpush3.msk.msra.mxu1 %vm3356_vm7, %v6395_v46 }
 0x830   : > { %9424 = vmatprep.subr.bf16.mxu0 %v9736_v37  ;;  %9439 = vmatprep.subr.bf16.mxu1 %v9736_v37 }
 0x8ed   : > { %v4961_v47 = vpop.f32.mrb[24].mxu0  ;;  %v5036_v53 = vpop.f32.mrb[28].mxu1 }
 0x8ee   : > { %v8273_v54 = vpop.f32.mrb[25].mxu0  ;;  %v8280_v55 = vpop.f32.mrb[29].mxu1  ;;  %8304 = vmatmul.mubr.msk.f32.vlgmr.msra.gmra.mrb[16].mxu0 %vm3352_vm8, %v4961_v47  ;;  %8329 = vmatmul.mubr.msk.f32.vlgmr.msra.gmra.mrb[20].mxu1 %vm3352_vm8, %v5036_v53 }
 0x8ef   : > { %9426 = vmatpush3.bf16.msra.mxu0 %v9425_v50  ;;  %9441 = vmatpush3.bf16.msra.mxu1 %v9425_v50  ;;  %v6428_v50 = vld [vmem:[%s11421_s7 + $0xa0] sm:$0xff]  ;;  %v6430_v55 = vld [vmem:[%s11421_s7 + $0xb0] sm:$0xff] }
 0x8f0   : > { %9427 = vmatprep.subr.bf16.mxu0 %v9736_v37  ;;  %9442 = vmatprep.subr.bf16.mxu1 %v9736_v37 }
 0x8f1   : > { %8353 = vmatprep.mubr.msk.f32.mxu0 %vm9737_vm2, %v9738_v39  ;;  %8378 = vmatprep.mubr.msk.f32.mxu1 %vm9737_vm2, %v9738_v39 }
 0x8f3   : > { %9429 = vmatpush3.bf16.msra.mxu0 %v9428_v56  ;;  %9444 = vmatpush3.bf16.msra.mxu1 %v9428_v56  ;;  %v6431_v56 = vld [vmem:[%s11421_s7 + $0xb8] sm:$0xff] }
 0x8f4   : > { %9430 = vmatprep.subr.bf16.mxu0 %v9736_v37  ;;  %9445 = vmatprep.subr.bf16.mxu1 %v9736_v37  ;;  %v9488_v63 = vpack.c.bf16 %v6431_v56, %v6430_v55  ;;  %v5817_v55 = vld [vmem:[%s11423_s9 + $0x60] sm:$0xff]  ;;  %v5818_v56 = vld [vmem:[%s11423_s9 + $0x68] sm:$0xff] }
 0x8f7   : > { %9432 = vmatpush3.bf16.msra.mxu0 %v9431_v61  ;;  %9447 = vmatpush3.bf16.msra.mxu1 %v9431_v61 }
 0x8f8   : > { %9433 = vmatprep.subr.bf16.mxu0 %v9736_v37  ;;  %9448 = vmatprep.subr.bf16.mxu1 %v9736_v37 }
 0x8fb   : > { %9435 = vmatpush3.bf16.msra.mxu0 %v9434_v0  ;;  %9450 = vmatpush3.bf16.msra.mxu1 %v9434_v0  ;;  %v9503_v0 = vpack.c.bf16 %v6442_v58, %v6441_v57  ;;  %v9548_v57 = vpack.c.bf16 %v5818_v56, %v5817_v55  ;;  %v5819_v58 = vld [vmem:[%s11423_s9 + $0x70] sm:$0xff] }
 0x8fc   : > { %9436 = vmatprep.subr.bf16.mxu0 %v9736_v37  ;;  %9451 = vmatprep.subr.bf16.mxu1 %v9736_v37 }
 0x8ff   : > { %9438 = vmatpush3.bf16.msra.mxu0 %v9437_v3  ;;  %9453 = vmatpush3.bf16.msra.mxu1 %v9437_v3  ;;  %v6443_v3 = vld [vmem:[%s11421_s7 + $0x110] sm:$0xff] }
 0x900   : > { %8351 = vmatprep.subr.mxu0 %v9738_v39  ;;  %8376 = vmatprep.subr.mxu1 %v9738_v39 }
 0x903   : > { %8352 = vmatpush3.msk.msra.mxu0 %vm3356_vm7, %v6410_v4  ;;  %8377 = vmatpush3.msk.msra.mxu1 %vm3356_vm7, %v6410_v4  ;;  %v6444_v4 = vld [vmem:[%s11421_s7 + $0x118] sm:$0xff] }
 0x904   : > { %8354 = vmatmul.mubr.msk.f32.vlgmr.msra.gmra.mrb[18].mxu0 %vm3352_vm8, %v4961_v47  ;;  %8379 = vmatmul.mubr.msk.f32.vlgmr.msra.gmra.mrb[22].mxu1 %vm3352_vm8, %v5036_v53  ;;  %v6440_v47 = vld [vmem:[%s11421_s7 + $0xf8] sm:$0xff]  ;;  %v9485_v53 = vpack.c.bf16 %v6429_v51, %v6428_v50  ;;  %v9506_v8 = vpack.c.bf16 %v6444_v4, %v6443_v3  ;;  %v5813_v50 = vld [vmem:[%s11423_s9 + $0x40] sm:$0xff]  ;;  %v5814_v51 = vld [vmem:[%s11423_s9 + $0x48] sm:$0xff] }
 0x905   : > { %9454 = vmatprep.subr.bf16.mxu0 %v9736_v37  ;;  %9469 = vmatprep.subr.bf16.mxu1 %v9736_v37  ;;  %v9500_v54 = vpack.c.bf16 %v6440_v47, %v6439_v52  ;;  %v9542_v52 = vpack.c.bf16 %v5814_v51, %v5813_v50  ;;  %v5815_v47 = vld [vmem:[%s11423_s9 + $0x50] sm:$0xff]  ;;  %v5900_v3 = vld [vmem:[%s11425_s11 + $0x20] sm:$0xff]  ;;  %v5901_v4 = vld [vmem:[%s11425_s11 + $0x28] sm:$0xff] }
 0x906   : > { %8401 = vmatprep.mubr.msk.f32.mxu0 %vm9737_vm2, %v9738_v39  ;;  %8424 = vmatprep.mubr.msk.f32.mxu1 %vm9737_vm2, %v9738_v39 }
 0x907   : > { %9456 = vmatpush3.bf16.msra.mxu0 %v9455_v10  ;;  %9471 = vmatpush3.bf16.msra.mxu1 %v9470_v12  ;;  %v6435_v10 = vld [vmem:[%s11421_s7 + $0xd8] sm:$0xff]  ;;  %v6446_v12 = vld [vmem:[%s11421_s7 + $0x128] sm:$0xff] }
 0x908   : > { %9457 = vmatprep.subr.bf16.mxu0 %v9736_v37  ;;  %9472 = vmatprep.subr.bf16.mxu1 %v9736_v37  ;;  %v9494_v13 = vpack.c.bf16 %v6435_v10, %v6434_v9  ;;  %v9509_v14 = vpack.c.bf16 %v6446_v12, %v6445_v11  ;;  %v5903_v9 = vld [vmem:[%s11425_s11 + $0x38] sm:$0xff] }
 0x90b   : > { %9459 = vmatpush3.bf16.msra.mxu0 %v9458_v5  ;;  %9474 = vmatpush3.bf16.msra.mxu1 %v9473_v7  ;;  %v6437_v5 = vld [vmem:[%s11421_s7 + $0xe8] sm:$0xff]  ;;  %v6448_v7 = vld [vmem:[%s11421_s7 + $0x138] sm:$0xff] }
 0x90c   : > { %9460 = vmatprep.subr.bf16.mxu0 %v9736_v37  ;;  %9475 = vmatprep.subr.bf16.mxu1 %v9736_v37  ;;  %v9497_v17 = vpack.c.bf16 %v6437_v5, %v6436_v15  ;;  %v9512_v18 = vpack.c.bf16 %v6448_v7, %v6447_v16 }
 0x90f   : > { %9462 = vmatpush3.bf16.msra.mxu0 %v9461_v20  ;;  %9477 = vmatpush3.bf16.msra.mxu1 %v9476_v22  ;;  %v6451_v20 = vld [vmem:[%s11421_s7 + $0x148] sm:$0xff]  ;;  %v6452_v22 = vld [vmem:[%s11421_s7 + $0x150] sm:$0xff] }
 0x910   : > { %9463 = vmatprep.subr.bf16.mxu0 %v9736_v37  ;;  %9478 = vmatprep.subr.bf16.mxu1 %v9736_v37  ;;  %v9515_v21 = vpack.c.bf16 %v6451_v20, %v6450_v19 }
 0x913   : > { %9465 = vmatpush3.bf16.msra.mxu0 %v9464_v26  ;;  %9480 = vmatpush3.bf16.msra.mxu1 %v9479_v28  ;;  %v9518_v26 = vpack.c.bf16 %v6453_v23, %v6452_v22  ;;  %v6455_v28 = vld [vmem:[%s11421_s7 + $0x168] sm:$0xff] }
 0x914   : > { %9466 = vmatprep.subr.bf16.mxu0 %v9736_v37  ;;  %9481 = vmatprep.subr.bf16.mxu1 %v9736_v37  ;;  %v9521_v29 = vpack.c.bf16 %v6455_v28, %v6454_v27  ;;  %v5906_v28 = vld [vmem:[%s11425_s11 + $0x50] sm:$0xf] }
 0x917   : > { %9468 = vmatpush3.bf16.msra.mxu0 %v9467_v32  ;;  %9483 = vmatpush3.bf16.msra.mxu1 %v9482_v59  ;;  %v9524_v32 = vpack.c.bf16 %v6457_v31, %v6456_v30  ;;  %v6459_v59 = vld [vmem:[%s11421_s7 + $0x188] sm:$0xff] }
 0x918   : > { %9484 = vmatprep.subr.bf16.mxu0 %v9736_v37  ;;  %9499 = vmatprep.subr.bf16.mxu1 %v9736_v37 }
 0x9c1   : > { %v5124_v60 = vpop.f32.mrb[16].mxu0  ;;  %v5198_v34 = vpop.f32.mrb[20].mxu1 }
 0x9c2   : > { %v8305_v35 = vpop.f32.mrb[17].mxu0  ;;  %v8330_v36 = vpop.f32.mrb[21].mxu1 }
 0x9c3   : > { %v5805_v35 = vld [vmem:[%s11423_s9] sm:$0xff]  ;;  %v5806_v36 = vld [vmem:[%s11423_s9 + $0x8] sm:$0xff] }
 0x9d7   : > { %v5284_v38 = vpop.f32.mrb[18].mxu0  ;;  %v5355_v40 = vpop.f32.mrb[22].mxu1 }
 0x9d8   : > { %v5360_v41 = vmax.f32 %v5124_v60, %v5284_v38  ;;  %v5361_v42 = vmax.f32 %v5198_v34, %v5355_v40  ;;  %v8355_v43 = vpop.f32.mrb[19].mxu0  ;;  %v8380_v44 = vpop.f32.mrb[23].mxu1  ;;  %v9527_v60 = vpack.c.bf16 %v6459_v59, %v6458_v33  ;;  %v9530_v38 = vpack.c.bf16 %v5806_v36, %v5805_v35  ;;  %v5807_v40 = vld [vmem:[%s11423_s9 + $0x10] sm:$0xff] }
 0x9d9   : > { %v5809_v43 = vld [vmem:[%s11423_s9 + $0x20] sm:$0xff]  ;;  %v5810_v44 = vld [vmem:[%s11423_s9 + $0x28] sm:$0xff] }
 0x9da   : > { %v5362_v46 = vmax.f32 %v5360_v41, %v5361_v42  ;;  %v5808_v41 = vld [vmem:[%s11423_s9 + $0x18] sm:$0xff] }
 0x9db   : > { %v9533_v42 = vpack.c.bf16 %v5808_v41, %v5807_v40 }
 0x9dc   : > { %v5370_v48 = vadd.f32 %v6415_v45, %v5362_v46  ;;  %v5811_v45 = vld [vmem:[%s11423_s9 + $0x30] sm:$0xff]  ;;  %v9536_v46 = vpack.c.bf16 %v5810_v44, %v5809_v43 }
 0x9de   : > { %v5371_v49 = vmax.f32 %v5370_v48, 0.0  ;;  %v5812_v48 = vld [vmem:[%s11423_s9 + $0x38] sm:$0xff] }
 0x9e0   : > { %5373 = vst.msk [vmem:[#allocation2] sm:$0x1f] %vm5372_vm9, %v5371_v49  ;;  %v9539_v49 = vpack.c.bf16 %v5812_v48, %v5811_v45 }
 0x9e7   : > { %v5385_v61 = vld [vmem:[#allocation2 + $0x1] sm:$0x1]  ;;  %v5374_v62 = vld [vmem:[#allocation2] sm:$0x1]  ;;  %v5544_v24 = vld [vmem:[#allocation2 + $0x2] sm:$0x1] }
 0x9e8   : > { %8402 = vmatmul.mubr.msk.f32.vlgmr.msra.gmra.mrb[26].mxu0 %vm5397_vm10, %v5385_v61  ;;  %8425 = vmatmul.mubr.msk.f32.vlgmr.msra.gmra.mrb[30].mxu1 %vm5397_vm10, %v5374_v62  ;;  %v5630_v25 = vld [vmem:[#allocation2 + $0x3] sm:$0x1]  ;;  %v5716_v34 = vld [vmem:[#allocation2 + $0x4] sm:$0x1]  ;;  %v5897_v62 = vld [vmem:[%s11425_s11 + $0x8] sm:$0xff] }
 0x9e9   : > { %9486 = vmatpush3.bf16.msra.mxu0 %v9485_v53  ;;  %9501 = vmatpush3.bf16.msra.mxu1 %v9500_v54  ;;  %v5816_v53 = vld [vmem:[%s11423_s9 + $0x58] sm:$0xff]  ;;  %v5896_v61 = vld [vmem:[%s11425_s11] sm:$0xff] }
 0x9ea   : > { %9487 = vmatprep.subr.bf16.mxu0 %v9736_v37  ;;  %9502 = vmatprep.subr.bf16.mxu1 %v9736_v37  ;;  %v9545_v54 = vpack.c.bf16 %v5816_v53, %v5815_v47 }
 0x9eb   : > { %8447 = vmatprep.mubr.msk.f32.mxu0 %vm9737_vm2, %v9738_v39  ;;  %8470 = vmatprep.mubr.msk.f32.mxu1 %vm9737_vm2, %v9738_v39 }
 0x9ed   : > { %9489 = vmatpush3.bf16.msra.mxu0 %v9488_v63  ;;  %9504 = vmatpush3.bf16.msra.mxu1 %v9503_v0  ;;  %v5898_v63 = vld [vmem:[%s11425_s11 + $0x10] sm:$0xff]  ;;  %v9551_v0 = vpack.c.bf16 %v5897_v62, %v5896_v61 }
 0x9ee   : > { %9490 = vmatprep.subr.bf16.mxu0 %v9736_v37  ;;  %9505 = vmatprep.subr.bf16.mxu1 %v9736_v37  ;;  %v9554_v2 = vpack.c.bf16 %v5899_v1, %v5898_v63 }
 0x9f1   : > { %9492 = vmatpush3.bf16.msra.mxu0 %v9491_v6  ;;  %9507 = vmatpush3.bf16.msra.mxu1 %v9506_v8  ;;  %v9557_v6 = vpack.c.bf16 %v5901_v4, %v5900_v3  ;;  %v5902_v8 = vld [vmem:[%s11425_s11 + $0x30] sm:$0xff] }
 0x9f2   : > { %9493 = vmatprep.subr.bf16.mxu0 %v9736_v37  ;;  %9508 = vmatprep.subr.bf16.mxu1 %v9736_v37  ;;  %v9560_v10 = vpack.c.bf16 %v5903_v9, %v5902_v8 }
 0x9f5   : > { %9495 = vmatpush3.bf16.msra.mxu0 %v9494_v13  ;;  %9510 = vmatpush3.bf16.msra.mxu1 %v9509_v14 }
 0x9f6   : > { %9496 = vmatprep.subr.bf16.mxu0 %v9736_v37  ;;  %9511 = vmatprep.subr.bf16.mxu1 %v9736_v37 }
 0x9f9   : > { %9498 = vmatpush3.bf16.msra.mxu0 %v9497_v17  ;;  %9513 = vmatpush3.bf16.msra.mxu1 %v9512_v18 }
 0x9fa   : > { %9514 = vmatprep.subr.bf16.mxu0 %v9736_v37  ;;  %9529 = vmatprep.subr.bf16.mxu1 %v9736_v37 }
 0x9fc   : > { %8448 = vmatmul.mubr.msk.f32.vlgmr.msra.gmra.mrb[28].mxu0 %vm5397_vm10, %v5544_v24  ;;  %8471 = vmatmul.mubr.msk.f32.vlgmr.msra.gmra.mrb[32].mxu1 %vm5397_vm10, %v5630_v25  ;;  %v5904_v25 = vld [vmem:[%s11425_s11 + $0x40] sm:$0xff] }
 0x9fd   : > { %9516 = vmatpush3.bf16.msra.mxu0 %v9515_v21  ;;  %8493 = vmatprep.mubr.msk.f32.mxu0 %vm9737_vm2, %v9738_v39  ;;  %v5802_v21 = vld [vmem:[%s11422_s8] sm:$0x1] }
 0x9fe   : > { %9517 = vmatprep.subr.bf16.mxu0 %v9736_v37  ;;  %8526 = vmatprep.mubr.msk.f32.mxu1 %vm9737_vm2, %v9738_v39 }
 0x9ff   : > { %9531 = vmatpush3.bf16.msra.mxu1 %v9530_v38 }
 0xa00   : > { %9532 = vmatprep.subr.bf16.mxu1 %v9736_v37 }
 0xa01   : > { %9519 = vmatpush3.bf16.msra.mxu0 %v9518_v26  ;;  %v5905_v26 = vld [vmem:[%s11425_s11 + $0x48] sm:$0xff] }
 0xa02   : > { %9520 = vmatprep.subr.bf16.mxu0 %v9736_v37  ;;  %v9563_v27 = vpack.c.bf16 %v5905_v26, %v5904_v25 }
 0xa03   : > { %9534 = vmatpush3.bf16.msra.mxu1 %v9533_v42 }
 0xa04   : > { %9535 = vmatprep.subr.bf16.mxu1 %v9736_v37 }
 0xa05   : > { %9522 = vmatpush3.bf16.msra.mxu0 %v9521_v29  ;;  %v5820_v29 = vld [vmem:[%s11424_s10] sm:$0x1] }
 0xa06   : > { %9523 = vmatprep.subr.bf16.mxu0 %v9736_v37 }
 0xa07   : > { %9537 = vmatpush3.bf16.msra.mxu1 %v9536_v46 }
 0xa08   : > { %9538 = vmatprep.subr.bf16.mxu1 %v9736_v37 }
 0xa09   : > { %9525 = vmatpush3.bf16.msra.mxu0 %v9524_v32 }
 0xa0a   : > { %9526 = vmatprep.subr.bf16.mxu0 %v9736_v37 }
 0xa0b   : > { %9540 = vmatpush3.bf16.msra.mxu1 %v9539_v49 }
 0xa0c   : > { %9541 = vmatprep.subr.bf16.mxu1 %v9736_v37 }
 0xa0d   : > { %9528 = vmatpush3.bf16.msra.mxu0 %v9527_v60 }
 0xa0e   : > { %9550 = vmatprep.subr.bf16.mxu0 %v9736_v37 }
 0xa0f   : > { %9543 = vmatpush3.bf16.msra.mxu1 %v9542_v52 }
 0xa10   : > { %8494 = vmatmul.mubr.msk.f32.vlgmr.msra.gmra.mrb[30].mxu0 %vm5397_vm10, %v5716_v34  ;;  %9544 = vmatprep.subr.bf16.mxu1 %v9736_v37 }
 0xa11   : > { %8551 = vmatprep.mubr.msk.f32.mxu0 %vm9737_vm2, %v9738_v39  ;;  %9552 = vmatpush3.bf16.msra.mxu0 %v9551_v0 }
 0xa12   : > { %9553 = vmatprep.subr.bf16.mxu0 %v9736_v37 }
 0xa13   : > { %9546 = vmatpush3.bf16.msra.mxu1 %v9545_v54 }
 0xa14   : > { %9547 = vmatprep.subr.bf16.mxu1 %v9736_v37 }
 0xa15   : > { %9555 = vmatpush3.bf16.msra.mxu0 %v9554_v2 }
 0xa16   : > { %9556 = vmatprep.subr.bf16.mxu0 %v9736_v37 }
 0xa17   : > { %9549 = vmatpush3.bf16.msra.mxu1 %v9548_v57 }
 0xa18   : > { %8524 = vmatprep.subr.mxu1 %v9738_v39 }
 0xa19   : > { %9558 = vmatpush3.bf16.msra.mxu0 %v9557_v6 }
 0xa1a   : > { %9559 = vmatprep.subr.bf16.mxu0 %v9736_v37 }
 0xa1b   : > { %8525 = vmatpush3.msra.mxu1 %v5819_v58 }
 0xa1d   : > { %9561 = vmatpush3.bf16.msra.mxu0 %v9560_v10 }
 0xa1e   : > { %9562 = vmatprep.subr.bf16.mxu0 %v9736_v37 }
 0xa21   : > { %9564 = vmatpush3.bf16.msra.mxu0 %v9563_v27 }
 0xa22   : > { %8549 = vmatprep.subr.mxu0 %v9738_v39  ;;  %v5907_v39 = vld [vmem:[%s11426_s12] sm:$0x1] }
 0xa25   : > { %8550 = vmatpush3.msk.msra.mxu0 %vm3356_vm7, %v5906_v28 }
 0xabb   : > { %v5467_v11 = vpop.f32.mrb[26].mxu0  ;;  %v5540_v12 = vpop.f32.mrb[30].mxu1 }
 0xabc   : > { %v5541_v13 = vadd.f32 %v5540_v12, %v5467_v11  ;;  %v8403_v14 = vpop.f32.mrb[27].mxu0  ;;  %v8426_v15 = vpop.f32.mrb[31].mxu1 }
 0xacf   : > { %v5625_v5 = vpop.f32.mrb[28].mxu0  ;;  %v5711_v16 = vpop.f32.mrb[32].mxu1 }
 0xad0   : > { %v5629_v7 = vadd.f32 %v5625_v5, %v5541_v13  ;;  %v8449_v17 = vpop.f32.mrb[29].mxu0  ;;  %v8472_v18 = vpop.f32.mrb[33].mxu1 }
 0xad2   : > { %v5715_v19 = vadd.f32 %v5711_v16, %v5629_v7 }
 0xae3   : > { %v5797_v20 = vpop.f32.mrb[30].mxu0 }
 0xae4   : > { %v5801_v22 = vadd.f32 %v5797_v20, %v5715_v19  ;;  %v8495_v23 = vpop.f32.mrb[31].mxu0 }
 0xae6   : > { %v5803_v24 = vadd.f32 %v5802_v21, %v5801_v22 }
 0xae8   : > { %v5804_v37 = vmax.f32 %v5803_v24, 0.0 }
 0xaea   : > { %8527 = vmatmul.mubr.msk.f32.vlgmr.msra.gmra.mrb[34].mxu1 %vm5821_vm11, %v5804_v37 }
 0xbbd   : > { %v5891_v30 = vpop.f32.mrb[34].mxu1 }
 0xbbe   : > { %v5892_v31 = vadd.f32 %v5891_v30, %v5820_v29  ;;  %v8528_v32 = vpop.f32.mrb[35].mxu1 }
 0xbc0   : > { %v5895_v33 = vmax.f32 %v5892_v31, 0.0 }
 0xbc2   : > { %8552 = vmatmul.mubr.msk.f32.vlgmr.msra.gmra.mrb[32].mxu0 %vm3352_vm8, %v5895_v33 }
 0xc95   : > { %v5980_v59 = vpop.f32.mrb[32].mxu0 }
 0xc96   : > { %v5981_v60 = vadd.f32 %v5980_v59, %v5907_v39  ;;  %v8553_v34 = vpop.f32.mrb[33].mxu0 }
 0xc98   : > { %5985 = vst.msk [vmem:[%s432_s22] sm:$0x1] %vm5984_vm12, %v5981_v60 }
 0xc99   : > { %9685 = shalt.err (!%p9682_p3)
}
 0xc9a   : > { %s9686_s0 = scalar_lea.hbm %s11372_s30, 16  ;;  %s9690_s17 = scalar_lea.hbm %s11427_s13, 32 }
 0xc9b   : > { %p9687_p4 = scmp.ne.s32.totalorder %s11372_s30, %s9686_s0  ;;  %p9691_p9 = scmp.lt.u32.totalorder %s11372_s30, %s11427_s13 }
 0xc9c   : > { %p9692_p10 = scmp.lt.u32.totalorder %s9690_s17, %s9686_s0  ;;  %p9694_p12 = scmp.lt.u32.totalorder %s9686_s0, %s11372_s30 }
 0xc9d   : > { %p9688_p7 = pnand %p9687_p4, %p9849_p5 }
 0xc9e   : > { %p9693_p11 = por %p9692_p10, %p9691_p9 }
 0xc9f   : > { %p9689_p8 = pneg %p9688_p7 }
 0xca0   : > { %p9695_p13 = por %p9694_p12, %p9693_p11 }
 0xca2   : > { %p9696_p0 = pnand %p9695_p13, %p9689_p8 }
 0xca4   : > { %9699 = shalt.err (!%p9696_p0)
}
 0xca5   : > { %9629 = dma.vmem_to_hbm [thread:$0]  (%p9849_p5), %s11374_s23, 16, %s11372_s30, %s5987_s15  }
 0xca6 PF: > { %p9635_p1 = scmp.ge.s32.totalorder %s9734_s28, 2  ;;  %s6011_s1 = sand.u32 1, %s9722_s25  }
 0xca7   : > { %s6012_s16 = scalar_lea.sflag [#allocation4], %s6011_s1 }
 0xca8   : > { %p9632_p2 = pnand %p9635_p1, %p9853_p6 }
 0xcaa   : > { %9717 = dma.done.wait (!%p9632_p2), %s6012_s16, 16  }
 0xcab   : > { %9719 = vsyncadd (!%p9632_p2), %s6012_s16, 4294967280  ;;  %s11437_s20 = sld [smem:[#allocation6_spill]]  ;;  %p23_p3 = scmp.ge.s32.totalorder %s9836_s14, 4  }
 0xcac   : > { %s11438_s25 = smov %s9726_s26  ;;  %s11439_s26 = smov %s9730_s27 }
 0xcad   : > { %s11441_s28 = smov %s9836_s14  ;;  %25 = sbr.rel (!%p23_p3) target bundleno = 6 (0x6), region = 147 }
 0xcb1   : > { %s11440_s27 = smov %s11437_s20 }
 0xcb4   :  { %6016 = vsyncpa [#allocation4], 1 }
 0xcb5   :  { %6018 = vsyncpa [#allocation4 + $0x1], 1 }

</bundles_post_ra>
